<compile_context>
chip_gen: v7x
topology: tpu7x:2x2x1
jax: 0.10.0
libtpu: 0.0.40
codegen_flags: <defaults>
</compile_context>

<pallas_src>
import jax
import jax.numpy as jnp
from jax import lax
from jax.experimental import pallas as pl
from jax.experimental.pallas import tpu as pltpu

N, C, H, W = 2, 4, 16, 16        # batch, channels (in == out), spatial
HP, WP = H + 2, W + 2            # zero-padded spatial dims (padding=1)
WIN = H * WP                     # 288 "halo" output positions per (image, channel)
KH = KW = 3
MID_LO = 128                     # lane where the interior (residual / conv output) starts
L0 = MID_LO - (WP + 1)           # = 109: lane where padded-flat position 0 lives
XL = 512                         # lane width of padded flat buffers (>= L0 + HP*WP + 2)
EPS = 1e-5


def _conv3x3(src_ref, w_ref):
    """3x3 conv over the padded flat ("halo") layout as VPU broadcast-FMAs.

    src_ref : (C, XL)            padded-flat input, position q at lane q + L0
    w_ref   : (KH*KW, Cin, Cout, 1) weights (BN scale already folded in)
    returns : (C, WIN) f32,      output halo position p at lane p
    """
    acc = jnp.zeros((C, WIN), jnp.float32)
    for kh in range(KH):
        for kw in range(KW):
            s = L0 + kh * WP + kw                     # static lane offset of this tap
            for ci in range(C):
                # (1, WIN) shifted input row  *  (Cout, 1) weight column
                acc = acc + src_ref[ci:ci + 1, s:s + WIN] * w_ref[kh * KW + kw, ci]
    return acc


def resblock_kernel(x_ref, w1_ref, b1_ref, w2_ref, b2_ref, o_ref, mid_ref):
    # ---- conv1 (BN1 scale folded into weights) + bias + ReLU ----
    y1 = jnp.maximum(_conv3x3(x_ref, w1_ref) + b1_ref[...], 0.0)

    # ---- zero the junk halo columns (flat position % WP >= W); iota mask, no DMA ----
    pos = lax.broadcasted_iota(jnp.int32, (C, WIN), 1)
    row = (pos.astype(jnp.float32) * (1.0 / WP)).astype(jnp.int32)   # == pos // WP (exact here)
    y1 = jnp.where(pos - row * WP < W, y1, 0.0)

    # ---- scatter into the zero-bordered intermediate buffer (aligned stores only) ----
    mid_ref[:, :MID_LO] = jnp.zeros((C, MID_LO), jnp.float32)          # left halo tile
    mid_ref[:, 3 * 128:] = jnp.zeros((C, XL - 3 * 128), jnp.float32)   # right halo tile
    mid_ref[:, MID_LO:MID_LO + WIN] = y1                               # 128-lane aligned store

    # ---- conv2 (BN2 scale folded) + bias, residual add, ReLU ----
    y2 = _conv3x3(mid_ref, w2_ref) + b2_ref[...]
    resid = x_ref[:, MID_LO:MID_LO + WIN]                              # 128-lane aligned read
    o_ref[...] = jnp.maximum(y2 + resid, 0.0)


def res_basic_block(x_nchw, w1, g1, be1, m1, v1, w2, g2, be2, m2, v2):
    # fold BN (eval mode): scale goes into the conv weights, bias stays separate
    s1 = g1 / jnp.sqrt(v1 + EPS)
    s2 = g2 / jnp.sqrt(v2 + EPS)
    b1 = (be1 - m1 * s1).reshape(C, 1)
    b2 = (be2 - m2 * s2).reshape(C, 1)
    # PyTorch OIHW conv weights -> (9 taps, Cin, Cout, 1) with BN scale folded in
    w1_t = (jnp.transpose(w1, (2, 3, 1, 0)).reshape(KH * KW, C, C) * s1[None, None, :])[..., None]
    w2_t = (jnp.transpose(w2, (2, 3, 1, 0)).reshape(KH * KW, C, C) * s2[None, None, :])[..., None]
    # NCHW -> (N, C, HP*WP) zero-padded flat rows, placed at lane offset L0
    x_pad = jnp.pad(x_nchw, ((0, 0), (0, 0), (1, 1), (1, 1)))          # (N, C, HP, WP)
    x_flat = jnp.pad(x_pad.reshape(N, C, HP * WP),
                     ((0, 0), (0, 0), (L0, XL - L0 - HP * WP)))        # (N, C, XL)

    out_flat = pl.pallas_call(
        resblock_kernel,
        out_shape=jax.ShapeDtypeStruct((N, C, WIN), jnp.float32),
        grid_spec=pltpu.PrefetchScalarGridSpec(
            num_scalar_prefetch=0,
            grid=(N,),
            in_specs=[
                pl.BlockSpec((None, C, XL), lambda n: (n, 0, 0)),           # x (flat, lane-dense)
                pl.BlockSpec((KH * KW, C, C, 1), lambda n: (0, 0, 0, 0)),   # conv1 weights
                pl.BlockSpec((C, 1), lambda n: (0, 0)),                     # bn1 bias
                pl.BlockSpec((KH * KW, C, C, 1), lambda n: (0, 0, 0, 0)),   # conv2 weights
                pl.BlockSpec((C, 1), lambda n: (0, 0)),                     # bn2 bias
            ],
            out_specs=pl.BlockSpec((None, C, WIN), lambda n: (n, 0, 0)),
            scratch_shapes=[pltpu.VMEM((C, XL), jnp.float32)],              # padded intermediate
        ),
        compiler_params=pltpu.CompilerParams(dimension_semantics=("parallel",)),
    )(x_flat, w1_t, b1, w2_t, b2)

    # halo layout (N, C, H*WP) -> NCHW, dropping the 2 junk columns per row
    return out_flat.reshape(N, C, H, WP)[:, :, :, :W]


# ---------------- pure-JAX reference (same eval-mode BN semantics) ----------------
def _conv3x3_ref(x_nhwc, w_oihw):
    w_hwio = jnp.transpose(w_oihw, (2, 3, 1, 0))
    return lax.conv_general_dilated(x_nhwc, w_hwio, (1, 1), "SAME",
                                    dimension_numbers=("NHWC", "HWIO", "NHWC"))


def res_basic_block_ref(x_nchw, w1, g1, be1, m1, v1, w2, g2, be2, m2, v2):
    def bn(y, g, be, m, v):
        return (y - m) / jnp.sqrt(v + EPS) * g + be
    x = jnp.transpose(x_nchw, (0, 2, 3, 1))
    out = jnp.maximum(bn(_conv3x3_ref(x, w1), g1, be1, m1, v1), 0.0)
    out = bn(_conv3x3_ref(out, w2), g2, be2, m2, v2)
    out = jnp.maximum(out + x, 0.0)
    return jnp.transpose(out, (0, 3, 1, 2))


if __name__ == "__main__":
    key = jax.random.PRNGKey(0)
    ks = jax.random.split(key, 11)
    x = jax.random.normal(ks[0], (N, C, H, W), jnp.float32)
    w1 = jax.random.normal(ks[1], (C, C, 3, 3), jnp.float32) * 0.2
    w2 = jax.random.normal(ks[2], (C, C, 3, 3), jnp.float32) * 0.2
    g1 = 1.0 + 0.1 * jax.random.normal(ks[3], (C,), jnp.float32)
    be1 = 0.1 * jax.random.normal(ks[4], (C,), jnp.float32)
    m1 = 0.1 * jax.random.normal(ks[5], (C,), jnp.float32)
    v1 = 1.0 + 0.1 * jnp.abs(jax.random.normal(ks[6], (C,), jnp.float32))
    g2 = 1.0 + 0.1 * jax.random.normal(ks[7], (C,), jnp.float32)
    be2 = 0.1 * jax.random.normal(ks[8], (C,), jnp.float32)
    m2 = 0.1 * jax.random.normal(ks[9], (C,), jnp.float32)
    v2 = 1.0 + 0.1 * jnp.abs(jax.random.normal(ks[10], (C,), jnp.float32))

    out = res_basic_block(x, w1, g1, be1, m1, v1, w2, g2, be2, m2, v2)
    out = jax.block_until_ready(out)

    ref = res_basic_block_ref(x, w1, g1, be1, m1, v1, w2, g2, be2, m2, v2)
    assert out.shape == (N, C, H, W), out.shape
    err = float(jnp.max(jnp.abs(out - ref)))
    assert jnp.allclose(out, ref, atol=1e-4, rtol=1e-4), f"max abs err {err}"
    print("KERNEL_OK")
</pallas_src>

<mosaic_0001>
module attributes {stable_mosaic.version = 11 : i64} {
  func.func @resblock_kernel(%arg0: i32, %arg1: memref<1x4x512xf32, #tpu.memory_space<vmem>>, %arg2: memref<9x4x4x1xf32, #tpu.memory_space<vmem>>, %arg3: memref<4x1xf32, #tpu.memory_space<vmem>>, %arg4: memref<9x4x4x1xf32, #tpu.memory_space<vmem>>, %arg5: memref<4x1xf32, #tpu.memory_space<vmem>>, %arg6: memref<1x4x288xf32, #tpu.memory_space<vmem>>, %arg7: memref<4x512xf32, #tpu.memory_space<vmem>>) attributes {dimension_semantics = [#tpu.dimension_semantics<parallel>], iteration_bounds = array<i64: 2>, scalar_prefetch = 0 : i64, scratch_operands = 1 : i64, tpu.core_type = #tpu.core_type<tc>, window_params = [{transform_indices = @transform_0, window_bounds = array<i64: 1, 4, 512>}, {pipeline_mode = #tpu.pipeline_mode<synchronous>, transform_indices = @transform_1, window_bounds = array<i64: 9, 4, 4, 1>}, {pipeline_mode = #tpu.pipeline_mode<synchronous>, transform_indices = @transform_2, window_bounds = array<i64: 4, 1>}, {pipeline_mode = #tpu.pipeline_mode<synchronous>, transform_indices = @transform_3, window_bounds = array<i64: 9, 4, 4, 1>}, {pipeline_mode = #tpu.pipeline_mode<synchronous>, transform_indices = @transform_4, window_bounds = array<i64: 4, 1>}, {transform_indices = @transform_5, window_bounds = array<i64: 1, 4, 288>}]} {
    %cst = arith.constant 0.000000e+00 : f32
    %0 = vector.broadcast %cst : f32 to vector<4x288xf32>
    %c0 = arith.constant 0 : index
    %c0_0 = arith.constant 0 : index
    %c109 = arith.constant 109 : index
    %1 = vector.load %arg1[%c0, %c0_0, %c109] : memref<1x4x512xf32, #tpu.memory_space<vmem>>, vector<1x1x288xf32>
    %2 = vector.shape_cast %1 : vector<1x1x288xf32> to vector<1x288xf32>
    %c0_1 = arith.constant 0 : index
    %c0_2 = arith.constant 0 : index
    %c0_3 = arith.constant 0 : index
    %c0_4 = arith.constant 0 : index
    %3 = vector.load %arg2[%c0_1, %c0_2, %c0_3, %c0_4] : memref<9x4x4x1xf32, #tpu.memory_space<vmem>>, vector<1x1x4x1xf32>
    %4 = vector.shape_cast %3 : vector<1x1x4x1xf32> to vector<4x1xf32>
    %5 = vector.broadcast %2 : vector<1x288xf32> to vector<4x288xf32>
    %6 = vector.broadcast %4 : vector<4x1xf32> to vector<4x288xf32>
    %7 = arith.mulf %5, %6 : vector<4x288xf32>
    %8 = arith.addf %0, %7 : vector<4x288xf32>
    %c0_5 = arith.constant 0 : index
    %c1 = arith.constant 1 : index
    %c109_6 = arith.constant 109 : index
    %9 = vector.load %arg1[%c0_5, %c1, %c109_6] : memref<1x4x512xf32, #tpu.memory_space<vmem>>, vector<1x1x288xf32>
    %10 = vector.shape_cast %9 : vector<1x1x288xf32> to vector<1x288xf32>
    %c0_7 = arith.constant 0 : index
    %c1_8 = arith.constant 1 : index
    %c0_9 = arith.constant 0 : index
    %c0_10 = arith.constant 0 : index
    %11 = vector.load %arg2[%c0_7, %c1_8, %c0_9, %c0_10] : memref<9x4x4x1xf32, #tpu.memory_space<vmem>>, vector<1x1x4x1xf32>
    %12 = vector.shape_cast %11 : vector<1x1x4x1xf32> to vector<4x1xf32>
    %13 = vector.broadcast %10 : vector<1x288xf32> to vector<4x288xf32>
    %14 = vector.broadcast %12 : vector<4x1xf32> to vector<4x288xf32>
    %15 = arith.mulf %13, %14 : vector<4x288xf32>
    %16 = arith.addf %8, %15 : vector<4x288xf32>
    %c0_11 = arith.constant 0 : index
    %c2 = arith.constant 2 : index
    %c109_12 = arith.constant 109 : index
    %17 = vector.load %arg1[%c0_11, %c2, %c109_12] : memref<1x4x512xf32, #tpu.memory_space<vmem>>, vector<1x1x288xf32>
    %18 = vector.shape_cast %17 : vector<1x1x288xf32> to vector<1x288xf32>
    %c0_13 = arith.constant 0 : index
    %c2_14 = arith.constant 2 : index
    %c0_15 = arith.constant 0 : index
    %c0_16 = arith.constant 0 : index
    %19 = vector.load %arg2[%c0_13, %c2_14, %c0_15, %c0_16] : memref<9x4x4x1xf32, #tpu.memory_space<vmem>>, vector<1x1x4x1xf32>
    %20 = vector.shape_cast %19 : vector<1x1x4x1xf32> to vector<4x1xf32>
    %21 = vector.broadcast %18 : vector<1x288xf32> to vector<4x288xf32>
    %22 = vector.broadcast %20 : vector<4x1xf32> to vector<4x288xf32>
    %23 = arith.mulf %21, %22 : vector<4x288xf32>
    %24 = arith.addf %16, %23 : vector<4x288xf32>
    %c0_17 = arith.constant 0 : index
    %c3 = arith.constant 3 : index
    %c109_18 = arith.constant 109 : index
    %25 = vector.load %arg1[%c0_17, %c3, %c109_18] : memref<1x4x512xf32, #tpu.memory_space<vmem>>, vector<1x1x288xf32>
    %26 = vector.shape_cast %25 : vector<1x1x288xf32> to vector<1x288xf32>
    %c0_19 = arith.constant 0 : index
    %c3_20 = arith.constant 3 : index
    %c0_21 = arith.constant 0 : index
    %c0_22 = arith.constant 0 : index
    %27 = vector.load %arg2[%c0_19, %c3_20, %c0_21, %c0_22] : memref<9x4x4x1xf32, #tpu.memory_space<vmem>>, vector<1x1x4x1xf32>
    %28 = vector.shape_cast %27 : vector<1x1x4x1xf32> to vector<4x1xf32>
    %29 = vector.broadcast %26 : vector<1x288xf32> to vector<4x288xf32>
    %30 = vector.broadcast %28 : vector<4x1xf32> to vector<4x288xf32>
    %31 = arith.mulf %29, %30 : vector<4x288xf32>
    %32 = arith.addf %24, %31 : vector<4x288xf32>
    %c0_23 = arith.constant 0 : index
    %c0_24 = arith.constant 0 : index
    %c110 = arith.constant 110 : index
    %33 = vector.load %arg1[%c0_23, %c0_24, %c110] : memref<1x4x512xf32, #tpu.memory_space<vmem>>, vector<1x1x288xf32>
    %34 = vector.shape_cast %33 : vector<1x1x288xf32> to vector<1x288xf32>
    %c1_25 = arith.constant 1 : index
    %c0_26 = arith.constant 0 : index
    %c0_27 = arith.constant 0 : index
    %c0_28 = arith.constant 0 : index
    %35 = vector.load %arg2[%c1_25, %c0_26, %c0_27, %c0_28] : memref<9x4x4x1xf32, #tpu.memory_space<vmem>>, vector<1x1x4x1xf32>
    %36 = vector.shape_cast %35 : vector<1x1x4x1xf32> to vector<4x1xf32>
    %37 = vector.broadcast %34 : vector<1x288xf32> to vector<4x288xf32>
    %38 = vector.broadcast %36 : vector<4x1xf32> to vector<4x288xf32>
    %39 = arith.mulf %37, %38 : vector<4x288xf32>
    %40 = arith.addf %32, %39 : vector<4x288xf32>
    %c0_29 = arith.constant 0 : index
    %c1_30 = arith.constant 1 : index
    %c110_31 = arith.constant 110 : index
    %41 = vector.load %arg1[%c0_29, %c1_30, %c110_31] : memref<1x4x512xf32, #tpu.memory_space<vmem>>, vector<1x1x288xf32>
    %42 = vector.shape_cast %41 : vector<1x1x288xf32> to vector<1x288xf32>
    %c1_32 = arith.constant 1 : index
    %c1_33 = arith.constant 1 : index
    %c0_34 = arith.constant 0 : index
    %c0_35 = arith.constant 0 : index
    %43 = vector.load %arg2[%c1_32, %c1_33, %c0_34, %c0_35] : memref<9x4x4x1xf32, #tpu.memory_space<vmem>>, vector<1x1x4x1xf32>
    %44 = vector.shape_cast %43 : vector<1x1x4x1xf32> to vector<4x1xf32>
    %45 = vector.broadcast %42 : vector<1x288xf32> to vector<4x288xf32>
    %46 = vector.broadcast %44 : vector<4x1xf32> to vector<4x288xf32>
    %47 = arith.mulf %45, %46 : vector<4x288xf32>
    %48 = arith.addf %40, %47 : vector<4x288xf32>
    %c0_36 = arith.constant 0 : index
    %c2_37 = arith.constant 2 : index
    %c110_38 = arith.constant 110 : index
    %49 = vector.load %arg1[%c0_36, %c2_37, %c110_38] : memref<1x4x512xf32, #tpu.memory_space<vmem>>, vector<1x1x288xf32>
    %50 = vector.shape_cast %49 : vector<1x1x288xf32> to vector<1x288xf32>
    %c1_39 = arith.constant 1 : index
    %c2_40 = arith.constant 2 : index
    %c0_41 = arith.constant 0 : index
    %c0_42 = arith.constant 0 : index
    %51 = vector.load %arg2[%c1_39, %c2_40, %c0_41, %c0_42] : memref<9x4x4x1xf32, #tpu.memory_space<vmem>>, vector<1x1x4x1xf32>
    %52 = vector.shape_cast %51 : vector<1x1x4x1xf32> to vector<4x1xf32>
    %53 = vector.broadcast %50 : vector<1x288xf32> to vector<4x288xf32>
    %54 = vector.broadcast %52 : vector<4x1xf32> to vector<4x288xf32>
    %55 = arith.mulf %53, %54 : vector<4x288xf32>
    %56 = arith.addf %48, %55 : vector<4x288xf32>
    %c0_43 = arith.constant 0 : index
    %c3_44 = arith.constant 3 : index
    %c110_45 = arith.constant 110 : index
    %57 = vector.load %arg1[%c0_43, %c3_44, %c110_45] : memref<1x4x512xf32, #tpu.memory_space<vmem>>, vector<1x1x288xf32>
    %58 = vector.shape_cast %57 : vector<1x1x288xf32> to vector<1x288xf32>
    %c1_46 = arith.constant 1 : index
    %c3_47 = arith.constant 3 : index
    %c0_48 = arith.constant 0 : index
    %c0_49 = arith.constant 0 : index
    %59 = vector.load %arg2[%c1_46, %c3_47, %c0_48, %c0_49] : memref<9x4x4x1xf32, #tpu.memory_space<vmem>>, vector<1x1x4x1xf32>
    %60 = vector.shape_cast %59 : vector<1x1x4x1xf32> to vector<4x1xf32>
    %61 = vector.broadcast %58 : vector<1x288xf32> to vector<4x288xf32>
    %62 = vector.broadcast %60 : vector<4x1xf32> to vector<4x288xf32>
    %63 = arith.mulf %61, %62 : vector<4x288xf32>
    %64 = arith.addf %56, %63 : vector<4x288xf32>
    %c0_50 = arith.constant 0 : index
    %c0_51 = arith.constant 0 : index
    %c111 = arith.constant 111 : index
    %65 = vector.load %arg1[%c0_50, %c0_51, %c111] : memref<1x4x512xf32, #tpu.memory_space<vmem>>, vector<1x1x288xf32>
    %66 = vector.shape_cast %65 : vector<1x1x288xf32> to vector<1x288xf32>
    %c2_52 = arith.constant 2 : index
    %c0_53 = arith.constant 0 : index
    %c0_54 = arith.constant 0 : index
    %c0_55 = arith.constant 0 : index
    %67 = vector.load %arg2[%c2_52, %c0_53, %c0_54, %c0_55] : memref<9x4x4x1xf32, #tpu.memory_space<vmem>>, vector<1x1x4x1xf32>
    %68 = vector.shape_cast %67 : vector<1x1x4x1xf32> to vector<4x1xf32>
    %69 = vector.broadcast %66 : vector<1x288xf32> to vector<4x288xf32>
    %70 = vector.broadcast %68 : vector<4x1xf32> to vector<4x288xf32>
    %71 = arith.mulf %69, %70 : vector<4x288xf32>
    %72 = arith.addf %64, %71 : vector<4x288xf32>
    %c0_56 = arith.constant 0 : index
    %c1_57 = arith.constant 1 : index
    %c111_58 = arith.constant 111 : index
    %73 = vector.load %arg1[%c0_56, %c1_57, %c111_58] : memref<1x4x512xf32, #tpu.memory_space<vmem>>, vector<1x1x288xf32>
    %74 = vector.shape_cast %73 : vector<1x1x288xf32> to vector<1x288xf32>
    %c2_59 = arith.constant 2 : index
    %c1_60 = arith.constant 1 : index
    %c0_61 = arith.constant 0 : index
    %c0_62 = arith.constant 0 : index
    %75 = vector.load %arg2[%c2_59, %c1_60, %c0_61, %c0_62] : memref<9x4x4x1xf32, #tpu.memory_space<vmem>>, vector<1x1x4x1xf32>
    %76 = vector.shape_cast %75 : vector<1x1x4x1xf32> to vector<4x1xf32>
    %77 = vector.broadcast %74 : vector<1x288xf32> to vector<4x288xf32>
    %78 = vector.broadcast %76 : vector<4x1xf32> to vector<4x288xf32>
    %79 = arith.mulf %77, %78 : vector<4x288xf32>
    %80 = arith.addf %72, %79 : vector<4x288xf32>
    %c0_63 = arith.constant 0 : index
    %c2_64 = arith.constant 2 : index
    %c111_65 = arith.constant 111 : index
    %81 = vector.load %arg1[%c0_63, %c2_64, %c111_65] : memref<1x4x512xf32, #tpu.memory_space<vmem>>, vector<1x1x288xf32>
    %82 = vector.shape_cast %81 : vector<1x1x288xf32> to vector<1x288xf32>
    %c2_66 = arith.constant 2 : index
    %c2_67 = arith.constant 2 : index
    %c0_68 = arith.constant 0 : index
    %c0_69 = arith.constant 0 : index
    %83 = vector.load %arg2[%c2_66, %c2_67, %c0_68, %c0_69] : memref<9x4x4x1xf32, #tpu.memory_space<vmem>>, vector<1x1x4x1xf32>
    %84 = vector.shape_cast %83 : vector<1x1x4x1xf32> to vector<4x1xf32>
    %85 = vector.broadcast %82 : vector<1x288xf32> to vector<4x288xf32>
    %86 = vector.broadcast %84 : vector<4x1xf32> to vector<4x288xf32>
    %87 = arith.mulf %85, %86 : vector<4x288xf32>
    %88 = arith.addf %80, %87 : vector<4x288xf32>
    %c0_70 = arith.constant 0 : index
    %c3_71 = arith.constant 3 : index
    %c111_72 = arith.constant 111 : index
    %89 = vector.load %arg1[%c0_70, %c3_71, %c111_72] : memref<1x4x512xf32, #tpu.memory_space<vmem>>, vector<1x1x288xf32>
    %90 = vector.shape_cast %89 : vector<1x1x288xf32> to vector<1x288xf32>
    %c2_73 = arith.constant 2 : index
    %c3_74 = arith.constant 3 : index
    %c0_75 = arith.constant 0 : index
    %c0_76 = arith.constant 0 : index
    %91 = vector.load %arg2[%c2_73, %c3_74, %c0_75, %c0_76] : memref<9x4x4x1xf32, #tpu.memory_space<vmem>>, vector<1x1x4x1xf32>
    %92 = vector.shape_cast %91 : vector<1x1x4x1xf32> to vector<4x1xf32>
    %93 = vector.broadcast %90 : vector<1x288xf32> to vector<4x288xf32>
    %94 = vector.broadcast %92 : vector<4x1xf32> to vector<4x288xf32>
    %95 = arith.mulf %93, %94 : vector<4x288xf32>
    %96 = arith.addf %88, %95 : vector<4x288xf32>
    %c0_77 = arith.constant 0 : index
    %c0_78 = arith.constant 0 : index
    %c127 = arith.constant 127 : index
    %97 = vector.load %arg1[%c0_77, %c0_78, %c127] : memref<1x4x512xf32, #tpu.memory_space<vmem>>, vector<1x1x288xf32>
    %98 = vector.shape_cast %97 : vector<1x1x288xf32> to vector<1x288xf32>
    %c3_79 = arith.constant 3 : index
    %c0_80 = arith.constant 0 : index
    %c0_81 = arith.constant 0 : index
    %c0_82 = arith.constant 0 : index
    %99 = vector.load %arg2[%c3_79, %c0_80, %c0_81, %c0_82] : memref<9x4x4x1xf32, #tpu.memory_space<vmem>>, vector<1x1x4x1xf32>
    %100 = vector.shape_cast %99 : vector<1x1x4x1xf32> to vector<4x1xf32>
    %101 = vector.broadcast %98 : vector<1x288xf32> to vector<4x288xf32>
    %102 = vector.broadcast %100 : vector<4x1xf32> to vector<4x288xf32>
    %103 = arith.mulf %101, %102 : vector<4x288xf32>
    %104 = arith.addf %96, %103 : vector<4x288xf32>
    %c0_83 = arith.constant 0 : index
    %c1_84 = arith.constant 1 : index
    %c127_85 = arith.constant 127 : index
    %105 = vector.load %arg1[%c0_83, %c1_84, %c127_85] : memref<1x4x512xf32, #tpu.memory_space<vmem>>, vector<1x1x288xf32>
    %106 = vector.shape_cast %105 : vector<1x1x288xf32> to vector<1x288xf32>
    %c3_86 = arith.constant 3 : index
    %c1_87 = arith.constant 1 : index
    %c0_88 = arith.constant 0 : index
    %c0_89 = arith.constant 0 : index
    %107 = vector.load %arg2[%c3_86, %c1_87, %c0_88, %c0_89] : memref<9x4x4x1xf32, #tpu.memory_space<vmem>>, vector<1x1x4x1xf32>
    %108 = vector.shape_cast %107 : vector<1x1x4x1xf32> to vector<4x1xf32>
    %109 = vector.broadcast %106 : vector<1x288xf32> to vector<4x288xf32>
    %110 = vector.broadcast %108 : vector<4x1xf32> to vector<4x288xf32>
    %111 = arith.mulf %109, %110 : vector<4x288xf32>
    %112 = arith.addf %104, %111 : vector<4x288xf32>
    %c0_90 = arith.constant 0 : index
    %c2_91 = arith.constant 2 : index
    %c127_92 = arith.constant 127 : index
    %113 = vector.load %arg1[%c0_90, %c2_91, %c127_92] : memref<1x4x512xf32, #tpu.memory_space<vmem>>, vector<1x1x288xf32>
    %114 = vector.shape_cast %113 : vector<1x1x288xf32> to vector<1x288xf32>
    %c3_93 = arith.constant 3 : index
    %c2_94 = arith.constant 2 : index
    %c0_95 = arith.constant 0 : index
    %c0_96 = arith.constant 0 : index
    %115 = vector.load %arg2[%c3_93, %c2_94, %c0_95, %c0_96] : memref<9x4x4x1xf32, #tpu.memory_space<vmem>>, vector<1x1x4x1xf32>
    %116 = vector.shape_cast %115 : vector<1x1x4x1xf32> to vector<4x1xf32>
    %117 = vector.broadcast %114 : vector<1x288xf32> to vector<4x288xf32>
    %118 = vector.broadcast %116 : vector<4x1xf32> to vector<4x288xf32>
    %119 = arith.mulf %117, %118 : vector<4x288xf32>
    %120 = arith.addf %112, %119 : vector<4x288xf32>
    %c0_97 = arith.constant 0 : index
    %c3_98 = arith.constant 3 : index
    %c127_99 = arith.constant 127 : index
    %121 = vector.load %arg1[%c0_97, %c3_98, %c127_99] : memref<1x4x512xf32, #tpu.memory_space<vmem>>, vector<1x1x288xf32>
    %122 = vector.shape_cast %121 : vector<1x1x288xf32> to vector<1x288xf32>
    %c3_100 = arith.constant 3 : index
    %c3_101 = arith.constant 3 : index
    %c0_102 = arith.constant 0 : index
    %c0_103 = arith.constant 0 : index
    %123 = vector.load %arg2[%c3_100, %c3_101, %c0_102, %c0_103] : memref<9x4x4x1xf32, #tpu.memory_space<vmem>>, vector<1x1x4x1xf32>
    %124 = vector.shape_cast %123 : vector<1x1x4x1xf32> to vector<4x1xf32>
    %125 = vector.broadcast %122 : vector<1x288xf32> to vector<4x288xf32>
    %126 = vector.broadcast %124 : vector<4x1xf32> to vector<4x288xf32>
    %127 = arith.mulf %125, %126 : vector<4x288xf32>
    %128 = arith.addf %120, %127 : vector<4x288xf32>
    %c0_104 = arith.constant 0 : index
    %c0_105 = arith.constant 0 : index
    %c128 = arith.constant 128 : index
    %129 = vector.load %arg1[%c0_104, %c0_105, %c128] : memref<1x4x512xf32, #tpu.memory_space<vmem>>, vector<1x1x288xf32>
    %130 = vector.shape_cast %129 : vector<1x1x288xf32> to vector<1x288xf32>
    %c4 = arith.constant 4 : index
    %c0_106 = arith.constant 0 : index
    %c0_107 = arith.constant 0 : index
    %c0_108 = arith.constant 0 : index
    %131 = vector.load %arg2[%c4, %c0_106, %c0_107, %c0_108] : memref<9x4x4x1xf32, #tpu.memory_space<vmem>>, vector<1x1x4x1xf32>
    %132 = vector.shape_cast %131 : vector<1x1x4x1xf32> to vector<4x1xf32>
    %133 = vector.broadcast %130 : vector<1x288xf32> to vector<4x288xf32>
    %134 = vector.broadcast %132 : vector<4x1xf32> to vector<4x288xf32>
    %135 = arith.mulf %133, %134 : vector<4x288xf32>
    %136 = arith.addf %128, %135 : vector<4x288xf32>
    %c0_109 = arith.constant 0 : index
    %c1_110 = arith.constant 1 : index
    %c128_111 = arith.constant 128 : index
    %137 = vector.load %arg1[%c0_109, %c1_110, %c128_111] : memref<1x4x512xf32, #tpu.memory_space<vmem>>, vector<1x1x288xf32>
    %138 = vector.shape_cast %137 : vector<1x1x288xf32> to vector<1x288xf32>
    %c4_112 = arith.constant 4 : index
    %c1_113 = arith.constant 1 : index
    %c0_114 = arith.constant 0 : index
    %c0_115 = arith.constant 0 : index
    %139 = vector.load %arg2[%c4_112, %c1_113, %c0_114, %c0_115] : memref<9x4x4x1xf32, #tpu.memory_space<vmem>>, vector<1x1x4x1xf32>
    %140 = vector.shape_cast %139 : vector<1x1x4x1xf32> to vector<4x1xf32>
    %141 = vector.broadcast %138 : vector<1x288xf32> to vector<4x288xf32>
    %142 = vector.broadcast %140 : vector<4x1xf32> to vector<4x288xf32>
    %143 = arith.mulf %141, %142 : vector<4x288xf32>
    %144 = arith.addf %136, %143 : vector<4x288xf32>
    %c0_116 = arith.constant 0 : index
    %c2_117 = arith.constant 2 : index
    %c128_118 = arith.constant 128 : index
    %145 = vector.load %arg1[%c0_116, %c2_117, %c128_118] : memref<1x4x512xf32, #tpu.memory_space<vmem>>, vector<1x1x288xf32>
    %146 = vector.shape_cast %145 : vector<1x1x288xf32> to vector<1x288xf32>
    %c4_119 = arith.constant 4 : index
    %c2_120 = arith.constant 2 : index
    %c0_121 = arith.constant 0 : index
    %c0_122 = arith.constant 0 : index
    %147 = vector.load %arg2[%c4_119, %c2_120, %c0_121, %c0_122] : memref<9x4x4x1xf32, #tpu.memory_space<vmem>>, vector<1x1x4x1xf32>
    %148 = vector.shape_cast %147 : vector<1x1x4x1xf32> to vector<4x1xf32>
    %149 = vector.broadcast %146 : vector<1x288xf32> to vector<4x288xf32>
    %150 = vector.broadcast %148 : vector<4x1xf32> to vector<4x288xf32>
    %151 = arith.mulf %149, %150 : vector<4x288xf32>
    %152 = arith.addf %144, %151 : vector<4x288xf32>
    %c0_123 = arith.constant 0 : index
    %c3_124 = arith.constant 3 : index
    %c128_125 = arith.constant 128 : index
    %153 = vector.load %arg1[%c0_123, %c3_124, %c128_125] : memref<1x4x512xf32, #tpu.memory_space<vmem>>, vector<1x1x288xf32>
    %154 = vector.shape_cast %153 : vector<1x1x288xf32> to vector<1x288xf32>
    %c4_126 = arith.constant 4 : index
    %c3_127 = arith.constant 3 : index
    %c0_128 = arith.constant 0 : index
    %c0_129 = arith.constant 0 : index
    %155 = vector.load %arg2[%c4_126, %c3_127, %c0_128, %c0_129] : memref<9x4x4x1xf32, #tpu.memory_space<vmem>>, vector<1x1x4x1xf32>
    %156 = vector.shape_cast %155 : vector<1x1x4x1xf32> to vector<4x1xf32>
    %157 = vector.broadcast %154 : vector<1x288xf32> to vector<4x288xf32>
    %158 = vector.broadcast %156 : vector<4x1xf32> to vector<4x288xf32>
    %159 = arith.mulf %157, %158 : vector<4x288xf32>
    %160 = arith.addf %152, %159 : vector<4x288xf32>
    %c0_130 = arith.constant 0 : index
    %c0_131 = arith.constant 0 : index
    %c129 = arith.constant 129 : index
    %161 = vector.load %arg1[%c0_130, %c0_131, %c129] : memref<1x4x512xf32, #tpu.memory_space<vmem>>, vector<1x1x288xf32>
    %162 = vector.shape_cast %161 : vector<1x1x288xf32> to vector<1x288xf32>
    %c5 = arith.constant 5 : index
    %c0_132 = arith.constant 0 : index
    %c0_133 = arith.constant 0 : index
    %c0_134 = arith.constant 0 : index
    %163 = vector.load %arg2[%c5, %c0_132, %c0_133, %c0_134] : memref<9x4x4x1xf32, #tpu.memory_space<vmem>>, vector<1x1x4x1xf32>
    %164 = vector.shape_cast %163 : vector<1x1x4x1xf32> to vector<4x1xf32>
    %165 = vector.broadcast %162 : vector<1x288xf32> to vector<4x288xf32>
    %166 = vector.broadcast %164 : vector<4x1xf32> to vector<4x288xf32>
    %167 = arith.mulf %165, %166 : vector<4x288xf32>
    %168 = arith.addf %160, %167 : vector<4x288xf32>
    %c0_135 = arith.constant 0 : index
    %c1_136 = arith.constant 1 : index
    %c129_137 = arith.constant 129 : index
    %169 = vector.load %arg1[%c0_135, %c1_136, %c129_137] : memref<1x4x512xf32, #tpu.memory_space<vmem>>, vector<1x1x288xf32>
    %170 = vector.shape_cast %169 : vector<1x1x288xf32> to vector<1x288xf32>
    %c5_138 = arith.constant 5 : index
    %c1_139 = arith.constant 1 : index
    %c0_140 = arith.constant 0 : index
    %c0_141 = arith.constant 0 : index
    %171 = vector.load %arg2[%c5_138, %c1_139, %c0_140, %c0_141] : memref<9x4x4x1xf32, #tpu.memory_space<vmem>>, vector<1x1x4x1xf32>
    %172 = vector.shape_cast %171 : vector<1x1x4x1xf32> to vector<4x1xf32>
    %173 = vector.broadcast %170 : vector<1x288xf32> to vector<4x288xf32>
    %174 = vector.broadcast %172 : vector<4x1xf32> to vector<4x288xf32>
    %175 = arith.mulf %173, %174 : vector<4x288xf32>
    %176 = arith.addf %168, %175 : vector<4x288xf32>
    %c0_142 = arith.constant 0 : index
    %c2_143 = arith.constant 2 : index
    %c129_144 = arith.constant 129 : index
    %177 = vector.load %arg1[%c0_142, %c2_143, %c129_144] : memref<1x4x512xf32, #tpu.memory_space<vmem>>, vector<1x1x288xf32>
    %178 = vector.shape_cast %177 : vector<1x1x288xf32> to vector<1x288xf32>
    %c5_145 = arith.constant 5 : index
    %c2_146 = arith.constant 2 : index
    %c0_147 = arith.constant 0 : index
    %c0_148 = arith.constant 0 : index
    %179 = vector.load %arg2[%c5_145, %c2_146, %c0_147, %c0_148] : memref<9x4x4x1xf32, #tpu.memory_space<vmem>>, vector<1x1x4x1xf32>
    %180 = vector.shape_cast %179 : vector<1x1x4x1xf32> to vector<4x1xf32>
    %181 = vector.broadcast %178 : vector<1x288xf32> to vector<4x288xf32>
    %182 = vector.broadcast %180 : vector<4x1xf32> to vector<4x288xf32>
    %183 = arith.mulf %181, %182 : vector<4x288xf32>
    %184 = arith.addf %176, %183 : vector<4x288xf32>
    %c0_149 = arith.constant 0 : index
    %c3_150 = arith.constant 3 : index
    %c129_151 = arith.constant 129 : index
    %185 = vector.load %arg1[%c0_149, %c3_150, %c129_151] : memref<1x4x512xf32, #tpu.memory_space<vmem>>, vector<1x1x288xf32>
    %186 = vector.shape_cast %185 : vector<1x1x288xf32> to vector<1x288xf32>
    %c5_152 = arith.constant 5 : index
    %c3_153 = arith.constant 3 : index
    %c0_154 = arith.constant 0 : index
    %c0_155 = arith.constant 0 : index
    %187 = vector.load %arg2[%c5_152, %c3_153, %c0_154, %c0_155] : memref<9x4x4x1xf32, #tpu.memory_space<vmem>>, vector<1x1x4x1xf32>
    %188 = vector.shape_cast %187 : vector<1x1x4x1xf32> to vector<4x1xf32>
    %189 = vector.broadcast %186 : vector<1x288xf32> to vector<4x288xf32>
    %190 = vector.broadcast %188 : vector<4x1xf32> to vector<4x288xf32>
    %191 = arith.mulf %189, %190 : vector<4x288xf32>
    %192 = arith.addf %184, %191 : vector<4x288xf32>
    %c0_156 = arith.constant 0 : index
    %c0_157 = arith.constant 0 : index
    %c145 = arith.constant 145 : index
    %193 = vector.load %arg1[%c0_156, %c0_157, %c145] : memref<1x4x512xf32, #tpu.memory_space<vmem>>, vector<1x1x288xf32>
    %194 = vector.shape_cast %193 : vector<1x1x288xf32> to vector<1x288xf32>
    %c6 = arith.constant 6 : index
    %c0_158 = arith.constant 0 : index
    %c0_159 = arith.constant 0 : index
    %c0_160 = arith.constant 0 : index
    %195 = vector.load %arg2[%c6, %c0_158, %c0_159, %c0_160] : memref<9x4x4x1xf32, #tpu.memory_space<vmem>>, vector<1x1x4x1xf32>
    %196 = vector.shape_cast %195 : vector<1x1x4x1xf32> to vector<4x1xf32>
    %197 = vector.broadcast %194 : vector<1x288xf32> to vector<4x288xf32>
    %198 = vector.broadcast %196 : vector<4x1xf32> to vector<4x288xf32>
    %199 = arith.mulf %197, %198 : vector<4x288xf32>
    %200 = arith.addf %192, %199 : vector<4x288xf32>
    %c0_161 = arith.constant 0 : index
    %c1_162 = arith.constant 1 : index
    %c145_163 = arith.constant 145 : index
    %201 = vector.load %arg1[%c0_161, %c1_162, %c145_163] : memref<1x4x512xf32, #tpu.memory_space<vmem>>, vector<1x1x288xf32>
    %202 = vector.shape_cast %201 : vector<1x1x288xf32> to vector<1x288xf32>
    %c6_164 = arith.constant 6 : index
    %c1_165 = arith.constant 1 : index
    %c0_166 = arith.constant 0 : index
    %c0_167 = arith.constant 0 : index
    %203 = vector.load %arg2[%c6_164, %c1_165, %c0_166, %c0_167] : memref<9x4x4x1xf32, #tpu.memory_space<vmem>>, vector<1x1x4x1xf32>
    %204 = vector.shape_cast %203 : vector<1x1x4x1xf32> to vector<4x1xf32>
    %205 = vector.broadcast %202 : vector<1x288xf32> to vector<4x288xf32>
    %206 = vector.broadcast %204 : vector<4x1xf32> to vector<4x288xf32>
    %207 = arith.mulf %205, %206 : vector<4x288xf32>
    %208 = arith.addf %200, %207 : vector<4x288xf32>
    %c0_168 = arith.constant 0 : index
    %c2_169 = arith.constant 2 : index
    %c145_170 = arith.constant 145 : index
    %209 = vector.load %arg1[%c0_168, %c2_169, %c145_170] : memref<1x4x512xf32, #tpu.memory_space<vmem>>, vector<1x1x288xf32>
    %210 = vector.shape_cast %209 : vector<1x1x288xf32> to vector<1x288xf32>
    %c6_171 = arith.constant 6 : index
    %c2_172 = arith.constant 2 : index
    %c0_173 = arith.constant 0 : index
    %c0_174 = arith.constant 0 : index
    %211 = vector.load %arg2[%c6_171, %c2_172, %c0_173, %c0_174] : memref<9x4x4x1xf32, #tpu.memory_space<vmem>>, vector<1x1x4x1xf32>
    %212 = vector.shape_cast %211 : vector<1x1x4x1xf32> to vector<4x1xf32>
    %213 = vector.broadcast %210 : vector<1x288xf32> to vector<4x288xf32>
    %214 = vector.broadcast %212 : vector<4x1xf32> to vector<4x288xf32>
    %215 = arith.mulf %213, %214 : vector<4x288xf32>
    %216 = arith.addf %208, %215 : vector<4x288xf32>
    %c0_175 = arith.constant 0 : index
    %c3_176 = arith.constant 3 : index
    %c145_177 = arith.constant 145 : index
    %217 = vector.load %arg1[%c0_175, %c3_176, %c145_177] : memref<1x4x512xf32, #tpu.memory_space<vmem>>, vector<1x1x288xf32>
    %218 = vector.shape_cast %217 : vector<1x1x288xf32> to vector<1x288xf32>
    %c6_178 = arith.constant 6 : index
    %c3_179 = arith.constant 3 : index
    %c0_180 = arith.constant 0 : index
    %c0_181 = arith.constant 0 : index
    %219 = vector.load %arg2[%c6_178, %c3_179, %c0_180, %c0_181] : memref<9x4x4x1xf32, #tpu.memory_space<vmem>>, vector<1x1x4x1xf32>
    %220 = vector.shape_cast %219 : vector<1x1x4x1xf32> to vector<4x1xf32>
    %221 = vector.broadcast %218 : vector<1x288xf32> to vector<4x288xf32>
    %222 = vector.broadcast %220 : vector<4x1xf32> to vector<4x288xf32>
    %223 = arith.mulf %221, %222 : vector<4x288xf32>
    %224 = arith.addf %216, %223 : vector<4x288xf32>
    %c0_182 = arith.constant 0 : index
    %c0_183 = arith.constant 0 : index
    %c146 = arith.constant 146 : index
    %225 = vector.load %arg1[%c0_182, %c0_183, %c146] : memref<1x4x512xf32, #tpu.memory_space<vmem>>, vector<1x1x288xf32>
    %226 = vector.shape_cast %225 : vector<1x1x288xf32> to vector<1x288xf32>
    %c7 = arith.constant 7 : index
    %c0_184 = arith.constant 0 : index
    %c0_185 = arith.constant 0 : index
    %c0_186 = arith.constant 0 : index
    %227 = vector.load %arg2[%c7, %c0_184, %c0_185, %c0_186] : memref<9x4x4x1xf32, #tpu.memory_space<vmem>>, vector<1x1x4x1xf32>
    %228 = vector.shape_cast %227 : vector<1x1x4x1xf32> to vector<4x1xf32>
    %229 = vector.broadcast %226 : vector<1x288xf32> to vector<4x288xf32>
    %230 = vector.broadcast %228 : vector<4x1xf32> to vector<4x288xf32>
    %231 = arith.mulf %229, %230 : vector<4x288xf32>
    %232 = arith.addf %224, %231 : vector<4x288xf32>
    %c0_187 = arith.constant 0 : index
    %c1_188 = arith.constant 1 : index
    %c146_189 = arith.constant 146 : index
    %233 = vector.load %arg1[%c0_187, %c1_188, %c146_189] : memref<1x4x512xf32, #tpu.memory_space<vmem>>, vector<1x1x288xf32>
    %234 = vector.shape_cast %233 : vector<1x1x288xf32> to vector<1x288xf32>
    %c7_190 = arith.constant 7 : index
    %c1_191 = arith.constant 1 : index
    %c0_192 = arith.constant 0 : index
    %c0_193 = arith.constant 0 : index
    %235 = vector.load %arg2[%c7_190, %c1_191, %c0_192, %c0_193] : memref<9x4x4x1xf32, #tpu.memory_space<vmem>>, vector<1x1x4x1xf32>
    %236 = vector.shape_cast %235 : vector<1x1x4x1xf32> to vector<4x1xf32>
    %237 = vector.broadcast %234 : vector<1x288xf32> to vector<4x288xf32>
    %238 = vector.broadcast %236 : vector<4x1xf32> to vector<4x288xf32>
    %239 = arith.mulf %237, %238 : vector<4x288xf32>
    %240 = arith.addf %232, %239 : vector<4x288xf32>
    %c0_194 = arith.constant 0 : index
    %c2_195 = arith.constant 2 : index
    %c146_196 = arith.constant 146 : index
    %241 = vector.load %arg1[%c0_194, %c2_195, %c146_196] : memref<1x4x512xf32, #tpu.memory_space<vmem>>, vector<1x1x288xf32>
    %242 = vector.shape_cast %241 : vector<1x1x288xf32> to vector<1x288xf32>
    %c7_197 = arith.constant 7 : index
    %c2_198 = arith.constant 2 : index
    %c0_199 = arith.constant 0 : index
    %c0_200 = arith.constant 0 : index
    %243 = vector.load %arg2[%c7_197, %c2_198, %c0_199, %c0_200] : memref<9x4x4x1xf32, #tpu.memory_space<vmem>>, vector<1x1x4x1xf32>
    %244 = vector.shape_cast %243 : vector<1x1x4x1xf32> to vector<4x1xf32>
    %245 = vector.broadcast %242 : vector<1x288xf32> to vector<4x288xf32>
    %246 = vector.broadcast %244 : vector<4x1xf32> to vector<4x288xf32>
    %247 = arith.mulf %245, %246 : vector<4x288xf32>
    %248 = arith.addf %240, %247 : vector<4x288xf32>
    %c0_201 = arith.constant 0 : index
    %c3_202 = arith.constant 3 : index
    %c146_203 = arith.constant 146 : index
    %249 = vector.load %arg1[%c0_201, %c3_202, %c146_203] : memref<1x4x512xf32, #tpu.memory_space<vmem>>, vector<1x1x288xf32>
    %250 = vector.shape_cast %249 : vector<1x1x288xf32> to vector<1x288xf32>
    %c7_204 = arith.constant 7 : index
    %c3_205 = arith.constant 3 : index
    %c0_206 = arith.constant 0 : index
    %c0_207 = arith.constant 0 : index
    %251 = vector.load %arg2[%c7_204, %c3_205, %c0_206, %c0_207] : memref<9x4x4x1xf32, #tpu.memory_space<vmem>>, vector<1x1x4x1xf32>
    %252 = vector.shape_cast %251 : vector<1x1x4x1xf32> to vector<4x1xf32>
    %253 = vector.broadcast %250 : vector<1x288xf32> to vector<4x288xf32>
    %254 = vector.broadcast %252 : vector<4x1xf32> to vector<4x288xf32>
    %255 = arith.mulf %253, %254 : vector<4x288xf32>
    %256 = arith.addf %248, %255 : vector<4x288xf32>
    %c0_208 = arith.constant 0 : index
    %c0_209 = arith.constant 0 : index
    %c147 = arith.constant 147 : index
    %257 = vector.load %arg1[%c0_208, %c0_209, %c147] : memref<1x4x512xf32, #tpu.memory_space<vmem>>, vector<1x1x288xf32>
    %258 = vector.shape_cast %257 : vector<1x1x288xf32> to vector<1x288xf32>
    %c8 = arith.constant 8 : index
    %c0_210 = arith.constant 0 : index
    %c0_211 = arith.constant 0 : index
    %c0_212 = arith.constant 0 : index
    %259 = vector.load %arg2[%c8, %c0_210, %c0_211, %c0_212] : memref<9x4x4x1xf32, #tpu.memory_space<vmem>>, vector<1x1x4x1xf32>
    %260 = vector.shape_cast %259 : vector<1x1x4x1xf32> to vector<4x1xf32>
    %261 = vector.broadcast %258 : vector<1x288xf32> to vector<4x288xf32>
    %262 = vector.broadcast %260 : vector<4x1xf32> to vector<4x288xf32>
    %263 = arith.mulf %261, %262 : vector<4x288xf32>
    %264 = arith.addf %256, %263 : vector<4x288xf32>
    %c0_213 = arith.constant 0 : index
    %c1_214 = arith.constant 1 : index
    %c147_215 = arith.constant 147 : index
    %265 = vector.load %arg1[%c0_213, %c1_214, %c147_215] : memref<1x4x512xf32, #tpu.memory_space<vmem>>, vector<1x1x288xf32>
    %266 = vector.shape_cast %265 : vector<1x1x288xf32> to vector<1x288xf32>
    %c8_216 = arith.constant 8 : index
    %c1_217 = arith.constant 1 : index
    %c0_218 = arith.constant 0 : index
    %c0_219 = arith.constant 0 : index
    %267 = vector.load %arg2[%c8_216, %c1_217, %c0_218, %c0_219] : memref<9x4x4x1xf32, #tpu.memory_space<vmem>>, vector<1x1x4x1xf32>
    %268 = vector.shape_cast %267 : vector<1x1x4x1xf32> to vector<4x1xf32>
    %269 = vector.broadcast %266 : vector<1x288xf32> to vector<4x288xf32>
    %270 = vector.broadcast %268 : vector<4x1xf32> to vector<4x288xf32>
    %271 = arith.mulf %269, %270 : vector<4x288xf32>
    %272 = arith.addf %264, %271 : vector<4x288xf32>
    %c0_220 = arith.constant 0 : index
    %c2_221 = arith.constant 2 : index
    %c147_222 = arith.constant 147 : index
    %273 = vector.load %arg1[%c0_220, %c2_221, %c147_222] : memref<1x4x512xf32, #tpu.memory_space<vmem>>, vector<1x1x288xf32>
    %274 = vector.shape_cast %273 : vector<1x1x288xf32> to vector<1x288xf32>
    %c8_223 = arith.constant 8 : index
    %c2_224 = arith.constant 2 : index
    %c0_225 = arith.constant 0 : index
    %c0_226 = arith.constant 0 : index
    %275 = vector.load %arg2[%c8_223, %c2_224, %c0_225, %c0_226] : memref<9x4x4x1xf32, #tpu.memory_space<vmem>>, vector<1x1x4x1xf32>
    %276 = vector.shape_cast %275 : vector<1x1x4x1xf32> to vector<4x1xf32>
    %277 = vector.broadcast %274 : vector<1x288xf32> to vector<4x288xf32>
    %278 = vector.broadcast %276 : vector<4x1xf32> to vector<4x288xf32>
    %279 = arith.mulf %277, %278 : vector<4x288xf32>
    %280 = arith.addf %272, %279 : vector<4x288xf32>
    %c0_227 = arith.constant 0 : index
    %c3_228 = arith.constant 3 : index
    %c147_229 = arith.constant 147 : index
    %281 = vector.load %arg1[%c0_227, %c3_228, %c147_229] : memref<1x4x512xf32, #tpu.memory_space<vmem>>, vector<1x1x288xf32>
    %282 = vector.shape_cast %281 : vector<1x1x288xf32> to vector<1x288xf32>
    %c8_230 = arith.constant 8 : index
    %c3_231 = arith.constant 3 : index
    %c0_232 = arith.constant 0 : index
    %c0_233 = arith.constant 0 : index
    %283 = vector.load %arg2[%c8_230, %c3_231, %c0_232, %c0_233] : memref<9x4x4x1xf32, #tpu.memory_space<vmem>>, vector<1x1x4x1xf32>
    %284 = vector.shape_cast %283 : vector<1x1x4x1xf32> to vector<4x1xf32>
    %285 = vector.broadcast %282 : vector<1x288xf32> to vector<4x288xf32>
    %286 = vector.broadcast %284 : vector<4x1xf32> to vector<4x288xf32>
    %287 = arith.mulf %285, %286 : vector<4x288xf32>
    %288 = arith.addf %280, %287 : vector<4x288xf32>
    %c0_234 = arith.constant 0 : index
    %c0_235 = arith.constant 0 : index
    %289 = vector.load %arg3[%c0_234, %c0_235] : memref<4x1xf32, #tpu.memory_space<vmem>>, vector<4x1xf32>
    %290 = vector.broadcast %289 : vector<4x1xf32> to vector<4x288xf32>
    %291 = arith.addf %288, %290 : vector<4x288xf32>
    %cst_236 = arith.constant 0.000000e+00 : f32
    %292 = vector.broadcast %cst_236 : f32 to vector<4x288xf32>
    %293 = arith.maximumf %291, %292 : vector<4x288xf32>
    %294 = tpu.iota {dimensions = array<i32: 1>} : vector<4x288xi32>
    %295 = arith.sitofp %294 : vector<4x288xi32> to vector<4x288xf32>
    %cst_237 = arith.constant 0.055555556 : f32
    %296 = vector.broadcast %cst_237 : f32 to vector<4x288xf32>
    %297 = arith.mulf %295, %296 : vector<4x288xf32>
    %298 = arith.fptosi %297 : vector<4x288xf32> to vector<4x288xi32>
    %c18_i32 = arith.constant 18 : i32
    %299 = vector.broadcast %c18_i32 : i32 to vector<4x288xi32>
    %300 = arith.muli %298, %299 : vector<4x288xi32>
    %301 = arith.subi %294, %300 : vector<4x288xi32>
    %c16_i32 = arith.constant 16 : i32
    %302 = vector.broadcast %c16_i32 : i32 to vector<4x288xi32>
    %303 = arith.cmpi slt, %301, %302 : vector<4x288xi32>
    %cst_238 = arith.constant 0.000000e+00 : f32
    %304 = vector.broadcast %cst_238 : f32 to vector<4x288xf32>
    %305 = arith.select %303, %293, %304 : vector<4x288xi1>, vector<4x288xf32>
    %cst_239 = arith.constant 0.000000e+00 : f32
    %306 = vector.broadcast %cst_239 : f32 to vector<4x128xf32>
    %c0_240 = arith.constant 0 : index
    %c0_241 = arith.constant 0 : index
    %307 = vector.load %arg7[%c0_240, %c0_241] : memref<4x512xf32, #tpu.memory_space<vmem>>, vector<4x128xf32>
    tpu.vector_store %arg7[%c0_240, %c0_241], %306 {strides = array<i32>} : memref<4x512xf32, #tpu.memory_space<vmem>>, vector<4x128xf32>,
    %cst_242 = arith.constant 0.000000e+00 : f32
    %308 = vector.broadcast %cst_242 : f32 to vector<4x128xf32>
    %c0_243 = arith.constant 0 : index
    %c384 = arith.constant 384 : index
    %309 = vector.load %arg7[%c0_243, %c384] : memref<4x512xf32, #tpu.memory_space<vmem>>, vector<4x128xf32>
    tpu.vector_store %arg7[%c0_243, %c384], %308 {strides = array<i32>} : memref<4x512xf32, #tpu.memory_space<vmem>>, vector<4x128xf32>,
    %c0_244 = arith.constant 0 : index
    %c128_245 = arith.constant 128 : index
    %310 = vector.load %arg7[%c0_244, %c128_245] : memref<4x512xf32, #tpu.memory_space<vmem>>, vector<4x288xf32>
    tpu.vector_store %arg7[%c0_244, %c128_245], %305 {strides = array<i32>} : memref<4x512xf32, #tpu.memory_space<vmem>>, vector<4x288xf32>,
    %cst_246 = arith.constant 0.000000e+00 : f32
    %311 = vector.broadcast %cst_246 : f32 to vector<4x288xf32>
    %c0_247 = arith.constant 0 : index
    %c109_248 = arith.constant 109 : index
    %312 = vector.load %arg7[%c0_247, %c109_248] : memref<4x512xf32, #tpu.memory_space<vmem>>, vector<1x288xf32>
    %c0_249 = arith.constant 0 : index
    %c0_250 = arith.constant 0 : index
    %c0_251 = arith.constant 0 : index
    %c0_252 = arith.constant 0 : index
    %313 = vector.load %arg4[%c0_249, %c0_250, %c0_251, %c0_252] : memref<9x4x4x1xf32, #tpu.memory_space<vmem>>, vector<1x1x4x1xf32>
    %314 = vector.shape_cast %313 : vector<1x1x4x1xf32> to vector<4x1xf32>
    %315 = vector.broadcast %312 : vector<1x288xf32> to vector<4x288xf32>
    %316 = vector.broadcast %314 : vector<4x1xf32> to vector<4x288xf32>
    %317 = arith.mulf %315, %316 : vector<4x288xf32>
    %318 = arith.addf %311, %317 : vector<4x288xf32>
    %c1_253 = arith.constant 1 : index
    %c109_254 = arith.constant 109 : index
    %319 = vector.load %arg7[%c1_253, %c109_254] : memref<4x512xf32, #tpu.memory_space<vmem>>, vector<1x288xf32>
    %c0_255 = arith.constant 0 : index
    %c1_256 = arith.constant 1 : index
    %c0_257 = arith.constant 0 : index
    %c0_258 = arith.constant 0 : index
    %320 = vector.load %arg4[%c0_255, %c1_256, %c0_257, %c0_258] : memref<9x4x4x1xf32, #tpu.memory_space<vmem>>, vector<1x1x4x1xf32>
    %321 = vector.shape_cast %320 : vector<1x1x4x1xf32> to vector<4x1xf32>
    %322 = vector.broadcast %319 : vector<1x288xf32> to vector<4x288xf32>
    %323 = vector.broadcast %321 : vector<4x1xf32> to vector<4x288xf32>
    %324 = arith.mulf %322, %323 : vector<4x288xf32>
    %325 = arith.addf %318, %324 : vector<4x288xf32>
    %c2_259 = arith.constant 2 : index
    %c109_260 = arith.constant 109 : index
    %326 = vector.load %arg7[%c2_259, %c109_260] : memref<4x512xf32, #tpu.memory_space<vmem>>, vector<1x288xf32>
    %c0_261 = arith.constant 0 : index
    %c2_262 = arith.constant 2 : index
    %c0_263 = arith.constant 0 : index
    %c0_264 = arith.constant 0 : index
    %327 = vector.load %arg4[%c0_261, %c2_262, %c0_263, %c0_264] : memref<9x4x4x1xf32, #tpu.memory_space<vmem>>, vector<1x1x4x1xf32>
    %328 = vector.shape_cast %327 : vector<1x1x4x1xf32> to vector<4x1xf32>
    %329 = vector.broadcast %326 : vector<1x288xf32> to vector<4x288xf32>
    %330 = vector.broadcast %328 : vector<4x1xf32> to vector<4x288xf32>
    %331 = arith.mulf %329, %330 : vector<4x288xf32>
    %332 = arith.addf %325, %331 : vector<4x288xf32>
    %c3_265 = arith.constant 3 : index
    %c109_266 = arith.constant 109 : index
    %333 = vector.load %arg7[%c3_265, %c109_266] : memref<4x512xf32, #tpu.memory_space<vmem>>, vector<1x288xf32>
    %c0_267 = arith.constant 0 : index
    %c3_268 = arith.constant 3 : index
    %c0_269 = arith.constant 0 : index
    %c0_270 = arith.constant 0 : index
    %334 = vector.load %arg4[%c0_267, %c3_268, %c0_269, %c0_270] : memref<9x4x4x1xf32, #tpu.memory_space<vmem>>, vector<1x1x4x1xf32>
    %335 = vector.shape_cast %334 : vector<1x1x4x1xf32> to vector<4x1xf32>
    %336 = vector.broadcast %333 : vector<1x288xf32> to vector<4x288xf32>
    %337 = vector.broadcast %335 : vector<4x1xf32> to vector<4x288xf32>
    %338 = arith.mulf %336, %337 : vector<4x288xf32>
    %339 = arith.addf %332, %338 : vector<4x288xf32>
    %c0_271 = arith.constant 0 : index
    %c110_272 = arith.constant 110 : index
    %340 = vector.load %arg7[%c0_271, %c110_272] : memref<4x512xf32, #tpu.memory_space<vmem>>, vector<1x288xf32>
    %c1_273 = arith.constant 1 : index
    %c0_274 = arith.constant 0 : index
    %c0_275 = arith.constant 0 : index
    %c0_276 = arith.constant 0 : index
    %341 = vector.load %arg4[%c1_273, %c0_274, %c0_275, %c0_276] : memref<9x4x4x1xf32, #tpu.memory_space<vmem>>, vector<1x1x4x1xf32>
    %342 = vector.shape_cast %341 : vector<1x1x4x1xf32> to vector<4x1xf32>
    %343 = vector.broadcast %340 : vector<1x288xf32> to vector<4x288xf32>
    %344 = vector.broadcast %342 : vector<4x1xf32> to vector<4x288xf32>
    %345 = arith.mulf %343, %344 : vector<4x288xf32>
    %346 = arith.addf %339, %345 : vector<4x288xf32>
    %c1_277 = arith.constant 1 : index
    %c110_278 = arith.constant 110 : index
    %347 = vector.load %arg7[%c1_277, %c110_278] : memref<4x512xf32, #tpu.memory_space<vmem>>, vector<1x288xf32>
    %c1_279 = arith.constant 1 : index
    %c1_280 = arith.constant 1 : index
    %c0_281 = arith.constant 0 : index
    %c0_282 = arith.constant 0 : index
    %348 = vector.load %arg4[%c1_279, %c1_280, %c0_281, %c0_282] : memref<9x4x4x1xf32, #tpu.memory_space<vmem>>, vector<1x1x4x1xf32>
    %349 = vector.shape_cast %348 : vector<1x1x4x1xf32> to vector<4x1xf32>
    %350 = vector.broadcast %347 : vector<1x288xf32> to vector<4x288xf32>
    %351 = vector.broadcast %349 : vector<4x1xf32> to vector<4x288xf32>
    %352 = arith.mulf %350, %351 : vector<4x288xf32>
    %353 = arith.addf %346, %352 : vector<4x288xf32>
    %c2_283 = arith.constant 2 : index
    %c110_284 = arith.constant 110 : index
    %354 = vector.load %arg7[%c2_283, %c110_284] : memref<4x512xf32, #tpu.memory_space<vmem>>, vector<1x288xf32>
    %c1_285 = arith.constant 1 : index
    %c2_286 = arith.constant 2 : index
    %c0_287 = arith.constant 0 : index
    %c0_288 = arith.constant 0 : index
    %355 = vector.load %arg4[%c1_285, %c2_286, %c0_287, %c0_288] : memref<9x4x4x1xf32, #tpu.memory_space<vmem>>, vector<1x1x4x1xf32>
    %356 = vector.shape_cast %355 : vector<1x1x4x1xf32> to vector<4x1xf32>
    %357 = vector.broadcast %354 : vector<1x288xf32> to vector<4x288xf32>
    %358 = vector.broadcast %356 : vector<4x1xf32> to vector<4x288xf32>
    %359 = arith.mulf %357, %358 : vector<4x288xf32>
    %360 = arith.addf %353, %359 : vector<4x288xf32>
    %c3_289 = arith.constant 3 : index
    %c110_290 = arith.constant 110 : index
    %361 = vector.load %arg7[%c3_289, %c110_290] : memref<4x512xf32, #tpu.memory_space<vmem>>, vector<1x288xf32>
    %c1_291 = arith.constant 1 : index
    %c3_292 = arith.constant 3 : index
    %c0_293 = arith.constant 0 : index
    %c0_294 = arith.constant 0 : index
    %362 = vector.load %arg4[%c1_291, %c3_292, %c0_293, %c0_294] : memref<9x4x4x1xf32, #tpu.memory_space<vmem>>, vector<1x1x4x1xf32>
    %363 = vector.shape_cast %362 : vector<1x1x4x1xf32> to vector<4x1xf32>
    %364 = vector.broadcast %361 : vector<1x288xf32> to vector<4x288xf32>
    %365 = vector.broadcast %363 : vector<4x1xf32> to vector<4x288xf32>
    %366 = arith.mulf %364, %365 : vector<4x288xf32>
    %367 = arith.addf %360, %366 : vector<4x288xf32>
    %c0_295 = arith.constant 0 : index
    %c111_296 = arith.constant 111 : index
    %368 = vector.load %arg7[%c0_295, %c111_296] : memref<4x512xf32, #tpu.memory_space<vmem>>, vector<1x288xf32>
    %c2_297 = arith.constant 2 : index
    %c0_298 = arith.constant 0 : index
    %c0_299 = arith.constant 0 : index
    %c0_300 = arith.constant 0 : index
    %369 = vector.load %arg4[%c2_297, %c0_298, %c0_299, %c0_300] : memref<9x4x4x1xf32, #tpu.memory_space<vmem>>, vector<1x1x4x1xf32>
    %370 = vector.shape_cast %369 : vector<1x1x4x1xf32> to vector<4x1xf32>
    %371 = vector.broadcast %368 : vector<1x288xf32> to vector<4x288xf32>
    %372 = vector.broadcast %370 : vector<4x1xf32> to vector<4x288xf32>
    %373 = arith.mulf %371, %372 : vector<4x288xf32>
    %374 = arith.addf %367, %373 : vector<4x288xf32>
    %c1_301 = arith.constant 1 : index
    %c111_302 = arith.constant 111 : index
    %375 = vector.load %arg7[%c1_301, %c111_302] : memref<4x512xf32, #tpu.memory_space<vmem>>, vector<1x288xf32>
    %c2_303 = arith.constant 2 : index
    %c1_304 = arith.constant 1 : index
    %c0_305 = arith.constant 0 : index
    %c0_306 = arith.constant 0 : index
    %376 = vector.load %arg4[%c2_303, %c1_304, %c0_305, %c0_306] : memref<9x4x4x1xf32, #tpu.memory_space<vmem>>, vector<1x1x4x1xf32>
    %377 = vector.shape_cast %376 : vector<1x1x4x1xf32> to vector<4x1xf32>
    %378 = vector.broadcast %375 : vector<1x288xf32> to vector<4x288xf32>
    %379 = vector.broadcast %377 : vector<4x1xf32> to vector<4x288xf32>
    %380 = arith.mulf %378, %379 : vector<4x288xf32>
    %381 = arith.addf %374, %380 : vector<4x288xf32>
    %c2_307 = arith.constant 2 : index
    %c111_308 = arith.constant 111 : index
    %382 = vector.load %arg7[%c2_307, %c111_308] : memref<4x512xf32, #tpu.memory_space<vmem>>, vector<1x288xf32>
    %c2_309 = arith.constant 2 : index
    %c2_310 = arith.constant 2 : index
    %c0_311 = arith.constant 0 : index
    %c0_312 = arith.constant 0 : index
    %383 = vector.load %arg4[%c2_309, %c2_310, %c0_311, %c0_312] : memref<9x4x4x1xf32, #tpu.memory_space<vmem>>, vector<1x1x4x1xf32>
    %384 = vector.shape_cast %383 : vector<1x1x4x1xf32> to vector<4x1xf32>
    %385 = vector.broadcast %382 : vector<1x288xf32> to vector<4x288xf32>
    %386 = vector.broadcast %384 : vector<4x1xf32> to vector<4x288xf32>
    %387 = arith.mulf %385, %386 : vector<4x288xf32>
    %388 = arith.addf %381, %387 : vector<4x288xf32>
    %c3_313 = arith.constant 3 : index
    %c111_314 = arith.constant 111 : index
    %389 = vector.load %arg7[%c3_313, %c111_314] : memref<4x512xf32, #tpu.memory_space<vmem>>, vector<1x288xf32>
    %c2_315 = arith.constant 2 : index
    %c3_316 = arith.constant 3 : index
    %c0_317 = arith.constant 0 : index
    %c0_318 = arith.constant 0 : index
    %390 = vector.load %arg4[%c2_315, %c3_316, %c0_317, %c0_318] : memref<9x4x4x1xf32, #tpu.memory_space<vmem>>, vector<1x1x4x1xf32>
    %391 = vector.shape_cast %390 : vector<1x1x4x1xf32> to vector<4x1xf32>
    %392 = vector.broadcast %389 : vector<1x288xf32> to vector<4x288xf32>
    %393 = vector.broadcast %391 : vector<4x1xf32> to vector<4x288xf32>
    %394 = arith.mulf %392, %393 : vector<4x288xf32>
    %395 = arith.addf %388, %394 : vector<4x288xf32>
    %c0_319 = arith.constant 0 : index
    %c127_320 = arith.constant 127 : index
    %396 = vector.load %arg7[%c0_319, %c127_320] : memref<4x512xf32, #tpu.memory_space<vmem>>, vector<1x288xf32>
    %c3_321 = arith.constant 3 : index
    %c0_322 = arith.constant 0 : index
    %c0_323 = arith.constant 0 : index
    %c0_324 = arith.constant 0 : index
    %397 = vector.load %arg4[%c3_321, %c0_322, %c0_323, %c0_324] : memref<9x4x4x1xf32, #tpu.memory_space<vmem>>, vector<1x1x4x1xf32>
    %398 = vector.shape_cast %397 : vector<1x1x4x1xf32> to vector<4x1xf32>
    %399 = vector.broadcast %396 : vector<1x288xf32> to vector<4x288xf32>
    %400 = vector.broadcast %398 : vector<4x1xf32> to vector<4x288xf32>
    %401 = arith.mulf %399, %400 : vector<4x288xf32>
    %402 = arith.addf %395, %401 : vector<4x288xf32>
    %c1_325 = arith.constant 1 : index
    %c127_326 = arith.constant 127 : index
    %403 = vector.load %arg7[%c1_325, %c127_326] : memref<4x512xf32, #tpu.memory_space<vmem>>, vector<1x288xf32>
    %c3_327 = arith.constant 3 : index
    %c1_328 = arith.constant 1 : index
    %c0_329 = arith.constant 0 : index
    %c0_330 = arith.constant 0 : index
    %404 = vector.load %arg4[%c3_327, %c1_328, %c0_329, %c0_330] : memref<9x4x4x1xf32, #tpu.memory_space<vmem>>, vector<1x1x4x1xf32>
    %405 = vector.shape_cast %404 : vector<1x1x4x1xf32> to vector<4x1xf32>
    %406 = vector.broadcast %403 : vector<1x288xf32> to vector<4x288xf32>
    %407 = vector.broadcast %405 : vector<4x1xf32> to vector<4x288xf32>
    %408 = arith.mulf %406, %407 : vector<4x288xf32>
    %409 = arith.addf %402, %408 : vector<4x288xf32>
    %c2_331 = arith.constant 2 : index
    %c127_332 = arith.constant 127 : index
    %410 = vector.load %arg7[%c2_331, %c127_332] : memref<4x512xf32, #tpu.memory_space<vmem>>, vector<1x288xf32>
    %c3_333 = arith.constant 3 : index
    %c2_334 = arith.constant 2 : index
    %c0_335 = arith.constant 0 : index
    %c0_336 = arith.constant 0 : index
    %411 = vector.load %arg4[%c3_333, %c2_334, %c0_335, %c0_336] : memref<9x4x4x1xf32, #tpu.memory_space<vmem>>, vector<1x1x4x1xf32>
    %412 = vector.shape_cast %411 : vector<1x1x4x1xf32> to vector<4x1xf32>
    %413 = vector.broadcast %410 : vector<1x288xf32> to vector<4x288xf32>
    %414 = vector.broadcast %412 : vector<4x1xf32> to vector<4x288xf32>
    %415 = arith.mulf %413, %414 : vector<4x288xf32>
    %416 = arith.addf %409, %415 : vector<4x288xf32>
    %c3_337 = arith.constant 3 : index
    %c127_338 = arith.constant 127 : index
    %417 = vector.load %arg7[%c3_337, %c127_338] : memref<4x512xf32, #tpu.memory_space<vmem>>, vector<1x288xf32>
    %c3_339 = arith.constant 3 : index
    %c3_340 = arith.constant 3 : index
    %c0_341 = arith.constant 0 : index
    %c0_342 = arith.constant 0 : index
    %418 = vector.load %arg4[%c3_339, %c3_340, %c0_341, %c0_342] : memref<9x4x4x1xf32, #tpu.memory_space<vmem>>, vector<1x1x4x1xf32>
    %419 = vector.shape_cast %418 : vector<1x1x4x1xf32> to vector<4x1xf32>
    %420 = vector.broadcast %417 : vector<1x288xf32> to vector<4x288xf32>
    %421 = vector.broadcast %419 : vector<4x1xf32> to vector<4x288xf32>
    %422 = arith.mulf %420, %421 : vector<4x288xf32>
    %423 = arith.addf %416, %422 : vector<4x288xf32>
    %c0_343 = arith.constant 0 : index
    %c128_344 = arith.constant 128 : index
    %424 = vector.load %arg7[%c0_343, %c128_344] : memref<4x512xf32, #tpu.memory_space<vmem>>, vector<1x288xf32>
    %c4_345 = arith.constant 4 : index
    %c0_346 = arith.constant 0 : index
    %c0_347 = arith.constant 0 : index
    %c0_348 = arith.constant 0 : index
    %425 = vector.load %arg4[%c4_345, %c0_346, %c0_347, %c0_348] : memref<9x4x4x1xf32, #tpu.memory_space<vmem>>, vector<1x1x4x1xf32>
    %426 = vector.shape_cast %425 : vector<1x1x4x1xf32> to vector<4x1xf32>
    %427 = vector.broadcast %424 : vector<1x288xf32> to vector<4x288xf32>
    %428 = vector.broadcast %426 : vector<4x1xf32> to vector<4x288xf32>
    %429 = arith.mulf %427, %428 : vector<4x288xf32>
    %430 = arith.addf %423, %429 : vector<4x288xf32>
    %c1_349 = arith.constant 1 : index
    %c128_350 = arith.constant 128 : index
    %431 = vector.load %arg7[%c1_349, %c128_350] : memref<4x512xf32, #tpu.memory_space<vmem>>, vector<1x288xf32>
    %c4_351 = arith.constant 4 : index
    %c1_352 = arith.constant 1 : index
    %c0_353 = arith.constant 0 : index
    %c0_354 = arith.constant 0 : index
    %432 = vector.load %arg4[%c4_351, %c1_352, %c0_353, %c0_354] : memref<9x4x4x1xf32, #tpu.memory_space<vmem>>, vector<1x1x4x1xf32>
    %433 = vector.shape_cast %432 : vector<1x1x4x1xf32> to vector<4x1xf32>
    %434 = vector.broadcast %431 : vector<1x288xf32> to vector<4x288xf32>
    %435 = vector.broadcast %433 : vector<4x1xf32> to vector<4x288xf32>
    %436 = arith.mulf %434, %435 : vector<4x288xf32>
    %437 = arith.addf %430, %436 : vector<4x288xf32>
    %c2_355 = arith.constant 2 : index
    %c128_356 = arith.constant 128 : index
    %438 = vector.load %arg7[%c2_355, %c128_356] : memref<4x512xf32, #tpu.memory_space<vmem>>, vector<1x288xf32>
    %c4_357 = arith.constant 4 : index
    %c2_358 = arith.constant 2 : index
    %c0_359 = arith.constant 0 : index
    %c0_360 = arith.constant 0 : index
    %439 = vector.load %arg4[%c4_357, %c2_358, %c0_359, %c0_360] : memref<9x4x4x1xf32, #tpu.memory_space<vmem>>, vector<1x1x4x1xf32>
    %440 = vector.shape_cast %439 : vector<1x1x4x1xf32> to vector<4x1xf32>
    %441 = vector.broadcast %438 : vector<1x288xf32> to vector<4x288xf32>
    %442 = vector.broadcast %440 : vector<4x1xf32> to vector<4x288xf32>
    %443 = arith.mulf %441, %442 : vector<4x288xf32>
    %444 = arith.addf %437, %443 : vector<4x288xf32>
    %c3_361 = arith.constant 3 : index
    %c128_362 = arith.constant 128 : index
    %445 = vector.load %arg7[%c3_361, %c128_362] : memref<4x512xf32, #tpu.memory_space<vmem>>, vector<1x288xf32>
    %c4_363 = arith.constant 4 : index
    %c3_364 = arith.constant 3 : index
    %c0_365 = arith.constant 0 : index
    %c0_366 = arith.constant 0 : index
    %446 = vector.load %arg4[%c4_363, %c3_364, %c0_365, %c0_366] : memref<9x4x4x1xf32, #tpu.memory_space<vmem>>, vector<1x1x4x1xf32>
    %447 = vector.shape_cast %446 : vector<1x1x4x1xf32> to vector<4x1xf32>
    %448 = vector.broadcast %445 : vector<1x288xf32> to vector<4x288xf32>
    %449 = vector.broadcast %447 : vector<4x1xf32> to vector<4x288xf32>
    %450 = arith.mulf %448, %449 : vector<4x288xf32>
    %451 = arith.addf %444, %450 : vector<4x288xf32>
    %c0_367 = arith.constant 0 : index
    %c129_368 = arith.constant 129 : index
    %452 = vector.load %arg7[%c0_367, %c129_368] : memref<4x512xf32, #tpu.memory_space<vmem>>, vector<1x288xf32>
    %c5_369 = arith.constant 5 : index
    %c0_370 = arith.constant 0 : index
    %c0_371 = arith.constant 0 : index
    %c0_372 = arith.constant 0 : index
    %453 = vector.load %arg4[%c5_369, %c0_370, %c0_371, %c0_372] : memref<9x4x4x1xf32, #tpu.memory_space<vmem>>, vector<1x1x4x1xf32>
    %454 = vector.shape_cast %453 : vector<1x1x4x1xf32> to vector<4x1xf32>
    %455 = vector.broadcast %452 : vector<1x288xf32> to vector<4x288xf32>
    %456 = vector.broadcast %454 : vector<4x1xf32> to vector<4x288xf32>
    %457 = arith.mulf %455, %456 : vector<4x288xf32>
    %458 = arith.addf %451, %457 : vector<4x288xf32>
    %c1_373 = arith.constant 1 : index
    %c129_374 = arith.constant 129 : index
    %459 = vector.load %arg7[%c1_373, %c129_374] : memref<4x512xf32, #tpu.memory_space<vmem>>, vector<1x288xf32>
    %c5_375 = arith.constant 5 : index
    %c1_376 = arith.constant 1 : index
    %c0_377 = arith.constant 0 : index
    %c0_378 = arith.constant 0 : index
    %460 = vector.load %arg4[%c5_375, %c1_376, %c0_377, %c0_378] : memref<9x4x4x1xf32, #tpu.memory_space<vmem>>, vector<1x1x4x1xf32>
    %461 = vector.shape_cast %460 : vector<1x1x4x1xf32> to vector<4x1xf32>
    %462 = vector.broadcast %459 : vector<1x288xf32> to vector<4x288xf32>
    %463 = vector.broadcast %461 : vector<4x1xf32> to vector<4x288xf32>
    %464 = arith.mulf %462, %463 : vector<4x288xf32>
    %465 = arith.addf %458, %464 : vector<4x288xf32>
    %c2_379 = arith.constant 2 : index
    %c129_380 = arith.constant 129 : index
    %466 = vector.load %arg7[%c2_379, %c129_380] : memref<4x512xf32, #tpu.memory_space<vmem>>, vector<1x288xf32>
    %c5_381 = arith.constant 5 : index
    %c2_382 = arith.constant 2 : index
    %c0_383 = arith.constant 0 : index
    %c0_384 = arith.constant 0 : index
    %467 = vector.load %arg4[%c5_381, %c2_382, %c0_383, %c0_384] : memref<9x4x4x1xf32, #tpu.memory_space<vmem>>, vector<1x1x4x1xf32>
    %468 = vector.shape_cast %467 : vector<1x1x4x1xf32> to vector<4x1xf32>
    %469 = vector.broadcast %466 : vector<1x288xf32> to vector<4x288xf32>
    %470 = vector.broadcast %468 : vector<4x1xf32> to vector<4x288xf32>
    %471 = arith.mulf %469, %470 : vector<4x288xf32>
    %472 = arith.addf %465, %471 : vector<4x288xf32>
    %c3_385 = arith.constant 3 : index
    %c129_386 = arith.constant 129 : index
    %473 = vector.load %arg7[%c3_385, %c129_386] : memref<4x512xf32, #tpu.memory_space<vmem>>, vector<1x288xf32>
    %c5_387 = arith.constant 5 : index
    %c3_388 = arith.constant 3 : index
    %c0_389 = arith.constant 0 : index
    %c0_390 = arith.constant 0 : index
    %474 = vector.load %arg4[%c5_387, %c3_388, %c0_389, %c0_390] : memref<9x4x4x1xf32, #tpu.memory_space<vmem>>, vector<1x1x4x1xf32>
    %475 = vector.shape_cast %474 : vector<1x1x4x1xf32> to vector<4x1xf32>
    %476 = vector.broadcast %473 : vector<1x288xf32> to vector<4x288xf32>
    %477 = vector.broadcast %475 : vector<4x1xf32> to vector<4x288xf32>
    %478 = arith.mulf %476, %477 : vector<4x288xf32>
    %479 = arith.addf %472, %478 : vector<4x288xf32>
    %c0_391 = arith.constant 0 : index
    %c145_392 = arith.constant 145 : index
    %480 = vector.load %arg7[%c0_391, %c145_392] : memref<4x512xf32, #tpu.memory_space<vmem>>, vector<1x288xf32>
    %c6_393 = arith.constant 6 : index
    %c0_394 = arith.constant 0 : index
    %c0_395 = arith.constant 0 : index
    %c0_396 = arith.constant 0 : index
    %481 = vector.load %arg4[%c6_393, %c0_394, %c0_395, %c0_396] : memref<9x4x4x1xf32, #tpu.memory_space<vmem>>, vector<1x1x4x1xf32>
    %482 = vector.shape_cast %481 : vector<1x1x4x1xf32> to vector<4x1xf32>
    %483 = vector.broadcast %480 : vector<1x288xf32> to vector<4x288xf32>
    %484 = vector.broadcast %482 : vector<4x1xf32> to vector<4x288xf32>
    %485 = arith.mulf %483, %484 : vector<4x288xf32>
    %486 = arith.addf %479, %485 : vector<4x288xf32>
    %c1_397 = arith.constant 1 : index
    %c145_398 = arith.constant 145 : index
    %487 = vector.load %arg7[%c1_397, %c145_398] : memref<4x512xf32, #tpu.memory_space<vmem>>, vector<1x288xf32>
    %c6_399 = arith.constant 6 : index
    %c1_400 = arith.constant 1 : index
    %c0_401 = arith.constant 0 : index
    %c0_402 = arith.constant 0 : index
    %488 = vector.load %arg4[%c6_399, %c1_400, %c0_401, %c0_402] : memref<9x4x4x1xf32, #tpu.memory_space<vmem>>, vector<1x1x4x1xf32>
    %489 = vector.shape_cast %488 : vector<1x1x4x1xf32> to vector<4x1xf32>
    %490 = vector.broadcast %487 : vector<1x288xf32> to vector<4x288xf32>
    %491 = vector.broadcast %489 : vector<4x1xf32> to vector<4x288xf32>
    %492 = arith.mulf %490, %491 : vector<4x288xf32>
    %493 = arith.addf %486, %492 : vector<4x288xf32>
    %c2_403 = arith.constant 2 : index
    %c145_404 = arith.constant 145 : index
    %494 = vector.load %arg7[%c2_403, %c145_404] : memref<4x512xf32, #tpu.memory_space<vmem>>, vector<1x288xf32>
    %c6_405 = arith.constant 6 : index
    %c2_406 = arith.constant 2 : index
    %c0_407 = arith.constant 0 : index
    %c0_408 = arith.constant 0 : index
    %495 = vector.load %arg4[%c6_405, %c2_406, %c0_407, %c0_408] : memref<9x4x4x1xf32, #tpu.memory_space<vmem>>, vector<1x1x4x1xf32>
    %496 = vector.shape_cast %495 : vector<1x1x4x1xf32> to vector<4x1xf32>
    %497 = vector.broadcast %494 : vector<1x288xf32> to vector<4x288xf32>
    %498 = vector.broadcast %496 : vector<4x1xf32> to vector<4x288xf32>
    %499 = arith.mulf %497, %498 : vector<4x288xf32>
    %500 = arith.addf %493, %499 : vector<4x288xf32>
    %c3_409 = arith.constant 3 : index
    %c145_410 = arith.constant 145 : index
    %501 = vector.load %arg7[%c3_409, %c145_410] : memref<4x512xf32, #tpu.memory_space<vmem>>, vector<1x288xf32>
    %c6_411 = arith.constant 6 : index
    %c3_412 = arith.constant 3 : index
    %c0_413 = arith.constant 0 : index
    %c0_414 = arith.constant 0 : index
    %502 = vector.load %arg4[%c6_411, %c3_412, %c0_413, %c0_414] : memref<9x4x4x1xf32, #tpu.memory_space<vmem>>, vector<1x1x4x1xf32>
    %503 = vector.shape_cast %502 : vector<1x1x4x1xf32> to vector<4x1xf32>
    %504 = vector.broadcast %501 : vector<1x288xf32> to vector<4x288xf32>
    %505 = vector.broadcast %503 : vector<4x1xf32> to vector<4x288xf32>
    %506 = arith.mulf %504, %505 : vector<4x288xf32>
    %507 = arith.addf %500, %506 : vector<4x288xf32>
    %c0_415 = arith.constant 0 : index
    %c146_416 = arith.constant 146 : index
    %508 = vector.load %arg7[%c0_415, %c146_416] : memref<4x512xf32, #tpu.memory_space<vmem>>, vector<1x288xf32>
    %c7_417 = arith.constant 7 : index
    %c0_418 = arith.constant 0 : index
    %c0_419 = arith.constant 0 : index
    %c0_420 = arith.constant 0 : index
    %509 = vector.load %arg4[%c7_417, %c0_418, %c0_419, %c0_420] : memref<9x4x4x1xf32, #tpu.memory_space<vmem>>, vector<1x1x4x1xf32>
    %510 = vector.shape_cast %509 : vector<1x1x4x1xf32> to vector<4x1xf32>
    %511 = vector.broadcast %508 : vector<1x288xf32> to vector<4x288xf32>
    %512 = vector.broadcast %510 : vector<4x1xf32> to vector<4x288xf32>
    %513 = arith.mulf %511, %512 : vector<4x288xf32>
    %514 = arith.addf %507, %513 : vector<4x288xf32>
    %c1_421 = arith.constant 1 : index
    %c146_422 = arith.constant 146 : index
    %515 = vector.load %arg7[%c1_421, %c146_422] : memref<4x512xf32, #tpu.memory_space<vmem>>, vector<1x288xf32>
    %c7_423 = arith.constant 7 : index
    %c1_424 = arith.constant 1 : index
    %c0_425 = arith.constant 0 : index
    %c0_426 = arith.constant 0 : index
    %516 = vector.load %arg4[%c7_423, %c1_424, %c0_425, %c0_426] : memref<9x4x4x1xf32, #tpu.memory_space<vmem>>, vector<1x1x4x1xf32>
    %517 = vector.shape_cast %516 : vector<1x1x4x1xf32> to vector<4x1xf32>
    %518 = vector.broadcast %515 : vector<1x288xf32> to vector<4x288xf32>
    %519 = vector.broadcast %517 : vector<4x1xf32> to vector<4x288xf32>
    %520 = arith.mulf %518, %519 : vector<4x288xf32>
    %521 = arith.addf %514, %520 : vector<4x288xf32>
    %c2_427 = arith.constant 2 : index
    %c146_428 = arith.constant 146 : index
    %522 = vector.load %arg7[%c2_427, %c146_428] : memref<4x512xf32, #tpu.memory_space<vmem>>, vector<1x288xf32>
    %c7_429 = arith.constant 7 : index
    %c2_430 = arith.constant 2 : index
    %c0_431 = arith.constant 0 : index
    %c0_432 = arith.constant 0 : index
    %523 = vector.load %arg4[%c7_429, %c2_430, %c0_431, %c0_432] : memref<9x4x4x1xf32, #tpu.memory_space<vmem>>, vector<1x1x4x1xf32>
    %524 = vector.shape_cast %523 : vector<1x1x4x1xf32> to vector<4x1xf32>
    %525 = vector.broadcast %522 : vector<1x288xf32> to vector<4x288xf32>
    %526 = vector.broadcast %524 : vector<4x1xf32> to vector<4x288xf32>
    %527 = arith.mulf %525, %526 : vector<4x288xf32>
    %528 = arith.addf %521, %527 : vector<4x288xf32>
    %c3_433 = arith.constant 3 : index
    %c146_434 = arith.constant 146 : index
    %529 = vector.load %arg7[%c3_433, %c146_434] : memref<4x512xf32, #tpu.memory_space<vmem>>, vector<1x288xf32>
    %c7_435 = arith.constant 7 : index
    %c3_436 = arith.constant 3 : index
    %c0_437 = arith.constant 0 : index
    %c0_438 = arith.constant 0 : index
    %530 = vector.load %arg4[%c7_435, %c3_436, %c0_437, %c0_438] : memref<9x4x4x1xf32, #tpu.memory_space<vmem>>, vector<1x1x4x1xf32>
    %531 = vector.shape_cast %530 : vector<1x1x4x1xf32> to vector<4x1xf32>
    %532 = vector.broadcast %529 : vector<1x288xf32> to vector<4x288xf32>
    %533 = vector.broadcast %531 : vector<4x1xf32> to vector<4x288xf32>
    %534 = arith.mulf %532, %533 : vector<4x288xf32>
    %535 = arith.addf %528, %534 : vector<4x288xf32>
    %c0_439 = arith.constant 0 : index
    %c147_440 = arith.constant 147 : index
    %536 = vector.load %arg7[%c0_439, %c147_440] : memref<4x512xf32, #tpu.memory_space<vmem>>, vector<1x288xf32>
    %c8_441 = arith.constant 8 : index
    %c0_442 = arith.constant 0 : index
    %c0_443 = arith.constant 0 : index
    %c0_444 = arith.constant 0 : index
    %537 = vector.load %arg4[%c8_441, %c0_442, %c0_443, %c0_444] : memref<9x4x4x1xf32, #tpu.memory_space<vmem>>, vector<1x1x4x1xf32>
    %538 = vector.shape_cast %537 : vector<1x1x4x1xf32> to vector<4x1xf32>
    %539 = vector.broadcast %536 : vector<1x288xf32> to vector<4x288xf32>
    %540 = vector.broadcast %538 : vector<4x1xf32> to vector<4x288xf32>
    %541 = arith.mulf %539, %540 : vector<4x288xf32>
    %542 = arith.addf %535, %541 : vector<4x288xf32>
    %c1_445 = arith.constant 1 : index
    %c147_446 = arith.constant 147 : index
    %543 = vector.load %arg7[%c1_445, %c147_446] : memref<4x512xf32, #tpu.memory_space<vmem>>, vector<1x288xf32>
    %c8_447 = arith.constant 8 : index
    %c1_448 = arith.constant 1 : index
    %c0_449 = arith.constant 0 : index
    %c0_450 = arith.constant 0 : index
    %544 = vector.load %arg4[%c8_447, %c1_448, %c0_449, %c0_450] : memref<9x4x4x1xf32, #tpu.memory_space<vmem>>, vector<1x1x4x1xf32>
    %545 = vector.shape_cast %544 : vector<1x1x4x1xf32> to vector<4x1xf32>
    %546 = vector.broadcast %543 : vector<1x288xf32> to vector<4x288xf32>
    %547 = vector.broadcast %545 : vector<4x1xf32> to vector<4x288xf32>
    %548 = arith.mulf %546, %547 : vector<4x288xf32>
    %549 = arith.addf %542, %548 : vector<4x288xf32>
    %c2_451 = arith.constant 2 : index
    %c147_452 = arith.constant 147 : index
    %550 = vector.load %arg7[%c2_451, %c147_452] : memref<4x512xf32, #tpu.memory_space<vmem>>, vector<1x288xf32>
    %c8_453 = arith.constant 8 : index
    %c2_454 = arith.constant 2 : index
    %c0_455 = arith.constant 0 : index
    %c0_456 = arith.constant 0 : index
    %551 = vector.load %arg4[%c8_453, %c2_454, %c0_455, %c0_456] : memref<9x4x4x1xf32, #tpu.memory_space<vmem>>, vector<1x1x4x1xf32>
    %552 = vector.shape_cast %551 : vector<1x1x4x1xf32> to vector<4x1xf32>
    %553 = vector.broadcast %550 : vector<1x288xf32> to vector<4x288xf32>
    %554 = vector.broadcast %552 : vector<4x1xf32> to vector<4x288xf32>
    %555 = arith.mulf %553, %554 : vector<4x288xf32>
    %556 = arith.addf %549, %555 : vector<4x288xf32>
    %c3_457 = arith.constant 3 : index
    %c147_458 = arith.constant 147 : index
    %557 = vector.load %arg7[%c3_457, %c147_458] : memref<4x512xf32, #tpu.memory_space<vmem>>, vector<1x288xf32>
    %c8_459 = arith.constant 8 : index
    %c3_460 = arith.constant 3 : index
    %c0_461 = arith.constant 0 : index
    %c0_462 = arith.constant 0 : index
    %558 = vector.load %arg4[%c8_459, %c3_460, %c0_461, %c0_462] : memref<9x4x4x1xf32, #tpu.memory_space<vmem>>, vector<1x1x4x1xf32>
    %559 = vector.shape_cast %558 : vector<1x1x4x1xf32> to vector<4x1xf32>
    %560 = vector.broadcast %557 : vector<1x288xf32> to vector<4x288xf32>
    %561 = vector.broadcast %559 : vector<4x1xf32> to vector<4x288xf32>
    %562 = arith.mulf %560, %561 : vector<4x288xf32>
    %563 = arith.addf %556, %562 : vector<4x288xf32>
    %c0_463 = arith.constant 0 : index
    %c0_464 = arith.constant 0 : index
    %564 = vector.load %arg5[%c0_463, %c0_464] : memref<4x1xf32, #tpu.memory_space<vmem>>, vector<4x1xf32>
    %565 = vector.broadcast %564 : vector<4x1xf32> to vector<4x288xf32>
    %566 = arith.addf %563, %565 : vector<4x288xf32>
    %c0_465 = arith.constant 0 : index
    %c0_466 = arith.constant 0 : index
    %c128_467 = arith.constant 128 : index
    %567 = vector.load %arg1[%c0_465, %c0_466, %c128_467] : memref<1x4x512xf32, #tpu.memory_space<vmem>>, vector<1x4x288xf32>
    %568 = vector.shape_cast %567 : vector<1x4x288xf32> to vector<4x288xf32>
    %569 = arith.addf %566, %568 : vector<4x288xf32>
    %cst_468 = arith.constant 0.000000e+00 : f32
    %570 = vector.broadcast %cst_468 : f32 to vector<4x288xf32>
    %571 = arith.maximumf %569, %570 : vector<4x288xf32>
    %c0_469 = arith.constant 0 : index
    %c0_470 = arith.constant 0 : index
    %c0_471 = arith.constant 0 : index
    %572 = vector.load %arg6[%c0_469, %c0_470, %c0_471] : memref<1x4x288xf32, #tpu.memory_space<vmem>>, vector<1x4x288xf32>
    %573 = vector.shape_cast %572 : vector<1x4x288xf32> to vector<4x288xf32>
    %574 = vector.shape_cast %571 : vector<4x288xf32> to vector<1x4x288xf32>
    tpu.vector_store %arg6[%c0_469, %c0_470, %c0_471], %574 {strides = array<i32>} : memref<1x4x288xf32, #tpu.memory_space<vmem>>, vector<1x4x288xf32>,
    return
  }
  func.func @transform_0(%arg0: i32) -> (i32, i32, i32) {
    %c0_i32 = arith.constant 0 : i32
    %c0_i32_0 = arith.constant 0 : i32
    %c0_i32_1 = arith.constant 0 : i32
    return %arg0, %c0_i32, %c0_i32_0 : i32, i32, i32
  }
  func.func @transform_1(%arg0: i32) -> (i32, i32, i32, i32) {
    %c0_i32 = arith.constant 0 : i32
    %c0_i32_0 = arith.constant 0 : i32
    %c0_i32_1 = arith.constant 0 : i32
    %c0_i32_2 = arith.constant 0 : i32
    %c0_i32_3 = arith.constant 0 : i32
    return %c0_i32, %c0_i32_0, %c0_i32_1, %c0_i32_2 : i32, i32, i32, i32
  }
  func.func @transform_2(%arg0: i32) -> (i32, i32) {
    %c0_i32 = arith.constant 0 : i32
    %c0_i32_0 = arith.constant 0 : i32
    %c0_i32_1 = arith.constant 0 : i32
    return %c0_i32, %c0_i32_0 : i32, i32
  }
  func.func @transform_3(%arg0: i32) -> (i32, i32, i32, i32) {
    %c0_i32 = arith.constant 0 : i32
    %c0_i32_0 = arith.constant 0 : i32
    %c0_i32_1 = arith.constant 0 : i32
    %c0_i32_2 = arith.constant 0 : i32
    %c0_i32_3 = arith.constant 0 : i32
    return %c0_i32, %c0_i32_0, %c0_i32_1, %c0_i32_2 : i32, i32, i32, i32
  }
  func.func @transform_4(%arg0: i32) -> (i32, i32) {
    %c0_i32 = arith.constant 0 : i32
    %c0_i32_0 = arith.constant 0 : i32
    %c0_i32_1 = arith.constant 0 : i32
    return %c0_i32, %c0_i32_0 : i32, i32
  }
  func.func @transform_5(%arg0: i32) -> (i32, i32, i32) {
    %c0_i32 = arith.constant 0 : i32
    %c0_i32_0 = arith.constant 0 : i32
    %c0_i32_1 = arith.constant 0 : i32
    return %arg0, %c0_i32, %c0_i32_0 : i32, i32, i32
  }
}

</mosaic_0001>

<bundles_post_ra>
// kernel: tpu_custom_call.1
= control target key start
LH: loop header
LB: loop body
LE: loop exit
PB: predicated region body
PF: predicated region fallthrough
CT: control target
= control target key end

     0   :  { %10 = vsyncpa [#allocation4], 0  ;;  %s4864_s0 = inlined_call_operand.vmem [shape: f32[2,4,512], index: 0, kind: input, shape index: {}]   ;;  %s4865_s1 = inlined_call_operand.vmem [shape: f32[9,4,4,1], index: 1, kind: input, shape index: {}]   ;;  %s4866_s2 = inlined_call_operand.vmem [shape: f32[4,1], index: 2, kind: input, shape index: {}]   ;;  %s4867_s3 = inlined_call_operand.vmem [shape: f32[9,4,4,1], index: 3, kind: input, shape index: {}]   ;;  %s4868_s4 = inlined_call_operand.vmem [shape: f32[4,1], index: 4, kind: input, shape index: {}]   ;;  %s4869_s5 = inlined_call_operand.hbm [shape: f32[2,4,288], index: 5, kind: output, shape index: {}]  }
   0x1   :  { %12 = vsyncpa [#allocation4 + $0x1], 0  ;;  %s3101_s18 = smov 0   ;;  %s3103_s19 = smov 0  }
   0x2   :  { %s3105_s20 = smov 0   ;;  %s3107_s21 = smov 0  }
   0x3 LB: > { %s3122_s22 = sadd.s32 4294967295, %s3057_s21   ;;  %s2847_s23 = sadd.s32 4294967294, %s3057_s21   ;;  %s3057_s21 = sphi %s3107_s21, %s5027_s21   ;;  %s3053_s20 = sphi %s3105_s20, %s5026_s20   ;;  %s3049_s19 = sphi %s3103_s19, %s5025_s19   ;;  %s3045_s18 = sphi %s3101_s18, %s5024_s18  }
   0x4   : > { %s3126_s24 = sadd.s32 1, %s3057_s21   ;;  %s135_s25 = sadd.s32 1, %s3053_s20 }
   0x5   : > { %s132_s26 = ssub.s32 %s3057_s21, %s3126_s24  ;;  %p145_p0 = scmp.ne.s32.totalorder %s3053_s20, %s3049_s19 }
   0x6   : > { %p133_p1 = scmp.eq.s32.totalorder %s132_s26, 0  ;;  %p146_p2 = scmp.eq.s32.totalorder %s3122_s22, 1 }
   0x7   : > { %p151_p3 = scmp.ne.s32.totalorder %s3049_s19, %s3045_s18  ;;  %p152_p4 = scmp.eq.s32.totalorder %s2847_s23, 1 }
   0x8   : > { %s3137_s27 = scalar_select %p133_p1, %s3053_s20, %s135_s25  }
   0x9   : > { %p3139_p5 = por %p146_p2, %p145_p0  ;;  %p3143_p6 = por %p152_p4, %p151_p3 }
   0xa   : > { %p2850_p7 = scmp.ge.s32.totalorder %s3057_s21, 1  ;;  %p190_p8 = scmp.lt.s32.totalorder %s3057_s21, 3 }
   0xc   : > { %p191_p9 = pnand %p2850_p7, %p190_p8 }
   0xe   : > { %194 = sbr.rel (%p191_p9) target bundleno = 3432 (0xd68), region = 40 }
  0x15   : > { %v2856_v0 = vld [vmem:[%s4865_s1 + $0x8] sm:$0xf]  ;;  %v224_v1 = vld [vmem:[%s4865_s1] sm:$0xf]  ;;  %v3059_v2 = vmov 0   ;;  %p218_p10 = scmp.lt.s32.totalorder %s3122_s22, 1  ;;  %v4870_v18 = vlaneseq }
  0x16   : > { %2993 = vset.pattern.permute.xlu1 %v3059_v2  ;;  %2992 = vset.pattern.permute.xlu0 %v3059_v2  ;;  %v2858_v3 = vld [vmem:[%s4865_s1 + $0xc] sm:$0xf]  ;;  %v2854_v4 = vld [vmem:[%s4865_s1 + $0x4] sm:$0xf]  ;;  %v2860_v5 = vld [vmem:[%s4865_s1 + $0x14] sm:$0xf] }
  0x17   : > { %324 = vperm.xlu1 %2993, %v2856_v0   ;;  %248 = vperm.xlu0 %2992, %v224_v1   ;;  %v2859_v6 = vld [vmem:[%s4865_s1 + $0x10] sm:$0xf]  ;;  %v2862_v7 = vld [vmem:[%s4865_s1 + $0x1c] sm:$0xf]  ;;  %v2861_v8 = vld [vmem:[%s4865_s1 + $0x18] sm:$0xf] }
  0x18   : > { %v2864_v9 = vld [vmem:[%s4865_s1 + $0x24] sm:$0xf]  ;;  %v2863_v10 = vld [vmem:[%s4865_s1 + $0x20] sm:$0xf]  ;;  %v2866_v11 = vld [vmem:[%s4865_s1 + $0x2c] sm:$0xf] }
  0x19   : > { %v2865_v12 = vld [vmem:[%s4865_s1 + $0x28] sm:$0xf]  ;;  %v2868_v13 = vld [vmem:[%s4865_s1 + $0x34] sm:$0xf]  ;;  %v2867_v14 = vld [vmem:[%s4865_s1 + $0x30] sm:$0xf] }
  0x1a   : > { %v2870_v15 = vld [vmem:[%s4865_s1 + $0x3c] sm:$0xf]  ;;  %v2869_v16 = vld [vmem:[%s4865_s1 + $0x38] sm:$0xf]  ;;  %v2872_v17 = vld [vmem:[%s4865_s1 + $0x40] sm:$0xf] }
  0x1b   : > { %362 = vperm.xlu1 %2993, %v2858_v3   ;;  %286 = vperm.xlu0 %2992, %v2854_v4   ;;  %s219_s7 = scalar_select %p218_p10, %s3122_s22, 1  ;;  %v227_v19 = vshrl.u32 %v4870_v18, 7  ;;  %vm396_vm0 = vcmask 1039360   ;;  %vm533_vm1 = vcmask 1031168   ;;  %vm670_vm2 = vcmask 900096  }
  0x1c   : > { %s3060_s12 = smov 127   ;;  %s3061_s13 = smov 126   ;;  %vm821_vm3 = vcmask 891904   ;;  %vm992_vm4 = vcmask 883712   ;;  %vm1109_vm5 = vcmask 752640   ;;  %vm1226_vm6 = vcmask 744448  }
  0x1d   : > { %s2933_s8 = sshll.u32 %s219_s7, 4  ;;  %v3208_v20 = vsub.s32 0, %v227_v19  ;;  %v3210_v21 = vsub.s32 1, %v227_v19  ;;  %v3212_v22 = vsub.s32 2, %v227_v19  ;;  %v3214_v23 = vsub.s32 3, %v227_v19  ;;  %s3062_s14 = smov 110  }
  0x1e   : > { %s3206_s11 = scalar_lea.vmem %s4864_s0, %s2933_s8  ;;  %s3063_s15 = smov 109   ;;  %vm1343_vm7 = vcmask 736256   ;;  %vm1489_vm8 = vcmask 154624   ;;  %vm1506_vm12 = vcmask 257024   ;;  %vm2765_vm13 = vcmask 1043456  }
  0x1f   : > { %412 = vperm.xlu1 %2993, %v2860_v5   ;;  %377 = vperm.xlu0 %2992, %v2859_v6   ;;  %4929 = vst [vmem:[#allocation6_spill] sm:$0xff] %v3208_v20  ;;  %4930 = vst [vmem:[#allocation7_spill] sm:$0xff] %v3210_v21  ;;  %v2855_v24 = vld [vmem:[%s3206_s11 + $0x2] ss:$4 sm:$0xf]  ;;  %s3064_s8 = smov 108  }
  0x20   : > { %4931 = vst [vmem:[#allocation8_spill] sm:$0xff] %v3212_v22  ;;  %4932 = vst [vmem:[#allocation9_spill] sm:$0xff] %v3214_v23  ;;  %v223_v25 = vld [vmem:[%s3206_s11] ss:$4 sm:$0xf]  ;;  %v3220_v28 = vrot.slane %v2855_v24, %v3210_v21  ;;  %v3223_v29 = vrot.slane %v2855_v24, %v3212_v22  ;;  %v3226_v30 = vrot.slane %v2855_v24, %v3214_v23  ;;  %s4925_s6 = smov 92  }
  0x21   : > { %v2853_v26 = vld [vmem:[%s3206_s11 + $0x1] ss:$4 sm:$0xf]  ;;  %v2857_v32 = vld [vmem:[%s3206_s11 + $0x3] ss:$4 sm:$0xf]  ;;  %v3230_v33 = vrot.slane %v223_v25, %v3208_v20  ;;  %v3233_v34 = vrot.slane %v223_v25, %v3210_v21  ;;  %v3236_v35 = vrot.slane %v223_v25, %v3212_v22  ;;  %v3242_v37 = vrot.slane %v223_v25, %v3214_v23 }
  0x22   : > { %v3239_v36 = vrot.slane %v2853_v26, %v3208_v20  ;;  %v3245_v38 = vrot.slane %v2853_v26, %v3210_v21  ;;  %v3248_v39 = vrot.slane %v2853_v26, %v3212_v22  ;;  %v3251_v40 = vrot.slane %v2853_v26, %v3214_v23  ;;  %s4911_s30 = smov 91   ;;  %s4921_s7 = smov 90  }
  0x23   : > { %480 = vperm.xlu1 %2993, %v2862_v7   ;;  %446 = vperm.xlu0 %2992, %v2861_v8   ;;  %v3254_v41 = vrot.slane %v2855_v24, %v3208_v20  ;;  %v3257_v42 = vrot.slane %v2857_v32, %v3210_v21  ;;  %v3260_v43 = vrot.slane %v2857_v32, %v3212_v22  ;;  %s4923_s9 = smov 19   ;;  %s2941_s16 = smul.u32 192, %s3122_s22 }
  0x24   : > { %v3263_v44 = vrot.slane %v2857_v32, %v3214_v23  ;;  %v3269_v49 = vrot.slane %v2857_v32, %v3208_v20 }
  0x25   : > { %s4820_s26 = scalar_lea.hbm %s4869_s5, %s2941_s16 }
  0x27   : > { %549 = vperm.xlu1 %2993, %v2864_v9   ;;  %514 = vperm.xlu0 %2992, %v2863_v10  }
  0x2b   : > { %617 = vperm.xlu1 %2993, %v2866_v11   ;;  %583 = vperm.xlu0 %2992, %v2865_v12  }
  0x2f   : > { %686 = vperm.xlu1 %2993, %v2868_v13   ;;  %651 = vperm.xlu0 %2992, %v2867_v14  }
  0x33   : > { %754 = vperm.xlu1 %2993, %v2870_v15   ;;  %720 = vperm.xlu0 %2992, %v2869_v16  }
  0x37   : > { %806 = vperm.xlu0 %2992, %v2872_v17  }
  0x96   : > { %v325_v27 = vpop.permute.xlu1 %324  ;;  %v249_v31 = vpop.permute.xlu0 %248 }
  0x97   : > { %v328_v45 = vmul.f32 %v325_v27, %v3220_v28  ;;  %v329_v46 = vmul.f32 %v325_v27, %v3223_v29  ;;  %v330_v47 = vmul.f32 %v325_v27, %v3226_v30  ;;  %v251_v50 = vmul.f32 %v249_v31, %v3230_v33 }
  0x98   : > { %v252_v51 = vmul.f32 %v249_v31, %v3233_v34  ;;  %v253_v52 = vmul.f32 %v249_v31, %v3236_v35  ;;  %v254_v54 = vmul.f32 %v249_v31, %v3242_v37  ;;  %v327_v59 = vmul.f32 %v325_v27, %v3254_v41 }
  0x9a   : > { %v287_v48 = vpop.permute.xlu0 %286  ;;  %v363_v55 = vpop.permute.xlu1 %362 }
  0x9b   : > { %v289_v53 = vmul.f32 %v287_v48, %v3239_v36  ;;  %v290_v56 = vmul.f32 %v287_v48, %v3245_v38  ;;  %v291_v57 = vmul.f32 %v287_v48, %v3248_v39  ;;  %v292_v58 = vmul.f32 %v287_v48, %v3251_v40 }
  0x9c   : > { %v366_v60 = vmul.f32 %v363_v55, %v3257_v42  ;;  %v367_v61 = vmul.f32 %v363_v55, %v3260_v43  ;;  %v368_v63 = vmul.f32 %v363_v55, %v3263_v44  ;;  %v365_v9 = vmul.f32 %v363_v55, %v3269_v49 }
  0x9d   : > { %v293_v62 = vadd.f32 %v289_v53, %v251_v50  ;;  %v294_v0 = vadd.f32 %v290_v56, %v252_v51  ;;  %v295_v1 = vadd.f32 %v291_v57, %v253_v52  ;;  %v296_v2 = vadd.f32 %v292_v58, %v254_v54 }
  0x9e   : > { %v378_v3 = vpop.permute.xlu0 %377  ;;  %v413_v16 = vpop.permute.xlu1 %412 }
  0x9f   : > { %v381_v4 = vmul.f32 %v378_v3, %v3233_v34  ;;  %v380_v5 = vmul.f32 %v378_v3, %v3230_v33  ;;  %v332_v6 = vadd.f32 %v328_v45, %v294_v0  ;;  %v333_v7 = vadd.f32 %v329_v46, %v295_v1 }
  0xa0   : > { %v334_v8 = vadd.f32 %v330_v47, %v296_v2  ;;  %v331_v10 = vadd.f32 %v327_v59, %v293_v62  ;;  %v383_v14 = vmul.f32 %v378_v3, %v3242_v37  ;;  %v382_v15 = vmul.f32 %v378_v3, %v3236_v35 }
  0xa1   : > { %390 = vrot.lane.b32.xlu0 %v381_v4, %s3060_s12  ;;  %388 = vrot.lane.b32.xlu1 %v380_v5, %s3060_s12  ;;  %v3290_v12 = vadd.f32 %v366_v60, %v332_v6  ;;  %v3292_v13 = vadd.f32 %v367_v61, %v333_v7  ;;  %v415_v19 = vmul.f32 %v413_v16, %v3239_v36 }
  0xa2   : > { %v3288_v11 = vadd.f32 %v368_v63, %v334_v8  ;;  %v3298_v17 = vadd.f32 %v365_v9, %v331_v10  ;;  %v416_v24 = vmul.f32 %v413_v16, %v3245_v38  ;;  %v417_v25 = vmul.f32 %v413_v16, %v3248_v39  ;;  %v447_v27 = vpop.permute.xlu0 %446  ;;  %v481_v47 = vpop.permute.xlu1 %480 }
  0xa3   : > { %v418_v26 = vmul.f32 %v413_v16, %v3251_v40  ;;  %v450_v31 = vmul.f32 %v447_v27, %v3220_v28  ;;  %v449_v32 = vmul.f32 %v447_v27, %v3254_v41  ;;  %v452_v45 = vmul.f32 %v447_v27, %v3226_v30 }
  0xa4   : > { %v451_v46 = vmul.f32 %v447_v27, %v3223_v29  ;;  %v483_v48 = vmul.f32 %v481_v47, %v3269_v49  ;;  %v484_v50 = vmul.f32 %v481_v47, %v3257_v42  ;;  %v485_v51 = vmul.f32 %v481_v47, %v3260_v43 }
  0xa5   : > { %394 = vrot.lane.b32.xlu0 %v383_v14, %s3060_s12  ;;  %392 = vrot.lane.b32.xlu1 %v382_v15, %s3060_s12  ;;  %v486_v52 = vmul.f32 %v481_v47, %v3263_v44 }
  0xa6   : > { %v515_v53 = vpop.permute.xlu0 %514  ;;  %v550_v58 = vpop.permute.xlu1 %549 }
  0xa7   : > { %v518_v54 = vmul.f32 %v515_v53, %v3233_v34  ;;  %v517_v55 = vmul.f32 %v515_v53, %v3230_v33  ;;  %v520_v56 = vmul.f32 %v515_v53, %v3242_v37  ;;  %v519_v57 = vmul.f32 %v515_v53, %v3236_v35 }
  0xa8   : > { %v552_v59 = vmul.f32 %v550_v58, %v3239_v36  ;;  %v553_v60 = vmul.f32 %v550_v58, %v3245_v38  ;;  %v554_v61 = vmul.f32 %v550_v58, %v3248_v39  ;;  %v555_v62 = vmul.f32 %v550_v58, %v3251_v40 }
  0xa9   : > { %423 = vrot.lane.b32.xlu0 %v415_v19, %s3060_s12  ;;  %425 = vrot.lane.b32.xlu1 %v416_v24, %s3060_s12 }
  0xaa   : > { %v584_v63 = vpop.permute.xlu0 %583  ;;  %v618_v4 = vpop.permute.xlu1 %617 }
  0xab   : > { %v587_v0 = vmul.f32 %v584_v63, %v3220_v28  ;;  %v586_v1 = vmul.f32 %v584_v63, %v3254_v41  ;;  %v589_v2 = vmul.f32 %v584_v63, %v3226_v30  ;;  %v588_v3 = vmul.f32 %v584_v63, %v3223_v29 }
  0xac   : > { %v620_v5 = vmul.f32 %v618_v4, %v3269_v49  ;;  %v621_v6 = vmul.f32 %v618_v4, %v3257_v42  ;;  %v622_v7 = vmul.f32 %v618_v4, %v3260_v43  ;;  %v623_v8 = vmul.f32 %v618_v4, %v3263_v44 }
  0xad   : > { %427 = vrot.lane.b32.xlu0 %v417_v25, %s3060_s12  ;;  %429 = vrot.lane.b32.xlu1 %v418_v26, %s3060_s12 }
  0xae   : > { %v652_v9 = vpop.permute.xlu0 %651  ;;  %v687_v19 = vpop.permute.xlu1 %686 }
  0xaf   : > { %v655_v10 = vmul.f32 %v652_v9, %v3233_v34  ;;  %v654_v14 = vmul.f32 %v652_v9, %v3230_v33  ;;  %v657_v15 = vmul.f32 %v652_v9, %v3242_v37  ;;  %v656_v16 = vmul.f32 %v652_v9, %v3236_v35 }
  0xb0   : > { %v689_v24 = vmul.f32 %v687_v19, %v3239_v36  ;;  %v690_v34 = vmul.f32 %v687_v19, %v3245_v38  ;;  %v691_v33 = vmul.f32 %v687_v19, %v3248_v39  ;;  %v692_v37 = vmul.f32 %v687_v19, %v3251_v40 }
  0xb1   : > { %459 = vrot.lane.b32.xlu0 %v450_v31, %s3060_s12  ;;  %457 = vrot.lane.b32.xlu1 %v449_v32, %s3060_s12 }
  0xb2   : > { %v721_v25 = vpop.permute.xlu0 %720  ;;  %v755_v26 = vpop.permute.xlu1 %754 }
  0xb3   : > { %v724_v35 = vmul.f32 %v721_v25, %v3220_v28  ;;  %v723_v36 = vmul.f32 %v721_v25, %v3254_v41  ;;  %v726_v38 = vmul.f32 %v721_v25, %v3226_v30  ;;  %v725_v39 = vmul.f32 %v721_v25, %v3223_v29  ;;  %v2871_v28 = vld [vmem:[%s3206_s11 + $0x4] ss:$4 sm:$0x7] }
  0xb4   : > { %v757_v40 = vmul.f32 %v755_v26, %v3269_v49  ;;  %v758_v27 = vmul.f32 %v755_v26, %v3257_v42  ;;  %v759_v41 = vmul.f32 %v755_v26, %v3260_v43  ;;  %v760_v30 = vmul.f32 %v755_v26, %v3263_v44  ;;  %v2874_v43 = vld [vmem:[%s4865_s1 + $0x44] sm:$0xf] }
  0xb5   : > { %463 = vrot.lane.b32.xlu0 %v452_v45, %s3060_s12  ;;  %461 = vrot.lane.b32.xlu1 %v451_v46, %s3060_s12  ;;  %v3388_v29 = vrot.slane %v2871_v28, %v3210_v21  ;;  %v3391_v31 = vrot.slane %v2871_v28, %v3208_v20  ;;  %v3398_v45 = vrot.slane %v2871_v28, %v3212_v22  ;;  %v2877_v28 = vld [vmem:[%s3206_s11 + $0x7] ss:$4 sm:$0x7] }
  0xb6   : > { %v807_v32 = vpop.permute.xlu0 %806 }
  0xb7   : > { %v810_v42 = vmul.f32 %v807_v32, %v3388_v29  ;;  %v809_v49 = vmul.f32 %v807_v32, %v3391_v31  ;;  %v811_v44 = vmul.f32 %v807_v32, %v3398_v45  ;;  %v3504_v32 = vrot.slane %v2877_v28, %v3208_v20 }
  0xb9   : > { %491 = vrot.lane.b32.xlu0 %v483_v48, %s3060_s12  ;;  %493 = vrot.lane.b32.xlu1 %v484_v50, %s3060_s12 }
  0xbd   : > { %495 = vrot.lane.b32.xlu0 %v485_v51, %s3060_s12  ;;  %497 = vrot.lane.b32.xlu1 %v486_v52, %s3060_s12 }
  0xc1   : > { %527 = vrot.lane.b32.xlu0 %v518_v54, %s3061_s13  ;;  %525 = vrot.lane.b32.xlu1 %v517_v55, %s3061_s13 }
  0xc5   : > { %531 = vrot.lane.b32.xlu0 %v520_v56, %s3061_s13  ;;  %529 = vrot.lane.b32.xlu1 %v519_v57, %s3061_s13 }
  0xc9   : > { %560 = vrot.lane.b32.xlu0 %v552_v59, %s3061_s13  ;;  %562 = vrot.lane.b32.xlu1 %v553_v60, %s3061_s13 }
  0xcd   : > { %564 = vrot.lane.b32.xlu0 %v554_v61, %s3061_s13  ;;  %566 = vrot.lane.b32.xlu1 %v555_v62, %s3061_s13 }
  0xd1   : > { %596 = vrot.lane.b32.xlu0 %v587_v0, %s3061_s13  ;;  %594 = vrot.lane.b32.xlu1 %v586_v1, %s3061_s13 }
  0xd5   : > { %600 = vrot.lane.b32.xlu0 %v589_v2, %s3061_s13  ;;  %598 = vrot.lane.b32.xlu1 %v588_v3, %s3061_s13 }
  0xd9   : > { %628 = vrot.lane.b32.xlu0 %v620_v5, %s3061_s13  ;;  %630 = vrot.lane.b32.xlu1 %v621_v6, %s3061_s13 }
  0xdd   : > { %632 = vrot.lane.b32.xlu0 %v622_v7, %s3061_s13  ;;  %634 = vrot.lane.b32.xlu1 %v623_v8, %s3061_s13  ;;  %v2873_v7 = vld [vmem:[%s3206_s11 + $0x5] ss:$4 sm:$0x7] }
  0xde   : > { %v3459_v9 = vrot.slane %v2873_v7, %v3210_v21  ;;  %v3467_v19 = vrot.slane %v2873_v7, %v3212_v22 }
  0xe1   : > { %664 = vrot.lane.b32.xlu0 %v655_v10, %s3062_s14  ;;  %662 = vrot.lane.b32.xlu1 %v654_v14, %s3062_s14  ;;  %v3462_v10 = vrot.slane %v2873_v7, %v3208_v20  ;;  %v2879_v7 = vld [vmem:[%s4865_s1 + $0x50] sm:$0xf] }
  0xe5   : > { %668 = vrot.lane.b32.xlu0 %v657_v15, %s3062_s14  ;;  %666 = vrot.lane.b32.xlu1 %v656_v16, %s3062_s14 }
  0xe9   : > { %697 = vrot.lane.b32.xlu0 %v689_v24, %s3062_s14  ;;  %699 = vrot.lane.b32.xlu1 %v690_v34, %s3062_s14  ;;  %v2876_v24 = vld [vmem:[%s4865_s1 + $0x48] sm:$0xf] }
  0xed   : > { %701 = vrot.lane.b32.xlu0 %v691_v33, %s3062_s14  ;;  %703 = vrot.lane.b32.xlu1 %v692_v37, %s3062_s14  ;;  %v2875_v33 = vld [vmem:[%s3206_s11 + $0x6] ss:$4 sm:$0x7] }
  0xee   : > { %v3480_v25 = vrot.slane %v2875_v33, %v3210_v21  ;;  %v3488_v26 = vrot.slane %v2875_v33, %v3212_v22 }
  0xf1   : > { %733 = vrot.lane.b32.xlu0 %v724_v35, %s3062_s14  ;;  %731 = vrot.lane.b32.xlu1 %v723_v36, %s3062_s14  ;;  %v3483_v35 = vrot.slane %v2875_v33, %v3208_v20  ;;  %v2880_v33 = vld [vmem:[%s4865_s1 + $0x54] sm:$0xf] }
  0xf5   : > { %737 = vrot.lane.b32.xlu0 %v726_v38, %s3062_s14  ;;  %735 = vrot.lane.b32.xlu1 %v725_v39, %s3062_s14 }
  0xf9   : > { %765 = vrot.lane.b32.xlu0 %v757_v40, %s3062_s14  ;;  %767 = vrot.lane.b32.xlu1 %v758_v27, %s3062_s14  ;;  %v2878_v40 = vld [vmem:[%s4865_s1 + $0x4c] sm:$0xf] }
  0xfd   : > { %769 = vrot.lane.b32.xlu0 %v759_v41, %s3062_s14  ;;  %771 = vrot.lane.b32.xlu1 %v760_v30, %s3062_s14  ;;  %v3501_v30 = vrot.slane %v2877_v28, %v3210_v21 }
 0x101   : > { %817 = vrot.lane.b32.xlu0 %v810_v42, %s3063_s15  ;;  %815 = vrot.lane.b32.xlu1 %v809_v49, %s3063_s15 }
 0x105   : > { %854 = vperm.xlu0 %2992, %v2874_v43   ;;  %819 = vrot.lane.b32.xlu1 %v811_v44, %s3063_s15  ;;  %v3509_v44 = vrot.slane %v2877_v28, %v3212_v22  ;;  %v2881_v28 = vld [vmem:[%s4865_s1 + $0x58] sm:$0xf] }
 0x113   : > { %v3407_v46 = vpop.permute.xlu0 %390 }
 0x117   : > { %v3409_v47 = vpop.permute.xlu0 %394 }
 0x11b   : > { %v3411_v48 = vpop.permute.xlu0 %423 }
 0x11f   : > { %v3413_v50 = vpop.permute.xlu0 %427 }
 0x123   : > { %v3415_v51 = vpop.permute.xlu0 %459 }
 0x127   : > { %v3417_v52 = vpop.permute.xlu0 %463 }
 0x12b   : > { %v3419_v53 = vpop.permute.xlu0 %491 }
 0x12f   : > { %v3421_v54 = vpop.permute.xlu0 %495 }
 0x133   : > { %v3423_v55 = vpop.permute.xlu0 %527 }
 0x137   : > { %v3425_v56 = vpop.permute.xlu0 %531 }
 0x13b   : > { %v3427_v57 = vpop.permute.xlu0 %560 }
 0x13f   : > { %v3429_v58 = vpop.permute.xlu0 %564 }
 0x143   : > { %v3431_v59 = vpop.permute.xlu0 %596 }
 0x147   : > { %v3433_v60 = vpop.permute.xlu0 %600 }
 0x14b   : > { %v3435_v61 = vpop.permute.xlu0 %628 }
 0x14f   : > { %v3437_v62 = vpop.permute.xlu0 %632 }
 0x153   : > { %v3439_v63 = vpop.permute.xlu0 %664 }
 0x157   : > { %v3441_v0 = vpop.permute.xlu0 %668 }
 0x15b   : > { %v3443_v1 = vpop.permute.xlu0 %697 }
 0x15f   : > { %v3445_v2 = vpop.permute.xlu0 %701 }
 0x163   : > { %v3447_v3 = vpop.permute.xlu0 %733 }
 0x167   : > { %v3449_v4 = vpop.permute.xlu0 %737 }
 0x168   : > { %4933 = vst [vmem:[#allocation10_spill] sm:$0xff] %v3449_v4 }
 0x16b   : > { %v3451_v5 = vpop.permute.xlu0 %765 }
 0x16c   : > { %4934 = vst [vmem:[#allocation11_spill] sm:$0xff] %v3451_v5 }
 0x16f   : > { %v3453_v6 = vpop.permute.xlu0 %769 }
 0x170   : > { %4935 = vst [vmem:[#allocation12_spill] sm:$0xff] %v3453_v6 }
 0x173   : > { %v3456_v8 = vpop.permute.xlu0 %817 }
 0x174   : > { %4936 = vst [vmem:[#allocation13_spill] sm:$0xff] %v3456_v8 }
 0x184   : > { %v855_v14 = vpop.permute.xlu0 %854 }
 0x185   : > { %v858_v15 = vmul.f32 %v855_v14, %v3459_v9  ;;  %v857_v16 = vmul.f32 %v855_v14, %v3462_v10  ;;  %v859_v34 = vmul.f32 %v855_v14, %v3467_v19 }
 0x187   : > { %865 = vrot.lane.b32.xlu0 %v858_v15, %s3063_s15  ;;  %863 = vrot.lane.b32.xlu1 %v857_v16, %s3063_s15 }
 0x18b   : > { %901 = vperm.xlu0 %2992, %v2876_v24   ;;  %867 = vrot.lane.b32.xlu1 %v859_v34, %s3063_s15 }
 0x1f9   : > { %v3477_v37 = vpop.permute.xlu0 %865 }
 0x1fa   : > { %4937 = vst [vmem:[#allocation14_spill] sm:$0xff] %v3477_v37 }
 0x20a   : > { %v902_v36 = vpop.permute.xlu0 %901 }
 0x20b   : > { %v905_v38 = vmul.f32 %v902_v36, %v3480_v25  ;;  %v904_v39 = vmul.f32 %v902_v36, %v3483_v35  ;;  %v906_v27 = vmul.f32 %v902_v36, %v3488_v26 }
 0x20d   : > { %912 = vrot.lane.b32.xlu0 %v905_v38, %s3063_s15  ;;  %910 = vrot.lane.b32.xlu1 %v904_v39, %s3063_s15 }
 0x211   : > { %948 = vperm.xlu0 %2992, %v2878_v40   ;;  %914 = vrot.lane.b32.xlu1 %v906_v27, %s3063_s15 }
 0x27f   : > { %v3498_v41 = vpop.permute.xlu0 %912 }
 0x280   : > { %4938 = vst [vmem:[#allocation15_spill] sm:$0xff] %v3498_v41 }
 0x290   : > { %v949_v42 = vpop.permute.xlu0 %948 }
 0x291   : > { %v952_v49 = vmul.f32 %v949_v42, %v3501_v30  ;;  %v951_v43 = vmul.f32 %v949_v42, %v3504_v32  ;;  %v953_v14 = vmul.f32 %v949_v42, %v3509_v44 }
 0x293   : > { %959 = vrot.lane.b32.xlu0 %v952_v49, %s3063_s15  ;;  %957 = vrot.lane.b32.xlu1 %v951_v43, %s3063_s15 }
 0x297   : > { %977 = vperm.xlu0 %2992, %v2879_v7   ;;  %961 = vrot.lane.b32.xlu1 %v953_v14, %s3063_s15 }
 0x305   : > { %v3518_v15 = vpop.permute.xlu0 %959 }
 0x306   : > { %4939 = vst [vmem:[#allocation16_spill] sm:$0xff] %v3518_v15 }
 0x316   : > { %v978_v16 = vpop.permute.xlu0 %977 }
 0x317   : > { %v981_v24 = vmul.f32 %v978_v16, %v3388_v29  ;;  %v980_v34 = vmul.f32 %v978_v16, %v3391_v31  ;;  %v982_v36 = vmul.f32 %v978_v16, %v3398_v45  ;;  %v2882_v16 = vld [vmem:[%s4865_s1 + $0x5c] sm:$0xf] }
 0x319   : > { %988 = vrot.lane.b32.xlu0 %v981_v24, %s3064_s8  ;;  %986 = vrot.lane.b32.xlu1 %v980_v34, %s3064_s8 }
 0x31d   : > { %1007 = vperm.xlu0 %2992, %v2880_v33   ;;  %990 = vrot.lane.b32.xlu1 %v982_v36, %s3064_s8 }
 0x38b   : > { %v3529_v38 = vpop.permute.xlu0 %988 }
 0x38c   : > { %4940 = vst [vmem:[#allocation17_spill] sm:$0xff] %v3529_v38 }
 0x39c   : > { %v1008_v39 = vpop.permute.xlu0 %1007 }
 0x39d   : > { %v1011_v40 = vmul.f32 %v1008_v39, %v3459_v9  ;;  %v1010_v27 = vmul.f32 %v1008_v39, %v3462_v10  ;;  %v1012_v42 = vmul.f32 %v1008_v39, %v3467_v19 }
 0x39f   : > { %1018 = vrot.lane.b32.xlu0 %v1011_v40, %s3064_s8  ;;  %1016 = vrot.lane.b32.xlu1 %v1010_v27, %s3064_s8  ;;  %v2883_v40 = vld [vmem:[%s4865_s1 + $0x60] sm:$0xf] }
 0x3a3   : > { %1036 = vperm.xlu0 %2992, %v2881_v28   ;;  %1020 = vrot.lane.b32.xlu1 %v1012_v42, %s3064_s8 }
 0x411   : > { %v3540_v49 = vpop.permute.xlu0 %1018 }
 0x412   : > { %4941 = vst [vmem:[#allocation18_spill] sm:$0xff] %v3540_v49 }
 0x422   : > { %v1037_v43 = vpop.permute.xlu0 %1036 }
 0x423   : > { %v1040_v7 = vmul.f32 %v1037_v43, %v3480_v25  ;;  %v1039_v14 = vmul.f32 %v1037_v43, %v3483_v35  ;;  %v1041_v24 = vmul.f32 %v1037_v43, %v3488_v26 }
 0x425   : > { %1047 = vrot.lane.b32.xlu0 %v1040_v7, %s3064_s8  ;;  %1045 = vrot.lane.b32.xlu1 %v1039_v14, %s3064_s8  ;;  %v2884_v14 = vld [vmem:[%s4865_s1 + $0x64] sm:$0xf] }
 0x429   : > { %1065 = vperm.xlu0 %2992, %v2882_v16   ;;  %1049 = vrot.lane.b32.xlu1 %v1041_v24, %s3064_s8 }
 0x497   : > { %v3551_v34 = vpop.permute.xlu0 %1047 }
 0x498   : > { %4942 = vst [vmem:[#allocation19_spill] sm:$0xff] %v3551_v34 }
 0x4a8   : > { %v1066_v33 = vpop.permute.xlu0 %1065 }
 0x4a9   : > { %v1069_v36 = vmul.f32 %v1066_v33, %v3501_v30  ;;  %v1068_v39 = vmul.f32 %v1066_v33, %v3504_v32  ;;  %v1070_v27 = vmul.f32 %v1066_v33, %v3509_v44 }
 0x4ab   : > { %1076 = vrot.lane.b32.xlu0 %v1069_v36, %s3064_s8  ;;  %1074 = vrot.lane.b32.xlu1 %v1068_v39, %s3064_s8 }
 0x4af   : > { %1094 = vperm.xlu0 %2992, %v2883_v40   ;;  %1078 = vrot.lane.b32.xlu1 %v1070_v27, %s3064_s8  ;;  %v2885_v40 = vld [vmem:[%s4865_s1 + $0x68] sm:$0xf] }
 0x51d   : > { %v3562_v28 = vpop.permute.xlu0 %1076 }
 0x51e   : > { %4943 = vst [vmem:[#allocation20_spill] sm:$0xff] %v3562_v28 }
 0x52e   : > { %v1095_v42 = vpop.permute.xlu0 %1094 }
 0x52f   : > { %v1098_v43 = vmul.f32 %v1095_v42, %v3388_v29  ;;  %v1097_v7 = vmul.f32 %v1095_v42, %v3391_v31  ;;  %v1099_v16 = vmul.f32 %v1095_v42, %v3398_v45 }
 0x531   : > { %1105 = vrot.lane.b32.xlu0 %v1098_v43, %s4925_s6  ;;  %1103 = vrot.lane.b32.xlu1 %v1097_v7, %s4925_s6 }
 0x535   : > { %1124 = vperm.xlu0 %2992, %v2884_v14   ;;  %1107 = vrot.lane.b32.xlu1 %v1099_v16, %s4925_s6  ;;  %v2886_v16 = vld [vmem:[%s4865_s1 + $0x6c] sm:$0xf] }
 0x5a3   : > { %v3573_v24 = vpop.permute.xlu0 %1105 }
 0x5a4   : > { %4944 = vst [vmem:[#allocation21_spill] sm:$0xff] %v3573_v24 }
 0x5b4   : > { %v1125_v33 = vpop.permute.xlu0 %1124 }
 0x5b5   : > { %v1127_v36 = vmul.f32 %v1125_v33, %v3462_v10  ;;  %v1128_v39 = vmul.f32 %v1125_v33, %v3459_v9  ;;  %v1129_v27 = vmul.f32 %v1125_v33, %v3467_v19 }
 0x5b7   : > { %1135 = vrot.lane.b32.xlu0 %v1128_v39, %s4925_s6  ;;  %1133 = vrot.lane.b32.xlu1 %v1127_v36, %s4925_s6 }
 0x5bb   : > { %1153 = vperm.xlu0 %2992, %v2885_v40   ;;  %1137 = vrot.lane.b32.xlu1 %v1129_v27, %s4925_s6 }
 0x629   : > { %v3584_v42 = vpop.permute.xlu0 %1135 }
 0x62a   : > { %4945 = vst [vmem:[#allocation22_spill] sm:$0xff] %v3584_v42 }
 0x63a   : > { %v1154_v43 = vpop.permute.xlu0 %1153 }
 0x63b   : > { %v1156_v7 = vmul.f32 %v1154_v43, %v3483_v35  ;;  %v1157_v14 = vmul.f32 %v1154_v43, %v3480_v25  ;;  %v1158_v33 = vmul.f32 %v1154_v43, %v3488_v26 }
 0x63d   : > { %1164 = vrot.lane.b32.xlu0 %v1157_v14, %s4925_s6  ;;  %1162 = vrot.lane.b32.xlu1 %v1156_v7, %s4925_s6  ;;  %v2887_v7 = vld [vmem:[%s4865_s1 + $0x70] sm:$0xf] }
 0x641   : > { %1182 = vperm.xlu0 %2992, %v2886_v16   ;;  %1166 = vrot.lane.b32.xlu1 %v1158_v33, %s4925_s6 }
 0x6af   : > { %v3595_v36 = vpop.permute.xlu0 %1164 }
 0x6b0   : > { %4946 = vst [vmem:[#allocation23_spill] sm:$0xff] %v3595_v36 }
 0x6c0   : > { %v1183_v39 = vpop.permute.xlu0 %1182 }
 0x6c1   : > { %v1185_v40 = vmul.f32 %v1183_v39, %v3504_v32  ;;  %v1186_v27 = vmul.f32 %v1183_v39, %v3501_v30  ;;  %v1187_v43 = vmul.f32 %v1183_v39, %v3509_v44 }
 0x6c3   : > { %1193 = vrot.lane.b32.xlu0 %v1186_v27, %s4925_s6  ;;  %1191 = vrot.lane.b32.xlu1 %v1185_v40, %s4925_s6  ;;  %v2888_v40 = vld [vmem:[%s4865_s1 + $0x74] sm:$0xf]  ;;  %v3616_v27 = vpop.permute.xlu1 %388 }
 0x6c7   : > { %1211 = vperm.xlu0 %2992, %v2887_v7   ;;  %1195 = vrot.lane.b32.xlu1 %v1187_v43, %s4925_s6  ;;  %v3621_v22 = vpop.permute.xlu1 %392 }
 0x735   : > { %v3606_v14 = vpop.permute.xlu0 %1193 }
 0x736   : > { %4947 = vst [vmem:[#allocation24_spill] sm:$0xff] %v3606_v14 }
 0x746   : > { %v1212_v16 = vpop.permute.xlu0 %1211 }
 0x747   : > { %v1214_v33 = vmul.f32 %v1212_v16, %v3391_v31  ;;  %v1215_v18 = vmul.f32 %v1212_v16, %v3388_v29  ;;  %v1216_v39 = vmul.f32 %v1212_v16, %v3398_v45  ;;  %v2889_v16 = vld [vmem:[%s4865_s1 + $0x78] sm:$0xf] }
 0x749   : > { %1222 = vrot.lane.b32.xlu0 %v1215_v18, %s4911_s30  ;;  %1220 = vrot.lane.b32.xlu1 %v1214_v33, %s4911_s30 }
 0x74d   : > { %1241 = vperm.xlu0 %2992, %v2888_v40   ;;  %1224 = vrot.lane.b32.xlu1 %v1216_v39, %s4911_s30  ;;  %v3631_v39 = vpop.permute.xlu1 %425 }
 0x751   : > { %v3636_v21 = vpop.permute.xlu1 %429 }
 0x7bb   : > { %v3619_v7 = vpop.permute.xlu0 %1222 }
 0x7bc   : > { %4948 = vst [vmem:[#allocation25_spill] sm:$0xff] %v3619_v7 }
 0x7cc   : > { %v1242_v43 = vpop.permute.xlu0 %1241 }
 0x7cd   : > { %v1244_v18 = vmul.f32 %v1242_v43, %v3462_v10  ;;  %v1245_v33 = vmul.f32 %v1242_v43, %v3459_v9  ;;  %v1246_v40 = vmul.f32 %v1242_v43, %v3467_v19  ;;  %v2890_v43 = vld [vmem:[%s4865_s1 + $0x7c] sm:$0xf] }
 0x7cf   : > { %1252 = vrot.lane.b32.xlu0 %v1245_v33, %s4911_s30  ;;  %1250 = vrot.lane.b32.xlu1 %v1244_v18, %s4911_s30 }
 0x7d3   : > { %1270 = vperm.xlu0 %2992, %v2889_v16   ;;  %1254 = vrot.lane.b32.xlu1 %v1246_v40, %s4911_s30  ;;  %v3646_v40 = vpop.permute.xlu1 %457 }
 0x7d7   : > { %v3651_v14 = vpop.permute.xlu1 %461 }
 0x841   : > { %v3634_v23 = vpop.permute.xlu0 %1252 }
 0x842   : > { %4949 = vst [vmem:[#allocation26_spill] sm:$0xff] %v3634_v23 }
 0x852   : > { %v1271_v20 = vpop.permute.xlu0 %1270 }
 0x853   : > { %v1273_v33 = vmul.f32 %v1271_v20, %v3483_v35  ;;  %v1274_v18 = vmul.f32 %v1271_v20, %v3480_v25  ;;  %v1275_v16 = vmul.f32 %v1271_v20, %v3488_v26  ;;  %v2891_v20 = vld [vmem:[%s4865_s1 + $0x80] sm:$0xf] }
 0x855   : > { %1281 = vrot.lane.b32.xlu0 %v1274_v18, %s4911_s30  ;;  %1279 = vrot.lane.b32.xlu1 %v1273_v33, %s4911_s30 }
 0x859   : > { %1299 = vperm.xlu0 %2992, %v2890_v43   ;;  %1283 = vrot.lane.b32.xlu1 %v1275_v16, %s4911_s30  ;;  %v3661_v16 = vpop.permute.xlu1 %493 }
 0x85d   : > { %v3666_v42 = vpop.permute.xlu1 %497 }
 0x8c7   : > { %v3649_v23 = vpop.permute.xlu0 %1281 }
 0x8c8   : > { %4950 = vst [vmem:[#allocation27_spill] sm:$0xff] %v3649_v23 }
 0x8d8   : > { %v1300_v7 = vpop.permute.xlu0 %1299 }
 0x8d9   : > { %v1302_v18 = vmul.f32 %v1300_v7, %v3504_v32  ;;  %v1303_v33 = vmul.f32 %v1300_v7, %v3501_v30  ;;  %v1304_v43 = vmul.f32 %v1300_v7, %v3509_v44  ;;  %v2892_v7 = vld [vmem:[%s4865_s1 + $0x84] sm:$0xf] }
 0x8db   : > { %1310 = vrot.lane.b32.xlu0 %v1303_v33, %s4911_s30  ;;  %1308 = vrot.lane.b32.xlu1 %v1302_v18, %s4911_s30 }
 0x8df   : > { %1328 = vperm.xlu0 %2992, %v2891_v20   ;;  %1312 = vrot.lane.b32.xlu1 %v1304_v43, %s4911_s30  ;;  %v3676_v43 = vpop.permute.xlu1 %525 }
 0x94d   : > { %v3664_v23 = vpop.permute.xlu0 %1310 }
 0x94e   : > { %4951 = vst [vmem:[#allocation28_spill] sm:$0xff] %v3664_v23  ;;  %v3679_v23 = vpop.permute.xlu1 %529 }
 0x95e   : > { %v1329_v36 = vpop.permute.xlu0 %1328 }
 0x95f   : > { %v1331_v33 = vmul.f32 %v1329_v36, %v3391_v31  ;;  %v1332_v18 = vmul.f32 %v1329_v36, %v3388_v29  ;;  %v1333_v20 = vmul.f32 %v1329_v36, %v3398_v45  ;;  %v3681_v31 = vpop.permute.xlu1 %562  ;;  %v2893_v36 = vld [vmem:[%s4865_s1 + $0x88] sm:$0xf] }
 0x961   : > { %1339 = vrot.lane.b32.xlu0 %v1332_v18, %s4921_s7  ;;  %1337 = vrot.lane.b32.xlu1 %v1331_v33, %s4921_s7 }
 0x963   : > { %v3683_v29 = vpop.permute.xlu1 %566 }
 0x965   : > { %1358 = vperm.xlu0 %2992, %v2892_v7   ;;  %1341 = vrot.lane.b32.xlu1 %v1333_v20, %s4921_s7 }
 0x967   : > { %v3687_v33 = vpop.permute.xlu1 %594 }
 0x96b   : > { %v3696_v7 = vpop.permute.xlu1 %598 }
 0x9d3   : > { %v3685_v18 = vpop.permute.xlu0 %1339 }
 0x9d4   : > { %4952 = vst [vmem:[#allocation29_spill] sm:$0xff] %v3685_v18 }
 0x9e4   : > { %v1359_v24 = vpop.permute.xlu0 %1358 }
 0x9e5   : > { %v1361_v28 = vmul.f32 %v1359_v24, %v3462_v10  ;;  %v1362_v45 = vmul.f32 %v1359_v24, %v3459_v9  ;;  %v1363_v20 = vmul.f32 %v1359_v24, %v3467_v19  ;;  %v2894_v10 = vld [vmem:[%s4865_s1 + $0x8c] sm:$0xf]  ;;  %v3703_v9 = vpop.permute.xlu1 %630 }
 0x9e7   : > { %1369 = vrot.lane.b32.xlu0 %v1362_v45, %s4921_s7  ;;  %1367 = vrot.lane.b32.xlu1 %v1361_v28, %s4921_s7 }
 0x9e9   : > { %v3705_v45 = vpop.permute.xlu1 %634 }
 0x9eb   : > { %1387 = vperm.xlu0 %2992, %v2893_v36   ;;  %1371 = vrot.lane.b32.xlu1 %v1363_v20, %s4921_s7 }
 0x9ed   : > { %v3707_v28 = vpop.permute.xlu1 %662 }
 0x9ef   : > { %1416 = vperm.xlu0 %2992, %v2894_v10  }
 0x9f1   : > { %v3709_v18 = vpop.permute.xlu1 %666 }
 0x9f5   : > { %v3711_v34 = vpop.permute.xlu1 %699 }
 0x9f9   : > { %v3713_v49 = vpop.permute.xlu1 %703 }
 0x9fd   : > { %v3715_v19 = vpop.permute.xlu1 %731 }
 0xa01   : > { %v3717_v24 = vpop.permute.xlu1 %735 }
 0xa05   : > { %v3719_v36 = vpop.permute.xlu1 %767 }
 0xa06   : > { %4953 = vst [vmem:[#allocation30_spill] sm:$0xff] %v3719_v36 }
 0xa09   : > { %v3721_v20 = vpop.permute.xlu1 %771 }
 0xa0a   : > { %4954 = vst [vmem:[#allocation31_spill] sm:$0xff] %v3721_v20 }
 0xa0d   : > { %v3723_v38 = vpop.permute.xlu1 %815 }
 0xa0e   : > { %4955 = vst [vmem:[#allocation32_spill] sm:$0xff] %v3723_v38 }
 0xa11   : > { %v3725_v10 = vpop.permute.xlu1 %819 }
 0xa12   : > { %4956 = vst [vmem:[#allocation33_spill] sm:$0xff] %v3725_v10 }
 0xa15   : > { %v3727_v15 = vpop.permute.xlu1 %863 }
 0xa16   : > { %4957 = vst [vmem:[#allocation34_spill] sm:$0xff] %v3727_v15 }
 0xa19   : > { %v3729_v41 = vpop.permute.xlu1 %867 }
 0xa1a   : > { %4958 = vst [vmem:[#allocation35_spill] sm:$0xff] %v3729_v41 }
 0xa1d   : > { %v3731_v37 = vpop.permute.xlu1 %910 }
 0xa1e   : > { %4959 = vst [vmem:[#allocation36_spill] sm:$0xff] %v3731_v37 }
 0xa21   : > { %v3733_v8 = vpop.permute.xlu1 %914 }
 0xa22   : > { %4960 = vst [vmem:[#allocation37_spill] sm:$0xff] %v3733_v8 }
 0xa25   : > { %v3735_v6 = vpop.permute.xlu1 %957 }
 0xa26   : > { %4961 = vst [vmem:[#allocation38_spill] sm:$0xff] %v3735_v6 }
 0xa29   : > { %v3737_v5 = vpop.permute.xlu1 %961 }
 0xa2d   : > { %v3739_v4 = vpop.permute.xlu1 %986 }
 0xa2e   : > { %4962 = vst [vmem:[#allocation39_spill] sm:$0xff] %v3739_v4 }
 0xa31   : > { %v3741_v36 = vpop.permute.xlu1 %990 }
 0xa32   : > { %4963 = vst [vmem:[#allocation40_spill] sm:$0xff] %v3741_v36 }
 0xa35   : > { %v3743_v20 = vpop.permute.xlu1 %1016 }
 0xa36   : > { %4964 = vst [vmem:[#allocation41_spill] sm:$0xff] %v3743_v20 }
 0xa39   : > { %v3745_v38 = vpop.permute.xlu1 %1020 }
 0xa3a   : > { %4965 = vst [vmem:[#allocation42_spill] sm:$0xff] %v3745_v38 }
 0xa3d   : > { %v3749_v15 = vpop.permute.xlu1 %1045 }
 0xa41   : > { %v3753_v6 = vpop.permute.xlu1 %1049 }
 0xa45   : > { %v3759_v4 = vpop.permute.xlu1 %1074 }
 0xa59   : > { %v3747_v10 = vpop.permute.xlu0 %1369 }
 0xa5a   : > { %4966 = vst [vmem:[#allocation43_spill] sm:$0xff] %v3747_v10 }
 0xa6a   : > { %v1388_v41 = vpop.permute.xlu0 %1387 }
 0xa6b   : > { %v1390_v37 = vmul.f32 %v1388_v41, %v3483_v35  ;;  %v1392_v8 = vmul.f32 %v1388_v41, %v3488_v26  ;;  %v1391_v20 = vmul.f32 %v1388_v41, %v3480_v25  ;;  %v1441_v35 = vld [vmem:[%s4866_s2] sm:$0xf]  ;;  %v2897_v41 = vld [vmem:[%s4867_s3 + $0xc] sm:$0xf] }
 0xa6d   : > { %1400 = vrot.lane.b32.xlu0 %v1392_v8, %s4921_s7  ;;  %1396 = vrot.lane.b32.xlu1 %v1390_v37, %s4921_s7  ;;  %v2895_v8 = vld [vmem:[%s4867_s3 + $0x4] sm:$0xf]  ;;  %v3771_v37 = vpop.permute.xlu1 %1078 }
 0xa6e   : > { %v1417_v36 = vpop.permute.xlu0 %1416 }
 0xa6f   : > { %v1420_v38 = vmul.f32 %v1417_v36, %v3501_v30  ;;  %v1419_v26 = vmul.f32 %v1417_v36, %v3504_v32  ;;  %v1421_v25 = vmul.f32 %v1417_v36, %v3509_v44  ;;  %v1509_v30 = vld [vmem:[%s4867_s3] sm:$0xf]  ;;  %v2896_v44 = vld [vmem:[%s4867_s3 + $0x8] sm:$0xf] }
 0xa71   : > { %1427 = vrot.lane.b32.xlu0 %v1420_v38, %s4921_s7  ;;  %1398 = vrot.lane.b32.xlu1 %v1391_v20, %s4921_s7  ;;  %v3781_v32 = vpop.permute.xlu1 %1103  ;;  %v2899_v38 = vld [vmem:[%s4867_s3 + $0x14] sm:$0xf]  ;;  %v2901_v20 = vld [vmem:[%s4867_s3 + $0x1c] sm:$0xf] }
 0xa75   : > { %1444 = vperm.xlu0 %2992, %v1441_v35   ;;  %1425 = vrot.lane.b32.xlu1 %v1419_v26, %s4921_s7  ;;  %v3789_v36 = vpop.permute.xlu1 %1107  ;;  %v2898_v35 = vld [vmem:[%s4867_s3 + $0x10] sm:$0xf] }
 0xa79   : > { %1571 = vperm.xlu0 %2992, %v2895_v8   ;;  %1429 = vrot.lane.b32.xlu1 %v1421_v25, %s4921_s7  ;;  %v3797_v26 = vpop.permute.xlu1 %1133  ;;  %v2903_v8 = vld [vmem:[%s4867_s3 + $0x24] sm:$0xf]  ;;  %v2900_v25 = vld [vmem:[%s4867_s3 + $0x18] sm:$0xf] }
 0xa7a   : > { %4967 = vst [vmem:[#allocation44_spill] sm:$0xff] %v3797_v26 }
 0xa7d   : > { %1647 = vperm.xlu0 %2992, %v2897_v41   ;;  %1533 = vperm.xlu1 %2993, %v1509_v30   ;;  %v2902_v41 = vld [vmem:[%s4867_s3 + $0x20] sm:$0xf]  ;;  %v3808_v30 = vpop.permute.xlu1 %1137 }
 0xa81   : > { %1696 = vperm.xlu0 %2992, %v2899_v38   ;;  %1609 = vperm.xlu1 %2993, %v2896_v44   ;;  %v2904_v38 = vld [vmem:[%s4867_s3 + $0x28] sm:$0xf]  ;;  %v3813_v44 = vpop.permute.xlu1 %1162 }
 0xa85   : > { %1764 = vperm.xlu0 %2992, %v2901_v20   ;;  %1662 = vperm.xlu1 %2993, %v2898_v35   ;;  %v3815_v20 = vpop.permute.xlu1 %1166 }
 0xa86   : > { %4968 = vst [vmem:[#allocation45_spill] sm:$0xff] %v3815_v20 }
 0xa89   : > { %1832 = vperm.xlu0 %2992, %v2903_v8   ;;  %1730 = vperm.xlu1 %2993, %v2900_v25   ;;  %v3817_v35 = vpop.permute.xlu1 %1191 }
 0xa8d   : > { %1798 = vperm.xlu1 %2993, %v2902_v41   ;;  %v3819_v8 = vpop.permute.xlu1 %1195  ;;  %v397_v41 = vsel %vm396_vm0, %v3616_v27, %v3407_v46  ;;  %v432_v27 = vsel %vm396_vm0, %v3631_v39, %v3413_v50 }
 0xa8e   : > { %4969 = vst [vmem:[#allocation46_spill] sm:$0xff] %v3819_v8  ;;  %v399_v8 = vsel %vm396_vm0, %v3621_v22, %v3409_v47 }
 0xa91   : > { %1866 = vperm.xlu1 %2993, %v2904_v38   ;;  %v3821_v25 = vpop.permute.xlu1 %1220  ;;  %v398_v38 = vsel %vm396_vm0, %v3407_v46, %v3621_v22  ;;  %v465_v22 = vsel %vm396_vm0, %v3646_v40, %v3415_v51  ;;  %v499_v40 = vsel %vm396_vm0, %v3419_v53, %v3661_v16 }
 0xa92   : > { %4970 = vst [vmem:[#allocation47_spill] sm:$0xff] %v3821_v25  ;;  %v407_v25 = vadd.f32 %v3409_v47, %v3288_v11  ;;  %v405_v46 = vadd.f32 %v398_v38, %v3290_v12  ;;  %v466_v47 = vsel %vm396_vm0, %v3415_v51, %v3651_v14 }
 0xa94   : > { %v441_v11 = vadd.f32 %v3636_v21, %v407_v25  ;;  %v439_v12 = vadd.f32 %v432_v27, %v405_v46 }
 0xa95   : > { %v3823_v10 = vpop.permute.xlu1 %1224 }
 0xa96   : > { %4971 = vst [vmem:[#allocation48_spill] sm:$0xff] %v3823_v10  ;;  %v431_v10 = vsel %vm396_vm0, %v3411_v48, %v3631_v39  ;;  %v473_v51 = vadd.f32 %v466_v47, %v439_v12 }
 0xa99   : > { %v3825_v26 = vpop.permute.xlu1 %1250 }
 0xa9a   : > { %4972 = vst [vmem:[#allocation49_spill] sm:$0xff] %v3825_v26  ;;  %v404_v26 = vadd.f32 %v397_v41, %v3298_v17  ;;  %v406_v17 = vadd.f32 %v399_v8, %v3292_v13 }
 0xa9c   : > { %v438_v48 = vadd.f32 %v431_v10, %v404_v26  ;;  %v475_v10 = vadd.f32 %v3417_v52, %v441_v11  ;;  %v501_v26 = vsel %vm396_vm0, %v3421_v54, %v3666_v42  ;;  %v604_v11 = vsel %vm533_vm1, %v3696_v7, %v3433_v60 }
 0xa9d   : > { %v3833_v20 = vpop.permute.xlu1 %1254 }
 0xa9e   : > { %4973 = vst [vmem:[#allocation50_spill] sm:$0xff] %v3833_v20  ;;  %v433_v20 = vsel %vm396_vm0, %v3413_v50, %v3636_v21  ;;  %v467_v50 = vsel %vm396_vm0, %v3651_v14, %v3417_v52  ;;  %v472_v13 = vadd.f32 %v465_v22, %v438_v48  ;;  %v500_v21 = vsel %vm396_vm0, %v3661_v16, %v3421_v54 }
 0xa9f   : > { %v440_v41 = vadd.f32 %v433_v20, %v406_v17  ;;  %v534_v14 = vsel %vm533_vm1, %v3676_v43, %v3423_v55  ;;  %v509_v53 = vadd.f32 %v3666_v42, %v475_v10  ;;  %v535_v52 = vsel %vm533_vm1, %v3423_v55, %v3679_v23 }
 0xaa0   : > { %v506_v25 = vadd.f32 %v499_v40, %v472_v13  ;;  %v507_v20 = vadd.f32 %v500_v21, %v473_v51  ;;  %v536_v16 = vsel %vm533_vm1, %v3679_v23, %v3425_v56  ;;  %v568_v54 = vsel %vm533_vm1, %v3427_v57, %v3681_v31 }
 0xaa1   : > { %v3859_v39 = vpop.permute.xlu1 %1279  ;;  %v474_v8 = vadd.f32 %v467_v50, %v440_v41  ;;  %v544_v43 = vadd.f32 %v3425_v56, %v509_v53  ;;  %v569_v42 = vsel %vm533_vm1, %v3681_v31, %v3429_v58  ;;  %v570_v22 = vsel %vm533_vm1, %v3429_v58, %v3683_v29  ;;  %v4974_v53 = vld [vmem:[#allocation10_spill] sm:$0xff] }
 0xaa2   : > { %v541_v27 = vadd.f32 %v534_v14, %v506_v25  ;;  %v542_v55 = vadd.f32 %v535_v52, %v507_v20  ;;  %v602_v23 = vsel %vm533_vm1, %v3687_v33, %v3431_v59  ;;  %v603_v31 = vsel %vm533_vm1, %v3431_v59, %v3696_v7  ;;  %v4976_v20 = vld [vmem:[#allocation11_spill] sm:$0xff] }
 0xaa3   : > { %v508_v38 = vadd.f32 %v501_v26, %v474_v8  ;;  %v578_v56 = vadd.f32 %v3683_v29, %v544_v43  ;;  %v636_v58 = vsel %vm533_vm1, %v3435_v61, %v3703_v9  ;;  %v637_v29 = vsel %vm533_vm1, %v3703_v9, %v3437_v62  ;;  %v4978_v43 = vld [vmem:[#allocation31_spill] sm:$0xff] }
 0xaa4   : > { %v575_v17 = vadd.f32 %v568_v54, %v541_v27  ;;  %v576_v48 = vadd.f32 %v569_v42, %v542_v55  ;;  %v638_v40 = vsel %vm533_vm1, %v3437_v62, %v3705_v45  ;;  %v671_v7 = vsel %vm670_vm2, %v3707_v28, %v3439_v63 }
 0xaa5   : > { %v3891_v46 = vpop.permute.xlu1 %1283  ;;  %v543_v57 = vadd.f32 %v536_v16, %v508_v38  ;;  %v612_v12 = vadd.f32 %v3433_v60, %v578_v56  ;;  %v672_v60 = vsel %vm670_vm2, %v3439_v63, %v3709_v18  ;;  %v673_v10 = vsel %vm670_vm2, %v3709_v18, %v3441_v0  ;;  %v4977_v38 = vld [vmem:[#allocation12_spill] sm:$0xff] }
 0xaa6   : > { %v609_v33 = vadd.f32 %v602_v23, %v575_v17  ;;  %v610_v59 = vadd.f32 %v603_v31, %v576_v48  ;;  %v705_v62 = vsel %vm670_vm2, %v3443_v1, %v3711_v34  ;;  %v707_v63 = vsel %vm670_vm2, %v3445_v2, %v3713_v49  ;;  %v4979_v23 = vld [vmem:[#allocation13_spill] sm:$0xff] }
 0xaa7   : > { %v577_v47 = vadd.f32 %v570_v22, %v543_v57  ;;  %v646_v13 = vadd.f32 %v3705_v45, %v612_v12  ;;  %v706_v45 = vsel %vm670_vm2, %v3711_v34, %v3445_v2  ;;  %v739_v18 = vsel %vm670_vm2, %v3715_v19, %v3447_v3  ;;  %v4975_v2 = vld [vmem:[#allocation30_spill] sm:$0xff]  ;;  %v4980_v57 = vld [vmem:[#allocation32_spill] sm:$0xff]  ;;  %v4981_v48 = vld [vmem:[#allocation33_spill] sm:$0xff] }
 0xaa8   : > { %v643_v41 = vadd.f32 %v636_v58, %v609_v33  ;;  %v644_v9 = vadd.f32 %v637_v29, %v610_v59  ;;  %v741_v52 = vsel %vm670_vm2, %v3717_v24, %v4974_v53  ;;  %v773_v16 = vsel %vm670_vm2, %v4976_v20, %v4975_v2  ;;  %v4982_v12 = vld [vmem:[#allocation14_spill] sm:$0xff]  ;;  %v4990_v20 = vld [vmem:[#allocation17_spill] sm:$0xff] }
 0xaa9   : > { %v3913_v50 = vpop.permute.xlu1 %1308  ;;  %v611_v61 = vadd.f32 %v604_v11, %v577_v47  ;;  %v681_v28 = vadd.f32 %v3441_v0, %v646_v13  ;;  %v740_v0 = vsel %vm670_vm2, %v3447_v3, %v3717_v24  ;;  %v774_v3 = vsel %vm670_vm2, %v4975_v2, %v4977_v38  ;;  %v4983_v29 = vld [vmem:[#allocation34_spill] sm:$0xff] }
 0xaaa   : > { %v678_v51 = vadd.f32 %v671_v7, %v643_v41  ;;  %v679_v26 = vadd.f32 %v672_v60, %v644_v9  ;;  %v775_v42 = vsel %vm670_vm2, %v4977_v38, %v4978_v43  ;;  %v822_v17 = vsel %vm821_vm3, %v4980_v57, %v4979_v23  ;;  %v4984_v7 = vld [vmem:[#allocation35_spill] sm:$0xff] }
 0xaab   : > { %v645_v21 = vadd.f32 %v638_v40, %v611_v61  ;;  %v715_v1 = vadd.f32 %v3713_v49, %v681_v28  ;;  %v823_v11 = vsel %vm821_vm3, %v4979_v23, %v4981_v48  ;;  %v869_v59 = vsel %vm821_vm3, %v4983_v29, %v4982_v12  ;;  %v4985_v9 = vld [vmem:[#allocation15_spill] sm:$0xff]  ;;  %v4995_v23 = vld [vmem:[#allocation42_spill] sm:$0xff] }
 0xaac   : > { %v712_v8 = vadd.f32 %v705_v62, %v678_v51  ;;  %v713_v34 = vadd.f32 %v706_v45, %v679_v26  ;;  %v870_v61 = vsel %vm821_vm3, %v4982_v12, %v4984_v7  ;;  %v4987_v51 = vld [vmem:[#allocation37_spill] sm:$0xff] }
 0xaad   : > { %v680_v14 = vadd.f32 %v673_v10, %v645_v21  ;;  %v3945_v25 = vpop.permute.xlu1 %1312  ;;  %v749_v49 = vadd.f32 %v4974_v53, %v715_v1  ;;  %v4986_v10 = vld [vmem:[#allocation36_spill] sm:$0xff]  ;;  %v917_v28 = vsel %vm821_vm3, %v4985_v9, %v4987_v51 }
 0xaae   : > { %v746_v54 = vadd.f32 %v739_v18, %v712_v8  ;;  %v747_v27 = vadd.f32 %v740_v0, %v713_v34  ;;  %v916_v62 = vsel %vm821_vm3, %v4986_v10, %v4985_v9  ;;  %v4988_v18 = vld [vmem:[#allocation16_spill] sm:$0xff] }
 0xaaf   : > { %v714_v19 = vadd.f32 %v707_v63, %v680_v14  ;;  %v783_v22 = vadd.f32 %v4978_v43, %v749_v49  ;;  %v4989_v14 = vld [vmem:[#allocation38_spill] sm:$0xff]  ;;  %v964_v34 = vsel %vm821_vm3, %v4988_v18, %v3737_v5  ;;  %v4992_v49 = vld [vmem:[#allocation40_spill] sm:$0xff] }
 0xab0   : > { %v780_v24 = vadd.f32 %v773_v16, %v746_v54  ;;  %v781_v31 = vadd.f32 %v774_v3, %v747_v27  ;;  %v963_v8 = vsel %vm821_vm3, %v4989_v14, %v4988_v18  ;;  %v4991_v16 = vld [vmem:[#allocation39_spill] sm:$0xff]  ;;  %v994_v38 = vsel %vm992_vm4, %v4990_v20, %v4992_v49 }
 0xab1   : > { %v748_v55 = vadd.f32 %v741_v52, %v714_v19  ;;  %v3964_v56 = vpop.permute.xlu1 %1337  ;;  %v831_v33 = vadd.f32 %v4981_v48, %v783_v22  ;;  %v993_v19 = vsel %vm992_vm4, %v4991_v16, %v4990_v20 }
 0xab2   : > { %v828_v47 = vadd.f32 %v4980_v57, %v780_v24  ;;  %v829_v40 = vadd.f32 %v822_v17, %v781_v31 }
 0xab3   : > { %v782_v58 = vadd.f32 %v775_v42, %v748_v55  ;;  %v878_v60 = vadd.f32 %v4984_v7, %v831_v33  ;;  %v4993_v42 = vld [vmem:[#allocation18_spill] sm:$0xff]  ;;  %v4994_v55 = vld [vmem:[#allocation41_spill] sm:$0xff] }
 0xab4   : > { %v875_v13 = vadd.f32 %v4983_v29, %v828_v47  ;;  %v876_v21 = vadd.f32 %v869_v59, %v829_v40  ;;  %v1022_v24 = vsel %vm992_vm4, %v4994_v55, %v4993_v42  ;;  %v1023_v57 = vsel %vm992_vm4, %v4993_v42, %v4995_v23  ;;  %v4997_v40 = vld [vmem:[#allocation20_spill] sm:$0xff] }
 0xab5   : > { %v830_v41 = vadd.f32 %v823_v11, %v782_v58  ;;  %v925_v63 = vadd.f32 %v4987_v51, %v878_v60  ;;  %v3990_v1 = vpop.permute.xlu1 %1341  ;;  %v4996_v11 = vld [vmem:[#allocation19_spill] sm:$0xff]  ;;  %v1080_v7 = vsel %vm992_vm4, %v3759_v4, %v4997_v40 }
 0xab6   : > { %v922_v26 = vadd.f32 %v4986_v10, %v875_v13  ;;  %v923_v0 = vadd.f32 %v916_v62, %v876_v21  ;;  %v1051_v58 = vsel %vm992_vm4, %v3749_v15, %v4996_v11  ;;  %v1052_v33 = vsel %vm992_vm4, %v4996_v11, %v3753_v6  ;;  %v4998_v10 = vld [vmem:[#allocation21_spill] sm:$0xff] }
 0xab7   : > { %v877_v45 = vadd.f32 %v870_v61, %v830_v41  ;;  %v972_v2 = vadd.f32 %v3737_v5, %v925_v63  ;;  %v1081_v41 = vsel %vm992_vm4, %v4997_v40, %v3771_v37  ;;  %v1111_v21 = vsel %vm1109_vm5, %v4998_v10, %v3789_v36 }
 0xab8   : > { %v969_v52 = vadd.f32 %v4989_v14, %v922_v26  ;;  %v970_v54 = vadd.f32 %v963_v8, %v923_v0  ;;  %v4999_v26 = vld [vmem:[#allocation22_spill] sm:$0xff] }
 0xab9   : > { %v924_v53 = vadd.f32 %v917_v28, %v877_v45  ;;  %v1002_v43 = vadd.f32 %v4992_v49, %v972_v2  ;;  %v4008_v22 = vpop.permute.xlu1 %1367  ;;  %v1140_v18 = vsel %vm1109_vm5, %v4999_v26, %v3808_v30 }
 0xaba   : > { %v999_v27 = vadd.f32 %v4991_v16, %v969_v52  ;;  %v1000_v5 = vadd.f32 %v993_v19, %v970_v54  ;;  %v5002_v52 = vld [vmem:[#allocation45_spill] sm:$0xff]  ;;  %v5003_v54 = vld [vmem:[#allocation24_spill] sm:$0xff] }
 0xabb   : > { %v971_v3 = vadd.f32 %v964_v34, %v924_v53  ;;  %v1031_v48 = vadd.f32 %v4995_v23, %v1002_v43  ;;  %v5001_v34 = vld [vmem:[#allocation23_spill] sm:$0xff] }
 0xabc   : > { %v1028_v31 = vadd.f32 %v4994_v55, %v999_v27  ;;  %v1029_v47 = vadd.f32 %v1022_v24, %v1000_v5  ;;  %v1169_v2 = vsel %vm1109_vm5, %v5001_v34, %v5002_v52  ;;  %v5005_v55 = vld [vmem:[#allocation25_spill] sm:$0xff]  ;;  %v5006_v24 = vld [vmem:[#allocation47_spill] sm:$0xff] }
 0xabd   : > { %v1001_v17 = vadd.f32 %v994_v38, %v971_v3  ;;  %v1060_v59 = vadd.f32 %v3753_v6, %v1031_v48  ;;  %v4034_v62 = vpop.permute.xlu1 %1371  ;;  %v5004_v38 = vld [vmem:[#allocation46_spill] sm:$0xff] }
 0xabe   : > { %v1057_v29 = vadd.f32 %v3749_v15, %v1028_v31  ;;  %v1058_v61 = vadd.f32 %v1051_v58, %v1029_v47  ;;  %v1110_v15 = vsel %vm1109_vm5, %v3781_v32, %v4998_v10  ;;  %v1198_v3 = vsel %vm1109_vm5, %v5003_v54, %v5004_v38  ;;  %v5008_v58 = vld [vmem:[#allocation26_spill] sm:$0xff]  ;;  %v5009_v47 = vld [vmem:[#allocation49_spill] sm:$0xff] }
 0xabf   : > { %v1030_v12 = vadd.f32 %v1023_v57, %v1001_v17  ;;  %v1089_v9 = vadd.f32 %v3771_v37, %v1060_v59  ;;  %v5007_v57 = vld [vmem:[#allocation48_spill] sm:$0xff] }
 0xac0   : > { %v1086_v60 = vadd.f32 %v3759_v4, %v1057_v29  ;;  %v1087_v6 = vadd.f32 %v1080_v7, %v1058_v61  ;;  %v5000_v4 = vld [vmem:[#allocation44_spill] sm:$0xff]  ;;  %v1228_v17 = vsel %vm1226_vm6, %v5005_v55, %v5007_v57  ;;  %v5011_v61 = vld [vmem:[#allocation27_spill] sm:$0xff] }
 0xac1   : > { %v1059_v13 = vadd.f32 %v1052_v33, %v1030_v12  ;;  %v1119_v45 = vadd.f32 %v3789_v36, %v1089_v9  ;;  %v1139_v37 = vsel %vm1109_vm5, %v5000_v4, %v4999_v26  ;;  %v5010_v12 = vld [vmem:[#allocation50_spill] sm:$0xff] }
 0xac2   : > { %v1116_v28 = vadd.f32 %v3781_v32, %v1086_v60  ;;  %v1117_v63 = vadd.f32 %v1110_v15, %v1087_v6  ;;  %v1168_v32 = vsel %vm1109_vm5, %v3813_v44, %v5001_v34  ;;  %v1257_v29 = vsel %vm1226_vm6, %v5008_v58, %v5010_v12  ;;  %v5012_v6 = vld [vmem:[#allocation28_spill] sm:$0xff] }
 0xac3   : > { %v1088_v51 = vadd.f32 %v1081_v41, %v1059_v13  ;;  %v1148_v0 = vadd.f32 %v3808_v30, %v1119_v45  ;;  %v1197_v30 = vsel %vm1109_vm5, %v3817_v35, %v5003_v54  ;;  %v1285_v41 = vsel %vm1226_vm6, %v3859_v39, %v5011_v61 }
 0xac4   : > { %v1145_v8 = vadd.f32 %v5000_v4, %v1116_v28  ;;  %v1146_v36 = vadd.f32 %v1139_v37, %v1117_v63  ;;  %v1286_v60 = vsel %vm1226_vm6, %v5011_v61, %v3891_v46  ;;  %v1315_v45 = vsel %vm1226_vm6, %v5012_v6, %v3945_v25  ;;  %v2912_v61 = vld [vmem:[%s4867_s3 + $0x48] sm:$0xf] }
 0xac5   : > { %v1118_v14 = vadd.f32 %v1111_v21, %v1088_v51  ;;  %v1177_v19 = vadd.f32 %v5002_v52, %v1148_v0  ;;  %v1314_v21 = vsel %vm1226_vm6, %v3913_v50, %v5012_v6  ;;  %v2921_v6 = vld [vmem:[%s4867_s3 + $0x6c] sm:$0xf] }
 0xac6   : > { %v1174_v16 = vadd.f32 %v3813_v44, %v1145_v8  ;;  %v1175_v49 = vadd.f32 %v1168_v32, %v1146_v36  ;;  %v1227_v44 = vsel %vm1226_vm6, %v5006_v24, %v5005_v55  ;;  %v5014_v32 = vld [vmem:[#allocation43_spill] sm:$0xff] }
 0xac7   : > { %v1147_v20 = vadd.f32 %v1140_v18, %v1118_v14  ;;  %v1206_v42 = vadd.f32 %v5004_v38, %v1177_v19  ;;  %v5013_v18 = vld [vmem:[#allocation29_spill] sm:$0xff] }
 0xac8   : > { %v1203_v43 = vadd.f32 %v3817_v35, %v1174_v16  ;;  %v1204_v23 = vadd.f32 %v1197_v30, %v1175_v49  ;;  %v1256_v35 = vsel %vm1226_vm6, %v5009_v47, %v5008_v58  ;;  %v1345_v14 = vsel %vm1343_vm7, %v5013_v18, %v3990_v1 }
 0xac9   : > { %v1176_v27 = vadd.f32 %v1169_v2, %v1147_v20  ;;  %v1236_v11 = vadd.f32 %v5007_v57, %v1206_v42 }
 0xaca   : > { %v1233_v48 = vadd.f32 %v5006_v24, %v1203_v43  ;;  %v1234_v33 = vadd.f32 %v1227_v44, %v1204_v23  ;;  %v3068_v43 = vmov 0.0  }
 0xacb   : > { %v1205_v31 = vadd.f32 %v1198_v3, %v1176_v27  ;;  %v1265_v7 = vadd.f32 %v5010_v12, %v1236_v11  ;;  %1499 = vst [vmem:[#allocation2] sm:$0xf] %v3068_v43  ;;  %1500 = vst [vmem:[#allocation2 + $0xc] sm:$0xf] %v3068_v43  ;;  %v2909_v12 = vld [vmem:[%s4867_s3 + $0x3c] sm:$0xf] }
 0xacc   : > { %v1262_v40 = vadd.f32 %v5009_v47, %v1233_v48  ;;  %v1263_v13 = vadd.f32 %v1256_v35, %v1234_v33  ;;  %v2905_v47 = vld [vmem:[%s4867_s3 + $0x2c] sm:$0xf]  ;;  %v2906_v35 = vld [vmem:[%s4867_s3 + $0x30] sm:$0xf]  ;;  %v2907_v33 = vld [vmem:[%s4867_s3 + $0x34] sm:$0xf] }
 0xacd   : > { %v1235_v59 = vadd.f32 %v1228_v17, %v1205_v31  ;;  %v1294_v15 = vadd.f32 %v3891_v46, %v1265_v7  ;;  %v2913_v7 = vld [vmem:[%s4867_s3 + $0x4c] sm:$0xf] }
 0xace   : > { %v1291_v10 = vadd.f32 %v3859_v39, %v1262_v40  ;;  %v1292_v28 = vadd.f32 %v1285_v41, %v1263_v13  ;;  %v1344_v39 = vsel %vm1343_vm7, %v3964_v56, %v5013_v18  ;;  %v2910_v40 = vld [vmem:[%s4867_s3 + $0x40] sm:$0xf]  ;;  %v2915_v41 = vld [vmem:[%s4867_s3 + $0x54] sm:$0xf]  ;;  %v2914_v13 = vld [vmem:[%s4867_s3 + $0x50] sm:$0xf] }
 0xacf   : > { %v1264_v9 = vadd.f32 %v1257_v29, %v1235_v59  ;;  %v1323_v63 = vadd.f32 %v3945_v25, %v1294_v15  ;;  %v1374_v25 = vsel %vm1343_vm7, %v5014_v32, %v4034_v62  ;;  %v2908_v29 = vld [vmem:[%s4867_s3 + $0x38] sm:$0xf]  ;;  %v2911_v59 = vld [vmem:[%s4867_s3 + $0x44] sm:$0xf]  ;;  %v2918_v15 = vld [vmem:[%s4867_s3 + $0x60] sm:$0xf] }
 0xad0   : > { %v1320_v37 = vadd.f32 %v3913_v50, %v1291_v10  ;;  %v1321_v46 = vadd.f32 %v1314_v21, %v1292_v28  ;;  %v1373_v50 = vsel %vm1343_vm7, %v4008_v22, %v5014_v32  ;;  %v2919_v10 = vld [vmem:[%s4867_s3 + $0x64] sm:$0xf]  ;;  %v2920_v21 = vld [vmem:[%s4867_s3 + $0x68] sm:$0xf]  ;;  %v2922_v28 = vld [vmem:[%s4867_s3 + $0x70] sm:$0xf] }
 0xad1   : > { %v1293_v4 = vadd.f32 %v1286_v60, %v1264_v9  ;;  %v1353_v34 = vadd.f32 %v3990_v1, %v1323_v63  ;;  %v2917_v60 = vld [vmem:[%s4867_s3 + $0x5c] sm:$0xf]  ;;  %v2916_v9 = vld [vmem:[%s4867_s3 + $0x58] sm:$0xf]  ;;  %v2929_v63 = vld [vmem:[%s4867_s3 + $0x8c] sm:$0xf] }
 0xad2   : > { %v1350_v0 = vadd.f32 %v3964_v56, %v1320_v37  ;;  %v1351_v36 = vadd.f32 %v1344_v39, %v1321_v46  ;;  %v2926_v37 = vld [vmem:[%s4867_s3 + $0x80] sm:$0xf]  ;;  %v2928_v18 = vld [vmem:[%s4867_s3 + $0x88] sm:$0xf]  ;;  %v5015_v46 = vlaneseq }
 0xad3   : > { %v1322_v8 = vadd.f32 %v1315_v45, %v1293_v4  ;;  %v1382_v20 = vadd.f32 %v4034_v62, %v1353_v34  ;;  %v2925_v45 = vld [vmem:[%s4867_s3 + $0x7c] sm:$0xf]  ;;  %v2927_v4 = vld [vmem:[%s4867_s3 + $0x84] sm:$0xf] }
 0xad4   : > { %v1379_v2 = vadd.f32 %v4008_v22, %v1350_v0  ;;  %v1380_v19 = vadd.f32 %v1373_v50, %v1351_v36 }
 0xad5   : > { %v1352_v52 = vadd.f32 %v1345_v14, %v1322_v8  ;;  %v1456_v14 = vand.u32 127, %v5015_v46 }
 0xad7   : > { %v1381_v30 = vadd.f32 %v1374_v25, %v1352_v52  ;;  %v1457_v34 = vadd.s32 128, %v1456_v14  ;;  %v1458_v32 = vadd.s32 256, %v1456_v14  ;;  %v1459_v25 = vcvt.s32.f32 %v1456_v14 }
 0xad9   : > { %v1460_v52 = vcvt.s32.f32 %v1457_v34 }
 0xadf   : > { %v1397_v53 = vpop.permute.xlu1 %1396  ;;  %v1401_v26 = vpop.permute.xlu0 %1400 }
 0xae0   : > { %v1411_v49 = vadd.f32 %v1401_v26, %v1382_v20  ;;  %v1408_v38 = vadd.f32 %v1397_v53, %v1379_v2  ;;  %v1461_v2 = vcvt.s32.f32 %v1458_v32  ;;  %v1462_v20 = vmul.f32 0.055555556, %v1459_v25 }
 0xae3   : > { %v1399_v5 = vpop.permute.xlu1 %1398  ;;  %v1428_v54 = vpop.permute.xlu0 %1427 }
 0xae4   : > { %v1402_v56 = vsel %vm1343_vm7, %v1397_v53, %v1399_v5  ;;  %v1403_v1 = vsel %vm1343_vm7, %v1399_v5, %v1401_v26  ;;  %v2924_v26 = vld [vmem:[%s4867_s3 + $0x78] sm:$0xf] }
 0xae5   : > { %v1409_v22 = vadd.f32 %v1402_v56, %v1380_v19  ;;  %v1410_v42 = vadd.f32 %v1403_v1, %v1381_v30  ;;  %v1464_v19 = vmul.f32 0.055555556, %v1461_v2  ;;  %v2935_v1 = vtrunc.f32 %v1462_v20 }
 0xae7   : > { %v1426_v51 = vpop.permute.xlu1 %1425 }
 0xae8   : > { %v1431_v3 = vsel %vm1343_vm7, %v1426_v51, %v1428_v54  ;;  %v1437_v62 = vadd.f32 %v1426_v51, %v1408_v38  ;;  %v2923_v51 = vld [vmem:[%s4867_s3 + $0x74] sm:$0xf] }
 0xae9   : > { %v1438_v44 = vadd.f32 %v1431_v3, %v1409_v22 }
 0xaeb   : > { %v1430_v16 = vpop.permute.xlu1 %1429 }
 0xaec   : > { %v1432_v27 = vsel %vm1343_vm7, %v1428_v54, %v1430_v16  ;;  %v1440_v55 = vadd.f32 %v1430_v16, %v1411_v49  ;;  %v1463_v16 = vmul.f32 0.055555556, %v1460_v52  ;;  %v2939_v49 = vtrunc.f32 %v1464_v19 }
 0xaed   : > { %v1439_v23 = vadd.f32 %v1432_v27, %v1410_v42  ;;  %v2936_v27 = vcvt.f32.s32 %v2935_v1 }
 0xaee   : > { %v2937_v30 = vtrunc.f32 %v1463_v16  ;;  %v2940_v22 = vcvt.f32.s32 %v2939_v49 }
 0xaef   : > { %v1468_v42 = vmul.u32 18, %v2936_v27 }
 0xaf0   : > { %v2938_v43 = vcvt.f32.s32 %v2937_v30 }
 0xaf4   : > { %v1445_v24 = vpop.permute.xlu0 %1444 }
 0xaf5   : > { %v1450_v57 = vadd.f32 %v1445_v24, %v1440_v55  ;;  %v1447_v17 = vadd.f32 %v1445_v24, %v1437_v62  ;;  %v1448_v48 = vadd.f32 %v1445_v24, %v1438_v44  ;;  %v1449_v53 = vadd.f32 %v1445_v24, %v1439_v23 }
 0xaf6   : > { %v1469_v62 = vmul.u32 18, %v2938_v43  ;;  %v1470_v55 = vmul.u32 18, %v2940_v22  ;;  %v1471_v23 = vsub.s32 %v1456_v14, %v1468_v42 }
 0xaf7   : > { %v1454_v5 = vmax.f32 %v1450_v57, 0.0  ;;  %v1451_v31 = vmax.f32 %v1447_v17, 0.0  ;;  %v1452_v11 = vmax.f32 %v1448_v48, 0.0  ;;  %v1453_v58 = vmax.f32 %v1449_v53, 0.0 }
 0xaf8   : > { %v4199_v8 = vpop.permute.xlu0 %1571  ;;  %v1472_v57 = vsub.s32 %v1457_v34, %v1469_v62  ;;  %v1473_v17 = vsub.s32 %v1458_v32, %v1470_v55  ;;  %vm1474_vm9 = vcmp.lt.s32.totalorder %v1471_v23, 16 }
 0xaf9   : > { %1487 = vrot.lane.b32.xlu0 %v1454_v5, %s4923_s9  ;;  %1481 = vrot.lane.b32.xlu1 %v1451_v31, %s4923_s9 }
 0xafa   : > { %vm1475_vm10 = vcmp.lt.s32.totalorder %v1472_v57, 16  ;;  %vm1476_vm11 = vcmp.lt.s32.totalorder %v1473_v17, 16 }
 0xafc   : > { %v4196_v39 = vpop.permute.xlu1 %1533  ;;  %v4203_v50 = vpop.permute.xlu0 %1647 }
 0xafd   : > { %1483 = vrot.lane.b32.xlu0 %v1452_v11, %s4923_s9  ;;  %1485 = vrot.lane.b32.xlu1 %v1453_v58, %s4923_s9  ;;  %s3070_s9 = smov [#allocation3]  }
 0xb00   : > { %v4201_v0 = vpop.permute.xlu1 %1609  ;;  %v1697_v54 = vpop.permute.xlu0 %1696 }
 0xb01   : > { %1900 = vperm.xlu0 %2992, %v2905_v47   ;;  %1934 = vperm.xlu1 %2993, %v2906_v35  }
 0xb04   : > { %v1663_v36 = vpop.permute.xlu1 %1662  ;;  %v4207_v38 = vpop.permute.xlu0 %1764 }
 0xb05   : > { %1968 = vperm.xlu0 %2992, %v2907_v33   ;;  %2036 = vperm.xlu1 %2993, %v2909_v12  }
 0xb08   : > { %v4205_v56 = vpop.permute.xlu1 %1730  ;;  %v4211_v24 = vpop.permute.xlu0 %1832 }
 0xb09   : > { %2002 = vperm.xlu0 %2992, %v2908_v29   ;;  %2135 = vperm.xlu1 %2993, %v2911_v59  }
 0xb0c   : > { %v4209_v3 = vpop.permute.xlu1 %1798 }
 0xb0d   : > { %2088 = vperm.xlu0 %2992, %v2910_v40   ;;  %2229 = vperm.xlu1 %2993, %v2913_v7   ;;  %v5016_v40 = vld [vmem:[#allocation7_spill] sm:$0xff] }
 0xb10   : > { %v4213_v44 = vpop.permute.xlu1 %1866 }
 0xb11   : > { %2182 = vperm.xlu0 %2992, %v2912_v61   ;;  %2287 = vperm.xlu1 %2993, %v2915_v41   ;;  %v5017_v61 = vld [vmem:[#allocation6_spill] sm:$0xff] }
 0xb15   : > { %2258 = vperm.xlu0 %2992, %v2914_v13   ;;  %2345 = vperm.xlu1 %2993, %v2917_v60  }
 0xb19   : > { %2316 = vperm.xlu0 %2992, %v2916_v9   ;;  %2403 = vperm.xlu1 %2993, %v2919_v10   ;;  %v5018_v9 = vld [vmem:[#allocation9_spill] sm:$0xff] }
 0xb1d   : > { %2374 = vperm.xlu0 %2992, %v2918_v15   ;;  %2461 = vperm.xlu1 %2993, %v2921_v6   ;;  %v5019_v15 = vld [vmem:[#allocation8_spill] sm:$0xff] }
 0xb21   : > { %2432 = vperm.xlu0 %2992, %v2920_v21   ;;  %2519 = vperm.xlu1 %2993, %v2923_v51  }
 0xb25   : > { %2490 = vperm.xlu0 %2992, %v2922_v28   ;;  %2577 = vperm.xlu1 %2993, %v2925_v45  }
 0xb29   : > { %2548 = vperm.xlu0 %2992, %v2924_v26   ;;  %2635 = vperm.xlu1 %2993, %v2927_v4  }
 0xb2d   : > { %2606 = vperm.xlu0 %2992, %v2926_v37   ;;  %2693 = vperm.xlu1 %2993, %v2929_v63  }
 0xb31   : > { %2664 = vperm.xlu0 %2992, %v2928_v18  }
 0xb6b   : > { %v1488_v5 = vpop.permute.xlu0 %1487  ;;  %v1482_v31 = vpop.permute.xlu1 %1481 }
 0xb6f   : > { %v1484_v48 = vpop.permute.xlu0 %1483  ;;  %v1486_v53 = vpop.permute.xlu1 %1485 }
 0xb70   : > { %v1490_v11 = vsel %vm1489_vm8, %v1482_v31, %v1484_v48  ;;  %v1491_v58 = vsel %vm1489_vm8, %v1484_v48, %v1486_v53  ;;  %v1492_v47 = vsel %vm1489_vm8, %v1486_v53, %v1488_v5 }
 0xb71   : > { %v1496_v35 = vsel %vm1474_vm9, %v1490_v11, 0.0  ;;  %v1497_v33 = vsel %vm1475_vm10, %v1491_v58, 0.0  ;;  %v1498_v12 = vsel %vm1476_vm11, %v1492_v47, 0.0 }
 0xb72   : > { %v1503_v29 = vcombine.low %v1496_v35, %v1497_v33  ;;  %1507 = vst.msk [vmem:[#allocation2 + $0xc] sm:$0xf] %vm1506_vm12, %v1498_v12 }
 0xb74   : > { %1505 = vst [vmem:[#allocation2 + $0x4] sm:$0xff] %v1503_v29 }
 0xb7b   : > { %v1508_v59 = vld [vmem:[#allocation2] ss:$4 sm:$0xf]  ;;  %v1545_v21 = vld [vmem:[#allocation2 + $0x1] ss:$4 sm:$0xf] }
 0xb7c   : > { %v4220_v7 = vrot.slane %v1508_v59, %v5016_v40  ;;  %v4223_v41 = vrot.slane %v1508_v59, %v5017_v61  ;;  %v4228_v10 = vrot.slane %v1508_v59, %v5018_v9  ;;  %v4231_v6 = vrot.slane %v1508_v59, %v5019_v15  ;;  %v1583_v46 = vld [vmem:[#allocation2 + $0x2] ss:$4 sm:$0xf]  ;;  %v1621_v16 = vld [vmem:[#allocation2 + $0x3] ss:$4 sm:$0xf] }
 0xb7d   : > { %v4238_v45 = vrot.slane %v1545_v21, %v5017_v61  ;;  %v4241_v26 = vrot.slane %v1545_v21, %v5016_v40  ;;  %v4248_v63 = vrot.slane %v1545_v21, %v5019_v15  ;;  %v4251_v18 = vrot.slane %v1545_v21, %v5018_v9 }
 0xb7e   : > { %v1666_v13 = vmul.f32 %v1663_v36, %v4220_v7  ;;  %v1665_v60 = vmul.f32 %v1663_v36, %v4223_v41  ;;  %v1668_v51 = vmul.f32 %v1663_v36, %v4228_v10  ;;  %v1667_v28 = vmul.f32 %v1663_v36, %v4231_v6 }
 0xb7f   : > { %v1699_v4 = vmul.f32 %v1697_v54, %v4238_v45  ;;  %v1700_v37 = vmul.f32 %v1697_v54, %v4241_v26  ;;  %v1701_v14 = vmul.f32 %v1697_v54, %v4248_v63  ;;  %v1702_v34 = vmul.f32 %v1697_v54, %v4251_v18 }
 0xb80   : > { %1675 = vrot.lane.b32.xlu1 %v1666_v13, %s3060_s12  ;;  %1673 = vrot.lane.b32.xlu0 %v1665_v60, %s3060_s12  ;;  %v4258_v32 = vrot.slane %v1583_v46, %v5016_v40  ;;  %v4261_v36 = vrot.slane %v1583_v46, %v5017_v61  ;;  %v4270_v2 = vrot.slane %v1583_v46, %v5018_v9 }
 0xb81   : > { %v4273_v20 = vrot.slane %v1583_v46, %v5019_v15  ;;  %v4282_v1 = vrot.slane %v1621_v16, %v5017_v61  ;;  %v4285_v30 = vrot.slane %v1621_v16, %v5016_v40  ;;  %v1536_v49 = vmul.f32 %v4196_v39, %v4223_v41 }
 0xb82   : > { %v1734_v25 = vmul.f32 %v4205_v56, %v4258_v32  ;;  %v1733_v52 = vmul.f32 %v4205_v56, %v4261_v36  ;;  %v1736_v19 = vmul.f32 %v4205_v56, %v4270_v2  ;;  %v1574_v27 = vmul.f32 %v4199_v8, %v4238_v45 }
 0xb83   : > { %v1735_v54 = vmul.f32 %v4205_v56, %v4273_v20  ;;  %v4294_v43 = vrot.slane %v1621_v16, %v5019_v15  ;;  %v4297_v56 = vrot.slane %v1621_v16, %v5018_v9  ;;  %v1767_v22 = vmul.f32 %v4207_v38, %v4282_v1 }
 0xb84   : > { %1679 = vrot.lane.b32.xlu1 %v1668_v51, %s3060_s12  ;;  %1677 = vrot.lane.b32.xlu0 %v1667_v28, %s3060_s12  ;;  %v1768_v42 = vmul.f32 %v4207_v38, %v4285_v30  ;;  %v1578_v62 = vadd.f32 %v1574_v27, %v1536_v49  ;;  %v1612_v55 = vmul.f32 %v4201_v0, %v4261_v36 }
 0xb85   : > { %v1537_v23 = vmul.f32 %v4196_v39, %v4220_v7  ;;  %v1575_v57 = vmul.f32 %v4199_v8, %v4241_v26  ;;  %v1650_v5 = vmul.f32 %v4203_v50, %v4282_v1  ;;  %v1769_v31 = vmul.f32 %v4207_v38, %v4294_v43 }
 0xb86   : > { %v1616_v17 = vadd.f32 %v1612_v55, %v1578_v62  ;;  %v1770_v48 = vmul.f32 %v4207_v38, %v4297_v56  ;;  %v1613_v58 = vmul.f32 %v4201_v0, %v4258_v32  ;;  %v1538_v47 = vmul.f32 %v4196_v39, %v4231_v6 }
 0xb87   : > { %v1579_v11 = vadd.f32 %v1575_v57, %v1537_v23  ;;  %v1539_v35 = vmul.f32 %v4196_v39, %v4228_v10  ;;  %v1576_v33 = vmul.f32 %v4199_v8, %v4248_v63  ;;  %v1577_v12 = vmul.f32 %v4199_v8, %v4251_v18 }
 0xb88   : > { %1707 = vrot.lane.b32.xlu1 %v1699_v4, %s3060_s12  ;;  %1709 = vrot.lane.b32.xlu0 %v1700_v37, %s3060_s12  ;;  %v4317_v53 = vadd.f32 %v1650_v5, %v1616_v17  ;;  %v1651_v29 = vmul.f32 %v4203_v50, %v4285_v30  ;;  %v1802_v59 = vmul.f32 %v4209_v3, %v4220_v7 }
 0xb89   : > { %v1617_v38 = vadd.f32 %v1613_v58, %v1579_v11  ;;  %v1801_v39 = vmul.f32 %v4209_v3, %v4223_v41  ;;  %v1580_v60 = vadd.f32 %v1576_v33, %v1538_v47  ;;  %v1614_v8 = vmul.f32 %v4201_v0, %v4273_v20 }
 0xb8a   : > { %v1581_v9 = vadd.f32 %v1577_v12, %v1539_v35  ;;  %v1615_v21 = vmul.f32 %v4201_v0, %v4270_v2  ;;  %v1652_v28 = vmul.f32 %v4203_v50, %v4294_v43  ;;  %v1804_v4 = vmul.f32 %v4209_v3, %v4228_v10 }
 0xb8b   : > { %v4337_v13 = vadd.f32 %v1651_v29, %v1617_v38  ;;  %v1618_v51 = vadd.f32 %v1614_v8, %v1580_v60  ;;  %v1803_v37 = vmul.f32 %v4209_v3, %v4231_v6  ;;  %v1836_v16 = vmul.f32 %v4211_v24, %v4241_v26 }
 0xb8c   : > { %1711 = vrot.lane.b32.xlu1 %v1701_v14, %s3060_s12  ;;  %1713 = vrot.lane.b32.xlu0 %v1702_v34, %s3060_s12  ;;  %v1619_v46 = vadd.f32 %v1615_v21, %v1581_v9  ;;  %v1653_v14 = vmul.f32 %v4203_v50, %v4297_v56  ;;  %v1837_v50 = vmul.f32 %v4211_v24, %v4248_v63  ;;  %v2067_v9 = vld [vmem:[#allocation2 + $0x4] ss:$4 sm:$0x7] }
 0xb8d   : > { %v4353_v34 = vadd.f32 %v1652_v28, %v1618_v51  ;;  %v1838_v3 = vmul.f32 %v4211_v24, %v4251_v18  ;;  %v1870_v49 = vmul.f32 %v4213_v44, %v4258_v32  ;;  %v1869_v27 = vmul.f32 %v4213_v44, %v4261_v36 }
 0xb8e   : > { %v4357_v0 = vadd.f32 %v1653_v14, %v1619_v46  ;;  %v1871_v62 = vmul.f32 %v4213_v44, %v4273_v20  ;;  %v4444_v21 = vrot.slane %v2067_v9, %v5017_v61  ;;  %v4447_v51 = vrot.slane %v2067_v9, %v5016_v40 }
 0xb90   : > { %1743 = vrot.lane.b32.xlu1 %v1734_v25, %s3060_s12  ;;  %1741 = vrot.lane.b32.xlu0 %v1733_v52, %s3060_s12  ;;  %v1901_v25 = vpop.permute.xlu0 %1900  ;;  %v1835_v52 = vmul.f32 %v4211_v24, %v4238_v45  ;;  %v1872_v24 = vmul.f32 %v4213_v44, %v4270_v2 }
 0xb91   : > { %v1903_v55 = vmul.f32 %v1901_v25, %v4282_v1  ;;  %v1904_v23 = vmul.f32 %v1901_v25, %v4285_v30  ;;  %v1905_v5 = vmul.f32 %v1901_v25, %v4294_v43 }
 0xb94   : > { %1747 = vrot.lane.b32.xlu1 %v1736_v19, %s3060_s12  ;;  %1745 = vrot.lane.b32.xlu0 %v1735_v54, %s3060_s12  ;;  %v1935_v19 = vpop.permute.xlu1 %1934  ;;  %v1969_v54 = vpop.permute.xlu0 %1968 }
 0xb95   : > { %v1938_v11 = vmul.f32 %v1935_v19, %v4220_v7  ;;  %v1937_v58 = vmul.f32 %v1935_v19, %v4223_v41  ;;  %v1940_v47 = vmul.f32 %v1935_v19, %v4228_v10  ;;  %v1939_v35 = vmul.f32 %v1935_v19, %v4231_v6 }
 0xb96   : > { %v1971_v7 = vmul.f32 %v1969_v54, %v4238_v45  ;;  %v1972_v41 = vmul.f32 %v1969_v54, %v4241_v26  ;;  %v1973_v6 = vmul.f32 %v1969_v54, %v4248_v63  ;;  %v1974_v29 = vmul.f32 %v1969_v54, %v4251_v18 }
 0xb98   : > { %1775 = vrot.lane.b32.xlu1 %v1767_v22, %s3060_s12  ;;  %1777 = vrot.lane.b32.xlu0 %v1768_v42, %s3060_s12  ;;  %v2037_v22 = vpop.permute.xlu1 %2036  ;;  %v2003_v42 = vpop.permute.xlu0 %2002 }
 0xb99   : > { %v2005_v45 = vmul.f32 %v2003_v42, %v4261_v36  ;;  %v2006_v26 = vmul.f32 %v2003_v42, %v4258_v32  ;;  %v2007_v63 = vmul.f32 %v2003_v42, %v4273_v20  ;;  %v2008_v18 = vmul.f32 %v2003_v42, %v4270_v2 }
 0xb9a   : > { %v2040_v32 = vmul.f32 %v2037_v22, %v4285_v30  ;;  %v2039_v8 = vmul.f32 %v2037_v22, %v4282_v1  ;;  %v2042_v20 = vmul.f32 %v2037_v22, %v4297_v56  ;;  %v2041_v2 = vmul.f32 %v2037_v22, %v4294_v43  ;;  %v2114_v1 = vld [vmem:[#allocation2 + $0x5] ss:$4 sm:$0x7] }
 0xb9b   : > { %v4458_v43 = vrot.slane %v2114_v1, %v5017_v61 }
 0xb9c   : > { %1779 = vrot.lane.b32.xlu1 %v1769_v31, %s3060_s12  ;;  %1781 = vrot.lane.b32.xlu0 %v1770_v48, %s3060_s12  ;;  %v4385_v57 = vpop.permute.xlu1 %2135  ;;  %v2089_v17 = vpop.permute.xlu0 %2088  ;;  %v1906_v31 = vmul.f32 %v1901_v25, %v4297_v56  ;;  %s5020_s12 = smov 92  }
 0xb9d   : > { %v2092_v56 = vmul.f32 %v2089_v17, %v4447_v51  ;;  %v2138_v46 = vmul.f32 %v4385_v57, %v4458_v43 }
 0xba0   : > { %1811 = vrot.lane.b32.xlu1 %v1802_v59, %s3061_s13  ;;  %1809 = vrot.lane.b32.xlu0 %v1801_v39, %s3061_s13  ;;  %v4393_v44 = vpop.permute.xlu1 %2229  ;;  %v4395_v48 = vpop.permute.xlu0 %2182 }
 0xba4   : > { %1815 = vrot.lane.b32.xlu1 %v1804_v4, %s3061_s13  ;;  %1813 = vrot.lane.b32.xlu0 %v1803_v37, %s3061_s13  ;;  %v4403_v33 = vpop.permute.xlu1 %2287  ;;  %v4405_v12 = vpop.permute.xlu0 %2258  ;;  %v2091_v4 = vmul.f32 %v2089_v17, %v4444_v21  ;;  %v4461_v37 = vrot.slane %v2067_v9, %v5019_v15 }
 0xba6   : > { %v2093_v14 = vmul.f32 %v2089_v17, %v4461_v37 }
 0xba8   : > { %1843 = vrot.lane.b32.xlu1 %v1835_v52, %s3061_s13  ;;  %1845 = vrot.lane.b32.xlu0 %v1836_v16, %s3061_s13  ;;  %v4413_v38 = vpop.permute.xlu1 %2345  ;;  %v4415_v10 = vpop.permute.xlu0 %2316  ;;  %v4473_v16 = vrot.slane %v2114_v1, %v5016_v40 }
 0xbaa   : > { %v2139_v19 = vmul.f32 %v4385_v57, %v4473_v16 }
 0xbac   : > { %1847 = vrot.lane.b32.xlu1 %v1837_v50, %s3061_s13  ;;  %1849 = vrot.lane.b32.xlu0 %v1838_v3, %s3061_s13  ;;  %v4423_v59 = vpop.permute.xlu1 %2403  ;;  %v4425_v39 = vpop.permute.xlu0 %2374  ;;  %v4476_v50 = vrot.slane %v2114_v1, %v5019_v15  ;;  %v2161_v3 = vld [vmem:[#allocation2 + $0x6] ss:$4 sm:$0x7] }
 0xbae   : > { %v2140_v54 = vmul.f32 %v4385_v57, %v4476_v50  ;;  %v4504_v57 = vrot.slane %v2161_v3, %v5019_v15 }
 0xbb0   : > { %1879 = vrot.lane.b32.xlu1 %v1870_v49, %s3061_s13  ;;  %1877 = vrot.lane.b32.xlu0 %v1869_v27, %s3061_s13  ;;  %v4433_v60 = vpop.permute.xlu1 %2461  ;;  %v4435_v36 = vpop.permute.xlu0 %2432  ;;  %v4485_v49 = vrot.slane %v2161_v3, %v5017_v61  ;;  %v4488_v27 = vrot.slane %v2161_v3, %v5016_v40  ;;  %v2321_v1 = vmul.f32 %v4415_v10, %v4504_v57 }
 0xbb2   : > { %v2320_v9 = vmul.f32 %v4415_v10, %v4488_v27 }
 0xbb4   : > { %1883 = vrot.lane.b32.xlu1 %v1872_v24, %s3061_s13  ;;  %1881 = vrot.lane.b32.xlu0 %v1871_v62, %s3061_s13  ;;  %v4449_v28 = vpop.permute.xlu1 %2519  ;;  %v4451_v30 = vpop.permute.xlu0 %2490  ;;  %v2208_v24 = vld [vmem:[#allocation2 + $0x7] ss:$4 sm:$0x7]  ;;  %v2185_v62 = vmul.f32 %v4395_v48, %v4485_v49 }
 0xbb8   : > { %1911 = vrot.lane.b32.xlu1 %v1903_v55, %s3061_s13  ;;  %1913 = vrot.lane.b32.xlu0 %v1904_v23, %s3061_s13  ;;  %v4468_v25 = vpop.permute.xlu1 %2577  ;;  %v4470_v52 = vpop.permute.xlu0 %2548  ;;  %v2186_v55 = vmul.f32 %v4395_v48, %v4488_v27  ;;  %v4501_v23 = vrot.slane %v2208_v24, %v5017_v61  ;;  %v4517_v61 = vrot.slane %v2208_v24, %v5016_v40 }
 0xbb9   : > { %v2261_v40 = vmul.f32 %v4405_v12, %v4444_v21 }
 0xbba   : > { %v2232_v17 = vmul.f32 %v4393_v44, %v4501_v23 }
 0xbbc   : > { %1915 = vrot.lane.b32.xlu1 %v1905_v5, %s3061_s13  ;;  %1917 = vrot.lane.b32.xlu0 %v1906_v31, %s3061_s13  ;;  %v4490_v22 = vpop.permute.xlu1 %2635  ;;  %v4492_v42 = vpop.permute.xlu0 %2606  ;;  %v2187_v5 = vmul.f32 %v4395_v48, %v4504_v57  ;;  %s5021_s13 = smov 91  }
 0xbc0   : > { %1947 = vrot.lane.b32.xlu1 %v1938_v11, %s3062_s14  ;;  %1945 = vrot.lane.b32.xlu0 %v1937_v58, %s3062_s14  ;;  %v4512_v31 = vpop.permute.xlu1 %2693  ;;  %v4514_v11 = vpop.permute.xlu0 %2664  ;;  %v4520_v58 = vrot.slane %v2208_v24, %v5019_v15  ;;  %v2262_v15 = vmul.f32 %v4405_v12, %v4447_v51 }
 0xbc2   : > { %v2234_v48 = vmul.f32 %v4393_v44, %v4520_v58  ;;  %v2350_v3 = vmul.f32 %v4413_v38, %v4520_v58 }
 0xbc4   : > { %1951 = vrot.lane.b32.xlu1 %v1940_v47, %s3062_s14  ;;  %1949 = vrot.lane.b32.xlu0 %v1939_v35, %s3062_s14  ;;  %v2233_v47 = vmul.f32 %v4393_v44, %v4517_v61  ;;  %v2290_v44 = vmul.f32 %v4403_v33, %v4458_v43 }
 0xbc8   : > { %1979 = vrot.lane.b32.xlu1 %v1971_v7, %s3062_s14  ;;  %1981 = vrot.lane.b32.xlu0 %v1972_v41, %s3062_s14 }
 0xbcc   : > { %1983 = vrot.lane.b32.xlu1 %v1973_v6, %s3062_s14  ;;  %1985 = vrot.lane.b32.xlu0 %v1974_v29, %s3062_s14  ;;  %v2263_v29 = vmul.f32 %v4405_v12, %v4461_v37  ;;  %v2319_v12 = vmul.f32 %v4415_v10, %v4485_v49 }
 0xbd0   : > { %2013 = vrot.lane.b32.xlu1 %v2005_v45, %s3062_s14  ;;  %2015 = vrot.lane.b32.xlu0 %v2006_v26, %s3062_s14 }
 0xbd4   : > { %2017 = vrot.lane.b32.xlu1 %v2007_v63, %s3062_s14  ;;  %2019 = vrot.lane.b32.xlu0 %v2008_v18, %s3062_s14  ;;  %v2291_v63 = vmul.f32 %v4403_v33, %v4473_v16  ;;  %v2292_v18 = vmul.f32 %v4403_v33, %v4476_v50  ;;  %v2348_v33 = vmul.f32 %v4413_v38, %v4501_v23 }
 0xbd8   : > { %2049 = vrot.lane.b32.xlu0 %v2040_v32, %s3062_s14  ;;  %2047 = vrot.lane.b32.xlu1 %v2039_v8, %s3062_s14 }
 0xbdc   : > { %2053 = vrot.lane.b32.xlu0 %v2042_v20, %s3062_s14  ;;  %2051 = vrot.lane.b32.xlu1 %v2041_v2, %s3062_s14  ;;  %s5022_s14 = smov 90  }
 0xbe0   : > { %2099 = vrot.lane.b32.xlu0 %v2092_v56, %s3063_s15  ;;  %2097 = vrot.lane.b32.xlu1 %v2091_v4, %s3063_s15 }
 0xbe4   : > { %2101 = vrot.lane.b32.xlu1 %v2093_v14, %s3063_s15  ;;  %2144 = vrot.lane.b32.xlu0 %v2138_v46, %s3063_s15  ;;  %v2349_v14 = vmul.f32 %v4413_v38, %v4517_v61  ;;  %v2378_v38 = vmul.f32 %v4425_v39, %v4447_v51 }
 0xbe8   : > { %2146 = vrot.lane.b32.xlu1 %v2139_v19, %s3063_s15  ;;  %2148 = vrot.lane.b32.xlu0 %v2140_v54, %s3063_s15 }
 0xbec   : > { %2191 = vrot.lane.b32.xlu1 %v2185_v62, %s3063_s15  ;;  %2193 = vrot.lane.b32.xlu0 %v2186_v55, %s3063_s15 }
 0xbf0   : > { %2195 = vrot.lane.b32.xlu1 %v2187_v5, %s3063_s15  ;;  %2238 = vrot.lane.b32.xlu0 %v2232_v17, %s3063_s15  ;;  %v2377_v5 = vmul.f32 %v4425_v39, %v4444_v21 }
 0xbf2   : > { %v1674_v35 = vpop.permute.xlu0 %1673  ;;  %v1676_v7 = vpop.permute.xlu1 %1675 }
 0xbf3   : > { %v1681_v46 = vsel %vm396_vm0, %v1674_v35, %v1676_v7 }
 0xbf4   : > { %2240 = vrot.lane.b32.xlu1 %v2233_v47, %s3063_s15  ;;  %2242 = vrot.lane.b32.xlu0 %v2234_v48, %s3063_s15  ;;  %v1688_v10 = vadd.f32 %v1681_v46, %v4317_v53 }
 0xbf6   : > { %v1678_v41 = vpop.permute.xlu0 %1677  ;;  %v1680_v6 = vpop.permute.xlu1 %1679 }
 0xbf7   : > { %v1682_v62 = vsel %vm396_vm0, %v1676_v7, %v1678_v41  ;;  %v1683_v55 = vsel %vm396_vm0, %v1678_v41, %v1680_v6  ;;  %v1691_v53 = vadd.f32 %v1680_v6, %v4357_v0 }
 0xbf8   : > { %2267 = vrot.lane.b32.xlu1 %v2261_v40, %s3064_s8  ;;  %2269 = vrot.lane.b32.xlu0 %v2262_v15, %s3064_s8  ;;  %v1689_v41 = vadd.f32 %v1682_v62, %v4337_v13 }
 0xbfa   : > { %v1710_v45 = vpop.permute.xlu0 %1709  ;;  %v1708_v26 = vpop.permute.xlu1 %1707 }
 0xbfb   : > { %v1715_v24 = vsel %vm396_vm0, %v1708_v26, %v1710_v45  ;;  %v2406_v26 = vmul.f32 %v4423_v59, %v4458_v43 }
 0xbfc   : > { %2271 = vrot.lane.b32.xlu1 %v2263_v29, %s3064_s8  ;;  %2296 = vrot.lane.b32.xlu0 %v2290_v44, %s3064_s8  ;;  %v1722_v47 = vadd.f32 %v1715_v24, %v1688_v10  ;;  %v1690_v44 = vadd.f32 %v1683_v55, %v4353_v34 }
 0xbfe   : > { %v1714_v32 = vpop.permute.xlu0 %1713  ;;  %v1712_v8 = vpop.permute.xlu1 %1711 }
 0xbff   : > { %v1716_v40 = vsel %vm396_vm0, %v1710_v45, %v1712_v8  ;;  %v1717_v15 = vsel %vm396_vm0, %v1712_v8, %v1714_v32  ;;  %v2379_v45 = vmul.f32 %v4425_v39, %v4461_v37 }
 0xc00   : > { %2298 = vrot.lane.b32.xlu1 %v2291_v63, %s3064_s8  ;;  %2300 = vrot.lane.b32.xlu0 %v2292_v18, %s3064_s8  ;;  %v1725_v63 = vadd.f32 %v1714_v32, %v1691_v53  ;;  %v1723_v18 = vadd.f32 %v1716_v40, %v1689_v41  ;;  %v1724_v13 = vadd.f32 %v1717_v15, %v1690_v44 }
 0xc01   : > { %v2464_v53 = vmul.f32 %v4433_v60, %v4501_v23  ;;  %v2437_v40 = vmul.f32 %v4435_v36, %v4504_v57 }
 0xc02   : > { %v1742_v20 = vpop.permute.xlu0 %1741  ;;  %v1744_v2 = vpop.permute.xlu1 %1743 }
 0xc03   : > { %v1749_v17 = vsel %vm396_vm0, %v1742_v20, %v1744_v2 }
 0xc04   : > { %2325 = vrot.lane.b32.xlu1 %v2319_v12, %s3064_s8  ;;  %2327 = vrot.lane.b32.xlu0 %v2320_v9, %s3064_s8  ;;  %v1756_v29 = vadd.f32 %v1749_v17, %v1722_v47 }
 0xc06   : > { %v1746_v4 = vpop.permute.xlu0 %1745  ;;  %v1748_v56 = vpop.permute.xlu1 %1747 }
 0xc07   : > { %v1750_v0 = vsel %vm396_vm0, %v1744_v2, %v1746_v4  ;;  %v1751_v6 = vsel %vm396_vm0, %v1746_v4, %v1748_v56  ;;  %v1759_v9 = vadd.f32 %v1748_v56, %v1725_v63  ;;  %v2407_v4 = vmul.f32 %v4423_v59, %v4473_v16 }
 0xc08   : > { %2329 = vrot.lane.b32.xlu1 %v2321_v1, %s3064_s8  ;;  %2354 = vrot.lane.b32.xlu0 %v2348_v33, %s3064_s8  ;;  %v1757_v32 = vadd.f32 %v1750_v0, %v1723_v18  ;;  %v1758_v46 = vadd.f32 %v1751_v6, %v1724_v13  ;;  %v2408_v56 = vmul.f32 %v4423_v59, %v4476_v50 }
 0xc09   : > { %v2436_v59 = vmul.f32 %v4435_v36, %v4488_v27  ;;  %v2465_v0 = vmul.f32 %v4433_v60, %v4517_v61  ;;  %v2466_v6 = vmul.f32 %v4433_v60, %v4520_v58 }
 0xc0a   : > { %v1778_v19 = vpop.permute.xlu0 %1777  ;;  %v1776_v54 = vpop.permute.xlu1 %1775 }
 0xc0b   : > { %v1783_v7 = vsel %vm396_vm0, %v1776_v54, %v1778_v19 }
 0xc0c   : > { %2356 = vrot.lane.b32.xlu1 %v2349_v14, %s3064_s8  ;;  %2358 = vrot.lane.b32.xlu0 %v2350_v3, %s3064_s8  ;;  %v1790_v8 = vadd.f32 %v1783_v7, %v1756_v29 }
 0xc0e   : > { %v1782_v48 = vpop.permute.xlu0 %1781  ;;  %v1780_v35 = vpop.permute.xlu1 %1779 }
 0xc0f   : > { %v1784_v20 = vsel %vm396_vm0, %v1778_v19, %v1780_v35  ;;  %v1785_v33 = vsel %vm396_vm0, %v1780_v35, %v1782_v48  ;;  %v1793_v39 = vadd.f32 %v1782_v48, %v1759_v9 }
 0xc10   : > { %2383 = vrot.lane.b32.xlu1 %v2377_v5, %s5020_s12  ;;  %2385 = vrot.lane.b32.xlu0 %v2378_v38, %s5020_s12  ;;  %v1791_v14 = vadd.f32 %v1784_v20, %v1757_v32  ;;  %v1792_v3 = vadd.f32 %v1785_v33, %v1758_v46  ;;  %v2435_v5 = vmul.f32 %v4435_v36, %v4485_v49 }
 0xc11   : > { %v2522_v46 = vmul.f32 %v4449_v28, %v4458_v43 }
 0xc12   : > { %v1810_v34 = vpop.permute.xlu0 %1809  ;;  %v1812_v12 = vpop.permute.xlu1 %1811 }
 0xc13   : > { %v1817_v1 = vsel %vm533_vm1, %v1810_v34, %v1812_v12  ;;  %v2494_v34 = vmul.f32 %v4451_v30, %v4447_v51 }
 0xc14   : > { %v1824_v2 = vadd.f32 %v1817_v1, %v1790_v8  ;;  %2387 = vrot.lane.b32.xlu1 %v2379_v45, %s5020_s12  ;;  %2412 = vrot.lane.b32.xlu0 %v2406_v26, %s5020_s12  ;;  %v2493_v8 = vmul.f32 %v4451_v30, %v4444_v21 }
 0xc16   : > { %v1814_v19 = vpop.permute.xlu0 %1813  ;;  %v1816_v54 = vpop.permute.xlu1 %1815 }
 0xc17   : > { %v1818_v24 = vsel %vm533_vm1, %v1812_v12, %v1814_v19  ;;  %v1819_v10 = vsel %vm533_vm1, %v1814_v19, %v1816_v54  ;;  %v1827_v62 = vadd.f32 %v1816_v54, %v1793_v39  ;;  %v2524_v19 = vmul.f32 %v4449_v28, %v4476_v50 }
 0xc18   : > { %v1825_v55 = vadd.f32 %v1818_v24, %v1791_v14  ;;  %v1826_v17 = vadd.f32 %v1819_v10, %v1792_v3  ;;  %2414 = vrot.lane.b32.xlu1 %v2407_v4, %s5020_s12  ;;  %2416 = vrot.lane.b32.xlu0 %v2408_v56, %s5020_s12  ;;  %v2523_v3 = vmul.f32 %v4449_v28, %v4473_v16 }
 0xc1a   : > { %v1846_v38 = vpop.permute.xlu0 %1845  ;;  %v1844_v47 = vpop.permute.xlu1 %1843 }
 0xc1b   : > { %v1851_v48 = vsel %vm533_vm1, %v1844_v47, %v1846_v38 }
 0xc1c   : > { %v1858_v35 = vadd.f32 %v1851_v48, %v1824_v2  ;;  %2441 = vrot.lane.b32.xlu1 %v2435_v5, %s5020_s12  ;;  %2443 = vrot.lane.b32.xlu0 %v2436_v59, %s5020_s12  ;;  %v2495_v2 = vmul.f32 %v4451_v30, %v4461_v37  ;;  %v2551_v5 = vmul.f32 %v4470_v52, %v4485_v49 }
 0xc1d   : > { %v2552_v59 = vmul.f32 %v4470_v52, %v4488_v27 }
 0xc1e   : > { %v1850_v15 = vpop.permute.xlu0 %1849  ;;  %v1848_v7 = vpop.permute.xlu1 %1847 }
 0xc1f   : > { %v1861_v41 = vadd.f32 %v1850_v15, %v1827_v62  ;;  %v1852_v44 = vsel %vm533_vm1, %v1846_v38, %v1848_v7  ;;  %v1853_v29 = vsel %vm533_vm1, %v1848_v7, %v1850_v15 }
 0xc20   : > { %v1859_v26 = vadd.f32 %v1852_v44, %v1825_v55  ;;  %v1860_v63 = vadd.f32 %v1853_v29, %v1826_v17  ;;  %2445 = vrot.lane.b32.xlu1 %v2437_v40, %s5020_s12  ;;  %2470 = vrot.lane.b32.xlu0 %v2464_v53, %s5020_s12  ;;  %v2553_v53 = vmul.f32 %v4470_v52, %v4504_v57 }
 0xc22   : > { %v1878_v36 = vpop.permute.xlu0 %1877  ;;  %v1880_v45 = vpop.permute.xlu1 %1879 }
 0xc23   : > { %v1885_v18 = vsel %vm533_vm1, %v1878_v36, %v1880_v45 }
 0xc24   : > { %v1892_v13 = vadd.f32 %v1885_v18, %v1858_v35  ;;  %2472 = vrot.lane.b32.xlu1 %v2465_v0, %s5020_s12  ;;  %2474 = vrot.lane.b32.xlu0 %v2466_v6, %s5020_s12  ;;  %v2580_v35 = vmul.f32 %v4468_v25, %v4501_v23  ;;  %v2582_v0 = vmul.f32 %v4468_v25, %v4520_v58  ;;  %s2999_s12 = sshll.u32 %s3070_s9, 4  ;;  %s3000_s12 = int_to_ptr.vmem [resolvable:$false] %s2999_s12 }
 0xc25   : > { %v2609_v18 = vmul.f32 %v4492_v42, %v4444_v21  ;;  %v2611_v21 = vmul.f32 %v4492_v42, %v4461_v37 }
 0xc26   : > { %v1882_v12 = vpop.permute.xlu0 %1881  ;;  %v1884_v9 = vpop.permute.xlu1 %1883 }
 0xc27   : > { %v1886_v20 = vsel %vm533_vm1, %v1880_v45, %v1882_v12  ;;  %v1887_v60 = vsel %vm533_vm1, %v1882_v12, %v1884_v9  ;;  %v1895_v33 = vadd.f32 %v1884_v9, %v1861_v41 }
 0xc28   : > { %v1893_v1 = vadd.f32 %v1886_v20, %v1859_v26  ;;  %v1894_v32 = vadd.f32 %v1887_v60, %v1860_v63  ;;  %2499 = vrot.lane.b32.xlu1 %v2493_v8, %s5021_s13  ;;  %2501 = vrot.lane.b32.xlu0 %v2494_v34, %s5021_s13  ;;  %v2581_v63 = vmul.f32 %v4468_v25, %v4517_v61 }
 0xc2a   : > { %v1914_v39 = vpop.permute.xlu0 %1913  ;;  %v1912_v4 = vpop.permute.xlu1 %1911 }
 0xc2b   : > { %v1919_v56 = vsel %vm533_vm1, %v1912_v4, %v1914_v39 }
 0xc2c   : > { %v1926_v14 = vadd.f32 %v1919_v56, %v1892_v13  ;;  %2503 = vrot.lane.b32.xlu1 %v2495_v2, %s5021_s13  ;;  %2528 = vrot.lane.b32.xlu0 %v2522_v46, %s5021_s13  ;;  %v2610_v13 = vmul.f32 %v4492_v42, %v4447_v51  ;;  %v2639_v2 = vmul.f32 %v4490_v22, %v4473_v16  ;;  %v2718_v16 = vld [vmem:[%s4868_s4] sm:$0xf] }
 0xc2e   : > { %v1918_v54 = vpop.permute.xlu0 %1917  ;;  %v1916_v24 = vpop.permute.xlu1 %1915 }
 0xc2f   : > { %v1929_v10 = vadd.f32 %v1918_v54, %v1895_v33  ;;  %v1920_v30 = vsel %vm533_vm1, %v1914_v39, %v1916_v24  ;;  %v1921_v62 = vsel %vm533_vm1, %v1916_v24, %v1918_v54  ;;  %v2638_v33 = vmul.f32 %v4490_v22, %v4458_v43 }
 0xc30   : > { %v1927_v55 = vadd.f32 %v1920_v30, %v1893_v1  ;;  %v1928_v17 = vadd.f32 %v1921_v62, %v1894_v32  ;;  %2530 = vrot.lane.b32.xlu1 %v2523_v3, %s5021_s13  ;;  %2532 = vrot.lane.b32.xlu0 %v2524_v19, %s5021_s13  ;;  %v2640_v39 = vmul.f32 %v4490_v22, %v4476_v50 }
 0xc31   : > { %v2667_v50 = vmul.f32 %v4514_v11, %v4485_v49  ;;  %v2669_v30 = vmul.f32 %v4514_v11, %v4504_v57  ;;  %v2697_v57 = vmul.f32 %v4512_v31, %v4517_v61 }
 0xc32   : > { %v1946_v28 = vpop.permute.xlu0 %1945  ;;  %v1948_v38 = vpop.permute.xlu1 %1947 }
 0xc33   : > { %v1953_v47 = vsel %vm670_vm2, %v1946_v28, %v1948_v38 }
 0xc34   : > { %v1960_v48 = vadd.f32 %v1953_v47, %v1926_v14  ;;  %2557 = vrot.lane.b32.xlu1 %v2551_v5, %s5021_s13  ;;  %2559 = vrot.lane.b32.xlu0 %v2552_v59, %s5021_s13 }
 0xc36   : > { %v1950_v40 = vpop.permute.xlu0 %1949  ;;  %v1952_v15 = vpop.permute.xlu1 %1951 }
 0xc37   : > { %v1954_v7 = vsel %vm670_vm2, %v1948_v38, %v1950_v40  ;;  %v1955_v41 = vsel %vm670_vm2, %v1950_v40, %v1952_v15  ;;  %v1963_v44 = vadd.f32 %v1952_v15, %v1929_v10  ;;  %v2668_v10 = vmul.f32 %v4514_v11, %v4488_v27 }
 0xc38   : > { %v1961_v29 = vadd.f32 %v1954_v7, %v1927_v55  ;;  %v1962_v26 = vadd.f32 %v1955_v41, %v1928_v17  ;;  %2586 = vrot.lane.b32.xlu0 %v2580_v35, %s5021_s13  ;;  %2561 = vrot.lane.b32.xlu1 %v2553_v53, %s5021_s13  ;;  %v2696_v27 = vmul.f32 %v4512_v31, %v4501_v23  ;;  %v2728_v53 = vld [vmem:[%s3206_s11 + $0x4] sm:$0xff] }
 0xc39   : > { %v2698_v40 = vmul.f32 %v4512_v31, %v4520_v58 }
 0xc3a   : > { %v1982_v52 = vpop.permute.xlu0 %1981  ;;  %v1980_v6 = vpop.permute.xlu1 %1979 }
 0xc3b   : > { %v1987_v36 = vsel %vm670_vm2, %v1980_v6, %v1982_v52 }
 0xc3c   : > { %v1994_v45 = vadd.f32 %v1987_v36, %v1960_v48  ;;  %2590 = vrot.lane.b32.xlu0 %v2582_v0, %s5021_s13  ;;  %2588 = vrot.lane.b32.xlu1 %v2581_v63, %s5021_s13  ;;  %s3001_s13 = scalar_lea.vmem %s3000_s12, 384 }
 0xc3e   : > { %v1986_v8 = vpop.permute.xlu0 %1985  ;;  %v1984_v34 = vpop.permute.xlu1 %1983 }
 0xc3f   : > { %v1997_v12 = vadd.f32 %v1986_v8, %v1963_v44  ;;  %v1988_v25 = vsel %vm670_vm2, %v1982_v52, %v1984_v34  ;;  %v1989_v9 = vsel %vm670_vm2, %v1984_v34, %v1986_v8 }
 0xc40   : > { %v1995_v20 = vadd.f32 %v1988_v25, %v1961_v29  ;;  %v1996_v60 = vadd.f32 %v1989_v9, %v1962_v26  ;;  %2617 = vrot.lane.b32.xlu0 %v2610_v13, %s5022_s14  ;;  %2615 = vrot.lane.b32.xlu1 %v2609_v18, %s5022_s14  ;;  %v2732_v29 = vcombine.high %v2728_v53, %v2728_v53  ;;  %v2729_v26 = vld [vmem:[%s3206_s11 + $0xc] sm:$0xf]  ;;  %s5023_s11 = smov 19  }
 0xc42   : > { %v2016_v51 = vpop.permute.xlu0 %2015  ;;  %v2014_v1 = vpop.permute.xlu1 %2013 }
 0xc43   : > { %v2021_v32 = vsel %vm670_vm2, %v2014_v1, %v2016_v51 }
 0xc44   : > { %v2028_v46 = vadd.f32 %v2021_v32, %v1994_v45  ;;  %2644 = vrot.lane.b32.xlu0 %v2638_v33, %s5022_s14  ;;  %2619 = vrot.lane.b32.xlu1 %v2611_v21, %s5022_s14 }
 0xc46   : > { %v2020_v4 = vpop.permute.xlu0 %2019  ;;  %v2018_v43 = vpop.permute.xlu1 %2017 }
 0xc47   : > { %v2031_v56 = vadd.f32 %v2020_v4, %v1997_v12  ;;  %v2022_v37 = vsel %vm670_vm2, %v2016_v51, %v2018_v43  ;;  %v2023_v42 = vsel %vm670_vm2, %v2018_v43, %v2020_v4 }
 0xc48   : > { %v2029_v14 = vadd.f32 %v2022_v37, %v1995_v20  ;;  %v2030_v3 = vadd.f32 %v2023_v42, %v1996_v60  ;;  %2648 = vrot.lane.b32.xlu0 %v2640_v39, %s5022_s14  ;;  %2646 = vrot.lane.b32.xlu1 %v2639_v2, %s5022_s14 }
 0xc4a   : > { %v2050_v22 = vpop.permute.xlu0 %2049  ;;  %v2048_v19 = vpop.permute.xlu1 %2047 }
 0xc4b   : > { %v2055_v54 = vsel %vm670_vm2, %v2048_v19, %v2050_v22 }
 0xc4c   : > { %v2062_v24 = vadd.f32 %v2055_v54, %v2028_v46  ;;  %2673 = vrot.lane.b32.xlu0 %v2667_v50, %s5022_s14  ;;  %2721 = vperm.xlu1 %2993, %v2718_v16  }
 0xc4e   : > { %v2054_v62 = vpop.permute.xlu0 %2053  ;;  %v2052_v55 = vpop.permute.xlu1 %2051 }
 0xc4f   : > { %v2065_v17 = vadd.f32 %v2054_v62, %v2031_v56  ;;  %v2056_v49 = vsel %vm670_vm2, %v2050_v22, %v2052_v55  ;;  %v2057_v5 = vsel %vm670_vm2, %v2052_v55, %v2054_v62 }
 0xc50   : > { %v2063_v59 = vadd.f32 %v2056_v49, %v2029_v14  ;;  %v2064_v28 = vadd.f32 %v2057_v5, %v2030_v3  ;;  %2677 = vrot.lane.b32.xlu0 %v2669_v30, %s5022_s14  ;;  %2675 = vrot.lane.b32.xlu1 %v2668_v10, %s5022_s14 }
 0xc52   : > { %v2100_v11 = vpop.permute.xlu0 %2099  ;;  %v2098_v38 = vpop.permute.xlu1 %2097 }
 0xc53   : > { %v2103_v47 = vsel %vm821_vm3, %v2098_v38, %v2100_v11  ;;  %v2109_v48 = vadd.f32 %v2098_v38, %v2062_v24 }
 0xc54   : > { %v2110_v35 = vadd.f32 %v2103_v47, %v2063_v59  ;;  %2704 = vrot.lane.b32.xlu0 %v2697_v57, %s5022_s14  ;;  %2702 = vrot.lane.b32.xlu1 %v2696_v27, %s5022_s14 }
 0xc56   : > { %v2145_v15 = vpop.permute.xlu0 %2144  ;;  %v2102_v23 = vpop.permute.xlu1 %2101 }
 0xc57   : > { %v2156_v7 = vadd.f32 %v2145_v15, %v2109_v48  ;;  %v2104_v61 = vsel %vm821_vm3, %v2100_v11, %v2102_v23  ;;  %v2112_v41 = vadd.f32 %v2102_v23, %v2065_v17 }
 0xc58   : > { %v2111_v44 = vadd.f32 %v2104_v61, %v2064_v28  ;;  %2706 = vrot.lane.b32.xlu1 %v2698_v40, %s5022_s14  ;;  %2733 = vrot.lane.b32.xlu0 %v2728_v53, %s3063_s15 }
 0xc5a   : > { %v2149_v63 = vpop.permute.xlu0 %2148  ;;  %v2147_v0 = vpop.permute.xlu1 %2146 }
 0xc5b   : > { %v2159_v52 = vadd.f32 %v2149_v63, %v2112_v41  ;;  %v2150_v6 = vsel %vm821_vm3, %v2145_v15, %v2147_v0  ;;  %v2151_v31 = vsel %vm821_vm3, %v2147_v0, %v2149_v63 }
 0xc5c   : > { %v2157_v58 = vadd.f32 %v2150_v6, %v2110_v35  ;;  %v2158_v36 = vadd.f32 %v2151_v31, %v2111_v44  ;;  %2737 = vrot.lane.b32.xlu0 %v2729_v26, %s3063_s15  ;;  %2735 = vrot.lane.b32.xlu1 %v2732_v29, %s3063_s15  ;;  %s215_s15 = sand.u32 1, %s3049_s19  }
 0xc5d   : > { %s2934_s30 = smul.u32 12, %s215_s15  ;;  %s2774_s22 = scalar_lea.sflag [#allocation4], %s215_s15 }
 0xc5e   : > { %v2194_v45 = vpop.permute.xlu0 %2193  ;;  %v2192_v18 = vpop.permute.xlu1 %2191 }
 0xc5f   : > { %v2197_v13 = vsel %vm821_vm3, %v2192_v18, %v2194_v45  ;;  %v2203_v8 = vadd.f32 %v2192_v18, %v2156_v7  ;;  %s217_s17 = scalar_lea.vmem [#allocation3], %s2934_s30 }
 0xc60   : > { %v2204_v34 = vadd.f32 %v2197_v13, %v2157_v58  ;;  %s2788_s23 = sshll.u32 %s217_s17, 4  ;;  %s4822_s23 = int_to_ptr.vmem [resolvable:$true] %s2788_s23 }
 0xc61   : > { %s2995_s6 = scalar_lea.vmem %s4822_s23, 192  ;;  %p3002_p0 = scmp.lt.s32.totalorder %s4822_s23, %s3000_s12 }
 0xc62   : > { %v2239_v12 = vpop.permute.xlu0 %2238  ;;  %v2196_v25 = vpop.permute.xlu1 %2195  ;;  %p2996_p11 = scmp.ne.s32.totalorder %s4822_s23, %s2995_s6  ;;  %p3003_p1 = scmp.lt.s32.totalorder %s3001_s13, %s2995_s6 }
 0xc63   : > { %v2250_v9 = vadd.f32 %v2239_v12, %v2203_v8  ;;  %v2198_v20 = vsel %vm821_vm3, %v2194_v45, %v2196_v25  ;;  %v2206_v60 = vadd.f32 %v2196_v25, %v2159_v52 }
 0xc64   : > { %v2205_v33 = vadd.f32 %v2198_v20, %v2158_v36  ;;  %p2997_p12 = pnand %p2996_p11, %p3139_p5  ;;  %p3004_p2 = por %p3003_p1, %p3002_p0 }
 0xc66   : > { %v2243_v21 = vpop.permute.xlu0 %2242  ;;  %v2241_v51 = vpop.permute.xlu1 %2240  ;;  %p2998_p13 = pneg %p2997_p12 }
 0xc67   : > { %v2253_v1 = vadd.f32 %v2243_v21, %v2206_v60  ;;  %v2244_v32 = vsel %vm821_vm3, %v2239_v12, %v2241_v51  ;;  %v2245_v46 = vsel %vm821_vm3, %v2241_v51, %v2243_v21 }
 0xc68   : > { %v2251_v2 = vadd.f32 %v2244_v32, %v2204_v34  ;;  %v2252_v39 = vadd.f32 %v2245_v46, %v2205_v33  ;;  %p3005_p3 = pnand %p3004_p2, %p2998_p13 }
 0xc6a   : > { %v2270_v4 = vpop.permute.xlu0 %2269  ;;  %v2268_v43 = vpop.permute.xlu1 %2267 }
 0xc6b   : > { %v2273_v56 = vsel %vm992_vm4, %v2268_v43, %v2270_v4  ;;  %v2279_v37 = vadd.f32 %v2268_v43, %v2250_v9 }
 0xc6c   : > { %v2280_v42 = vadd.f32 %v2273_v56, %v2251_v2 }
 0xc6e   : > { %v2297_v14 = vpop.permute.xlu0 %2296  ;;  %v2272_v3 = vpop.permute.xlu1 %2271 }
 0xc6f   : > { %v2308_v16 = vadd.f32 %v2297_v14, %v2279_v37  ;;  %v2274_v50 = vsel %vm992_vm4, %v2270_v4, %v2272_v3  ;;  %v2282_v45 = vadd.f32 %v2272_v3, %v2253_v1 }
 0xc70   : > { %v2281_v22 = vadd.f32 %v2274_v50, %v2252_v39 }
 0xc72   : > { %v2301_v19 = vpop.permute.xlu0 %2300  ;;  %v2299_v54 = vpop.permute.xlu1 %2298 }
 0xc73   : > { %v2302_v24 = vsel %vm992_vm4, %v2297_v14, %v2299_v54  ;;  %v2303_v18 = vsel %vm992_vm4, %v2299_v54, %v2301_v19  ;;  %v2311_v12 = vadd.f32 %v2301_v19, %v2282_v45 }
 0xc74   : > { %v2309_v10 = vadd.f32 %v2302_v24, %v2280_v42  ;;  %v2310_v60 = vadd.f32 %v2303_v18, %v2281_v22 }
 0xc76   : > { %v2328_v30 = vpop.permute.xlu0 %2327  ;;  %v2326_v62 = vpop.permute.xlu1 %2325 }
 0xc77   : > { %v2331_v13 = vsel %vm992_vm4, %v2326_v62, %v2328_v30  ;;  %v2337_v8 = vadd.f32 %v2326_v62, %v2308_v16 }
 0xc78   : > { %v2338_v33 = vadd.f32 %v2331_v13, %v2309_v10 }
 0xc7a   : > { %v2355_v55 = vpop.permute.xlu0 %2354  ;;  %v2330_v17 = vpop.permute.xlu1 %2329 }
 0xc7b   : > { %v2366_v25 = vadd.f32 %v2355_v55, %v2337_v8  ;;  %v2332_v9 = vsel %vm992_vm4, %v2328_v30, %v2330_v17  ;;  %v2340_v51 = vadd.f32 %v2330_v17, %v2311_v12 }
 0xc7c   : > { %v2339_v2 = vadd.f32 %v2332_v9, %v2310_v60 }
 0xc7e   : > { %v2359_v49 = vpop.permute.xlu0 %2358  ;;  %v2357_v5 = vpop.permute.xlu1 %2356 }
 0xc7f   : > { %v2360_v20 = vsel %vm992_vm4, %v2355_v55, %v2357_v5  ;;  %v2361_v1 = vsel %vm992_vm4, %v2357_v5, %v2359_v49  ;;  %v2369_v4 = vadd.f32 %v2359_v49, %v2340_v51 }
 0xc80   : > { %v2367_v39 = vadd.f32 %v2360_v20, %v2338_v33  ;;  %v2368_v42 = vadd.f32 %v2361_v1, %v2339_v2 }
 0xc82   : > { %v2386_v59 = vpop.permute.xlu0 %2385  ;;  %v2384_v28 = vpop.permute.xlu1 %2383 }
 0xc83   : > { %v2389_v32 = vsel %vm1109_vm5, %v2384_v28, %v2386_v59  ;;  %v2395_v46 = vadd.f32 %v2384_v28, %v2366_v25 }
 0xc84   : > { %v2396_v14 = vadd.f32 %v2389_v32, %v2367_v39 }
 0xc86   : > { %v2413_v27 = vpop.permute.xlu0 %2412  ;;  %v2388_v57 = vpop.permute.xlu1 %2387 }
 0xc87   : > { %v2424_v43 = vadd.f32 %v2413_v27, %v2395_v46  ;;  %v2390_v56 = vsel %vm1109_vm5, %v2386_v59, %v2388_v57  ;;  %v2398_v16 = vadd.f32 %v2388_v57, %v2369_v4 }
 0xc88   : > { %v2397_v54 = vadd.f32 %v2390_v56, %v2368_v42 }
 0xc8a   : > { %v2417_v11 = vpop.permute.xlu0 %2416  ;;  %v2415_v38 = vpop.permute.xlu1 %2414 }
 0xc8b   : > { %v2418_v37 = vsel %vm1109_vm5, %v2413_v27, %v2415_v38  ;;  %v2419_v50 = vsel %vm1109_vm5, %v2415_v38, %v2417_v11  ;;  %v2427_v30 = vadd.f32 %v2417_v11, %v2398_v16 }
 0xc8c   : > { %v2425_v24 = vadd.f32 %v2418_v37, %v2396_v14  ;;  %v2426_v49 = vadd.f32 %v2419_v50, %v2397_v54 }
 0xc8e   : > { %v2444_v47 = vpop.permute.xlu0 %2443  ;;  %v2442_v48 = vpop.permute.xlu1 %2441 }
 0xc8f   : > { %v2447_v22 = vsel %vm1109_vm5, %v2442_v48, %v2444_v47  ;;  %v2453_v19 = vadd.f32 %v2442_v48, %v2424_v43 }
 0xc90   : > { %v2454_v5 = vadd.f32 %v2447_v22, %v2425_v24 }
 0xc92   : > { %v2471_v35 = vpop.permute.xlu0 %2470  ;;  %v2446_v53 = vpop.permute.xlu1 %2445 }
 0xc93   : > { %v2482_v62 = vadd.f32 %v2471_v35, %v2453_v19  ;;  %v2448_v55 = vsel %vm1109_vm5, %v2444_v47, %v2446_v53  ;;  %v2456_v59 = vadd.f32 %v2446_v53, %v2427_v30 }
 0xc94   : > { %v2455_v38 = vadd.f32 %v2448_v55, %v2426_v49 }
 0xc96   : > { %v2475_v40 = vpop.permute.xlu0 %2474  ;;  %v2473_v15 = vpop.permute.xlu1 %2472 }
 0xc97   : > { %v2476_v17 = vsel %vm1109_vm5, %v2471_v35, %v2473_v15  ;;  %v2477_v28 = vsel %vm1109_vm5, %v2473_v15, %v2475_v40  ;;  %v2485_v18 = vadd.f32 %v2475_v40, %v2456_v59 }
 0xc98   : > { %v2483_v45 = vadd.f32 %v2476_v17, %v2454_v5  ;;  %v2484_v35 = vadd.f32 %v2477_v28, %v2455_v38 }
 0xc9a   : > { %v2502_v23 = vpop.permute.xlu0 %2501  ;;  %v2500_v7 = vpop.permute.xlu1 %2499 }
 0xc9b   : > { %v2505_v27 = vsel %vm1226_vm6, %v2500_v7, %v2502_v23  ;;  %v2511_v57 = vadd.f32 %v2500_v7, %v2482_v62 }
 0xc9c   : > { %v2512_v8 = vadd.f32 %v2505_v27, %v2483_v45 }
 0xc9e   : > { %v2529_v61 = vpop.permute.xlu0 %2528  ;;  %v4733_v41 = vpop.permute.xlu1 %2503 }
 0xc9f   : > { %v2540_v13 = vadd.f32 %v2529_v61, %v2511_v57  ;;  %v2506_v11 = vsel %vm1226_vm6, %v2502_v23, %v4733_v41  ;;  %v2514_v53 = vadd.f32 %v4733_v41, %v2485_v18 }
 0xca0   : > { %v2513_v25 = vadd.f32 %v2506_v11, %v2484_v35 }
 0xca2   : > { %v4735_v44 = vpop.permute.xlu0 %2532  ;;  %v4737_v29 = vpop.permute.xlu1 %2530 }
 0xca3   : > { %v2534_v47 = vsel %vm1226_vm6, %v2529_v61, %v4737_v29  ;;  %v2535_v15 = vsel %vm1226_vm6, %v4737_v29, %v4735_v44  ;;  %v2543_v23 = vadd.f32 %v4735_v44, %v2514_v53 }
 0xca4   : > { %v2541_v9 = vadd.f32 %v2534_v47, %v2512_v8  ;;  %v2542_v29 = vadd.f32 %v2535_v15, %v2513_v25 }
 0xca6   : > { %v4739_v26 = vpop.permute.xlu0 %2559  ;;  %v2558_v63 = vpop.permute.xlu1 %2557 }
 0xca7   : > { %v2563_v7 = vsel %vm1226_vm6, %v2558_v63, %v4739_v26  ;;  %v2569_v40 = vadd.f32 %v2558_v63, %v2540_v13 }
 0xca8   : > { %v2570_v33 = vadd.f32 %v2563_v7, %v2541_v9 }
 0xcaa   : > { %v4741_v0 = vpop.permute.xlu0 %2586  ;;  %v4745_v6 = vpop.permute.xlu1 %2561 }
 0xcab   : > { %v2598_v61 = vadd.f32 %v4741_v0, %v2569_v40  ;;  %v2564_v60 = vsel %vm1226_vm6, %v4739_v26, %v4745_v6  ;;  %v2572_v51 = vadd.f32 %v4745_v6, %v2543_v23 }
 0xcac   : > { %v2571_v32 = vadd.f32 %v2564_v60, %v2542_v29 }
 0xcae   : > { %v4743_v52 = vpop.permute.xlu0 %2590  ;;  %v4749_v58 = vpop.permute.xlu1 %2588 }
 0xcaf   : > { %v2592_v41 = vsel %vm1226_vm6, %v4741_v0, %v4749_v58  ;;  %v2593_v63 = vsel %vm1226_vm6, %v4749_v58, %v4743_v52  ;;  %v2601_v0 = vadd.f32 %v4743_v52, %v2572_v51 }
 0xcb0   : > { %v2599_v26 = vadd.f32 %v2592_v41, %v2570_v33  ;;  %v2600_v4 = vadd.f32 %v2593_v63, %v2571_v32 }
 0xcb2   : > { %v4747_v31 = vpop.permute.xlu0 %2617  ;;  %v4755_v34 = vpop.permute.xlu1 %2615 }
 0xcb3   : > { %v2621_v44 = vsel %vm1343_vm7, %v4755_v34, %v4747_v31  ;;  %v2627_v1 = vadd.f32 %v4755_v34, %v2598_v61 }
 0xcb4   : > { %v2628_v43 = vadd.f32 %v2621_v44, %v2599_v26 }
 0xcb6   : > { %v4751_v36 = vpop.permute.xlu0 %2644  ;;  %v2620_v3 = vpop.permute.xlu1 %2619 }
 0xcb7   : > { %v2656_v39 = vadd.f32 %v4751_v36, %v2627_v1  ;;  %v2622_v6 = vsel %vm1343_vm7, %v4747_v31, %v2620_v3  ;;  %v2630_v56 = vadd.f32 %v2620_v3, %v2601_v0 }
 0xcb8   : > { %v2629_v14 = vadd.f32 %v2622_v6, %v2600_v4 }
 0xcba   : > { %v4759_v21 = vpop.permute.xlu0 %2648  ;;  %v2647_v48 = vpop.permute.xlu1 %2646 }
 0xcbb   : > { %v2650_v58 = vsel %vm1343_vm7, %v4751_v36, %v2647_v48  ;;  %v2651_v34 = vsel %vm1343_vm7, %v2647_v48, %v4759_v21  ;;  %v2659_v22 = vadd.f32 %v4759_v21, %v2630_v56 }
 0xcbc   : > { %v2657_v16 = vadd.f32 %v2650_v58, %v2628_v43  ;;  %v2658_v54 = vadd.f32 %v2651_v34, %v2629_v14 }
 0xcbe   : > { %v2674_v10 = vpop.permute.xlu0 %2673 }
 0xcbf   : > { %v2685_v37 = vadd.f32 %v2674_v10, %v2656_v39 }
 0xcc2   : > { %v2678_v12 = vpop.permute.xlu0 %2677 }
 0xcc3   : > { %v2688_v3 = vadd.f32 %v2678_v12, %v2659_v22 }
 0xcc6   : > { %v2705_v46 = vpop.permute.xlu0 %2704 }
 0xcca   : > { %v2734_v50 = vpop.permute.xlu0 %2733 }
 0xccb   : > { %v2722_v20 = vpop.permute.xlu1 %2721 }
 0xcce   : > { %v2738_v59 = vpop.permute.xlu0 %2737 }
 0xccf   : > { %v2676_v2 = vpop.permute.xlu1 %2675 }
 0xcd0   : > { %v2679_v42 = vsel %vm1343_vm7, %v2674_v10, %v2676_v2  ;;  %v2680_v31 = vsel %vm1343_vm7, %v2676_v2, %v2678_v12 }
 0xcd1   : > { %v2686_v24 = vadd.f32 %v2679_v42, %v2657_v16  ;;  %v2687_v30 = vadd.f32 %v2680_v31, %v2658_v54 }
 0xcd3   : > { %v2703_v52 = vpop.permute.xlu1 %2702 }
 0xcd4   : > { %v2708_v19 = vsel %vm1343_vm7, %v2703_v52, %v2705_v46  ;;  %v2714_v36 = vadd.f32 %v2703_v52, %v2685_v37 }
 0xcd5   : > { %v2715_v62 = vadd.f32 %v2708_v19, %v2686_v24 }
 0xcd6   : > { %v2724_v55 = vadd.f32 %v2722_v20, %v2714_v36 }
 0xcd7   : > { %v2707_v17 = vpop.permute.xlu1 %2706  ;;  %v2725_v21 = vadd.f32 %v2722_v20, %v2715_v62 }
 0xcd8   : > { %v2709_v10 = vsel %vm1343_vm7, %v2705_v46, %v2707_v17  ;;  %v2717_v49 = vadd.f32 %v2707_v17, %v2688_v3  ;;  %v2745_v27 = vadd.f32 %v2734_v50, %v2724_v55 }
 0xcd9   : > { %v2716_v5 = vadd.f32 %v2709_v10, %v2687_v30 }
 0xcda   : > { %v2727_v28 = vadd.f32 %v2722_v20, %v2717_v49  ;;  %v2749_v35 = vmax.f32 %v2745_v27, 0.0 }
 0xcdb   : > { %v2726_v57 = vadd.f32 %v2722_v20, %v2716_v5  ;;  %v2736_v38 = vpop.permute.xlu1 %2735 }
 0xcdc   : > { %v2748_v45 = vadd.f32 %v2738_v59, %v2727_v28  ;;  %v2739_v48 = vsel %vm821_vm3, %v2734_v50, %v2736_v38  ;;  %v2740_v18 = vsel %vm821_vm3, %v2736_v38, %v2738_v59 }
 0xcdd   : > { %v2746_v13 = vadd.f32 %v2739_v48, %v2725_v21  ;;  %v2747_v11 = vadd.f32 %v2740_v18, %v2726_v57 }
 0xcde   : > { %v2752_v47 = vmax.f32 %v2748_v45, 0.0 }
 0xcdf   : > { %v2750_v8 = vmax.f32 %v2746_v13, 0.0  ;;  %v2751_v12 = vmax.f32 %v2747_v11, 0.0 }
 0xce1   : > { %v2757_v53 = vcombine.low %v2749_v35, %v2750_v8  ;;  %v2758_v15 = vcombine.low %v2751_v12, %v2752_v47 }
 0xce3   : > { %2761 = vrot.lane.b32.xlu0 %v2758_v15, %s5023_s11  ;;  %2759 = vrot.lane.b32.xlu1 %v2757_v53, %s5023_s11 }
 0xd55   : > { %v2762_v7 = vpop.permute.xlu0 %2761  ;;  %v2760_v40 = vpop.permute.xlu1 %2759 }
 0xd56   : > { %v2764_v25 = vrot.slane %v2762_v7, 4  ;;  %v2763_v9 = vrot.slane %v2760_v40, 4 }
 0xd58   : > { %v2768_v20 = vsel %vm1489_vm8, %v2762_v7, %v2764_v25  ;;  %v2766_v23 = vsel %vm2765_vm13, %v2763_v9, %v2764_v25 }
 0xd59   : > { %2772 = vst.msk [vmem:[%s217_s17 + $0x8] sm:$0xf] %vm1506_vm12, %v2768_v20  ;;  %v2767_v61 = vsel %vm1489_vm8, %v2760_v40, %v2766_v23 }
 0xd5a   : > { %2771 = vst [vmem:[%s217_s17] sm:$0xff] %v2767_v61 }
 0xd5b   : > { %3008 = shalt.err (!%p3005_p3)
}
 0xd5c   : > { %s3009_s14 = scalar_lea.hbm %s4820_s26, 192  ;;  %s3013_s11 = scalar_lea.hbm %s4869_s5, 384 }
 0xd5d   : > { %p3010_p4 = scmp.ne.s32.totalorder %s4820_s26, %s3009_s14  ;;  %p3014_p9 = scmp.lt.u32.totalorder %s4820_s26, %s4869_s5 }
 0xd5e   : > { %p3015_p10 = scmp.lt.u32.totalorder %s3013_s11, %s3009_s14  ;;  %p3017_p12 = scmp.lt.u32.totalorder %s3009_s14, %s4820_s26 }
 0xd5f   : > { %p3011_p7 = pnand %p3010_p4, %p3139_p5 }
 0xd60   : > { %p3016_p11 = por %p3015_p10, %p3014_p9 }
 0xd61   : > { %p3012_p8 = pneg %p3011_p7 }
 0xd62   : > { %p3018_p13 = por %p3017_p12, %p3016_p11 }
 0xd64   : > { %p3019_p0 = pnand %p3018_p13, %p3012_p8 }
 0xd66   : > { %3022 = shalt.err (!%p3019_p0)
}
 0xd67   : > { %2942 = dma.vmem_to_hbm [thread:$0]  (%p3139_p5), %s4822_s23, 192, %s4820_s26, %s2774_s22  }
 0xd68 PF: > { %p2948_p1 = scmp.ge.s32.totalorder %s3057_s21, 2  ;;  %s2800_s16 = sand.u32 1, %s3045_s18  }
 0xd69   : > { %s2801_s17 = scalar_lea.sflag [#allocation4], %s2800_s16 }
 0xd6a   : > { %p2945_p2 = pnand %p2948_p1, %p3143_p6 }
 0xd6c   : > { %3040 = dma.done.wait (!%p2945_p2), %s2801_s17, 192  }
 0xd6d   : > { %3042 = vsyncadd (!%p2945_p2), %s2801_s17, 4294967104  ;;  %p15_p3 = scmp.ge.s32.totalorder %s3126_s24, 4   ;;  %s5024_s18 = smov %s3049_s19 }
 0xd6e   : > { %s5025_s19 = smov %s3053_s20  ;;  %s5026_s20 = smov %s3137_s27 }
 0xd6f   : > { %s5027_s21 = smov %s3126_s24  ;;  %17 = sbr.rel (!%p15_p3) target bundleno = 3 (0x3), region = 159 }
 0xd76   :  { %2806 = vsyncpa [#allocation4], 1 }
 0xd77   :  { %2808 = vsyncpa [#allocation4 + $0x1], 1 }

</bundles_post_ra>
